<compile_context>
chip_gen: v7x
topology: tpu7x:2x2x1
jax: 0.10.0
libtpu: 0.0.40
codegen_flags: <defaults>
</compile_context>

<pallas_src>
import functools

import jax
import jax.numpy as jnp
from jax.experimental import pallas as pl
from jax.experimental.pallas import tpu as pltpu

VOCAB = 50
EMBED = 32
HIDDEN = 32
NUM_LAYERS = 2
BATCH = 4
SEQ = 8
SUBLANE = 8  # pad batch to a full sublane group


# ----------------------------------------------------------------------------
# Fused Pallas kernel
# ----------------------------------------------------------------------------
def _birnn_kernel(tok_ref, table_ref,
                  wih0_ref, whhf0_ref, whhb0_ref, b0_ref,
                  wih1_ref, whhf1_ref, whhb1_ref, b1_ref,
                  decw0_ref, decw1_ref, decb_ref,
                  out_ref,
                  gx_sc, h_sc,
                  *, seq_len, batch, hidden, vocab_pad):
    """Fully fused embed + 2-layer bidirectional LSTM + linear decoder.

    tok_ref    : (S*Bp, 1)   int32 time-major token ids
    table_ref  : (Vp, E)     f32 embedding table (rows padded to 8)
    wihL_ref   : (I_L, 8H)   bf16  [W_ih_fwd^T | W_ih_bwd^T]
    whhfL/whhbL: (H, 4H)     bf16  per-direction W_hh^T
    bL_ref     : (1, 8H)     f32   [b_ih+b_hh fwd | b_ih+b_hh bwd]
    decw0/1    : (2H, 2)     f32   decoder weight halves (time 0 / time S-1)
    decb_ref   : (1, 2)      f32
    out_ref    : (Bp, 2)     f32 logits
    gx_sc      : (S*Bp, 8H)  f32 hoisted input projection (shared by layers)
    h_sc       : (S*Bp, 4H)  f32 merged hidden sequences [f0 | bw0 | f1 | bw1]
    """
    S, Bp, H = seq_len, batch, hidden
    G = 4 * H  # gates per direction (= 128 lanes)

    def cell(g, c):
        # Full-tile activations: 2 wide EUP pushes + 1 narrow tanh.
        sig = jax.nn.sigmoid(g)          # (Bp, 4H)
        th = jnp.tanh(g)                 # (Bp, 4H)
        i = sig[:, 0:H]
        f = sig[:, H:2 * H]
        gg = th[:, 2 * H:3 * H]
        o = sig[:, 3 * H:4 * H]
        c_new = f * c + i * gg
        return o * jnp.tanh(c_new), c_new

    def run_layer(whhf_ref, whhb_ref, col):
        whhf = whhf_ref[...]             # (H, 4H) bf16
        whhb = whhb_ref[...]             # (H, 4H) bf16

        def step(t, carry):
            h_f, c_f, h_b, c_b = carry
            off_f = pl.multiple_of(t * Bp, Bp)            # fwd: time t
            off_b = pl.multiple_of((S - 1 - t) * Bp, Bp)  # bwd: time S-1-t
            # Per-direction recurrent dots (no block-diag, no concat carry);
            # gx slice fused (sublane + lane in one index).
            g_f = gx_sc[pl.ds(off_f, Bp), 0:G] + jnp.dot(
                h_f.astype(jnp.bfloat16), whhf,
                preferred_element_type=jnp.float32)
            g_b = gx_sc[pl.ds(off_b, Bp), G:2 * G] + jnp.dot(
                h_b.astype(jnp.bfloat16), whhb,
                preferred_element_type=jnp.float32)
            h_f, c_f = cell(g_f, c_f)
            h_b, c_b = cell(g_b, c_b)
            h_sc[pl.ds(off_f, Bp), col:col + H] = h_f
            h_sc[pl.ds(off_b, Bp), col + H:col + 2 * H] = h_b
            return h_f, c_f, h_b, c_b

        z = jnp.zeros((Bp, H), jnp.float32)
        jax.lax.fori_loop(0, S, step, (z, z, z, z), unroll=True)

    # ---- In-kernel embedding gather as a one-hot MXU matmul (runs once). ----
    tok = tok_ref[...]                                      # (S*Bp, 1) int32
    onehot = (tok == jax.lax.broadcasted_iota(
        jnp.int32, (S * Bp, vocab_pad), 1)).astype(jnp.float32)
    emb = jnp.dot(onehot, table_ref[...],
                  preferred_element_type=jnp.float32)       # (S*Bp, E) f32

    # ---- Layer 0: hoisted input projection for BOTH directions, then RNN. ----
    gx_sc[...] = jnp.dot(emb.astype(jnp.bfloat16), wih0_ref[...],
                         preferred_element_type=jnp.float32) + b0_ref[...]
    run_layer(whhf0_ref, whhb0_ref, 0)

    # ---- Layer 1: input is the lane-contiguous [f0 | bw0] half of h_sc. ----
    gx_sc[...] = jnp.dot(h_sc[:, 0:2 * H].astype(jnp.bfloat16), wih1_ref[...],
                         preferred_element_type=jnp.float32) + b1_ref[...]
    run_layer(whhf1_ref, whhb1_ref, 2 * H)

    # ---- Epilogue: encoding = cat(out[0], out[-1]); decoder split into two
    #      (2H, 2) dots — no concat on the critical path.
    last = (S - 1) * Bp
    out_ref[...] = (
        jnp.dot(h_sc[0:Bp, 2 * H:4 * H], decw0_ref[...],
                preferred_element_type=jnp.float32)
        + jnp.dot(h_sc[last:last + Bp, 2 * H:4 * H], decw1_ref[...],
                  preferred_element_type=jnp.float32)
        + decb_ref[...]).astype(out_ref.dtype)


# ----------------------------------------------------------------------------
# Wrapper: weight packing + pallas_call
# ----------------------------------------------------------------------------
def _pack_layer(layer_p):
    """PyTorch-layout (4H,I)/(4H,H)/(4H,) per-direction weights -> packed."""
    wih_f, whh_f, bih_f, bhh_f = layer_p["fwd"]
    wih_b, whh_b, bih_b, bhh_b = layer_p["bwd"]
    wih = jnp.concatenate([wih_f.T, wih_b.T], axis=1).astype(jnp.bfloat16)
    whhf = whh_f.T.astype(jnp.bfloat16)                         # (H, 4H)
    whhb = whh_b.T.astype(jnp.bfloat16)                         # (H, 4H)
    b = jnp.concatenate([bih_f + bhh_f, bih_b + bhh_b])[None, :]  # (1, 8H) f32
    return wih, whhf, whhb, b


def birnn_forward(params, tokens):
    """tokens: (batch, seq_len) int32 -> logits (batch, 2)."""
    B, S = tokens.shape
    H = HIDDEN

    # Pad batch to a full sublane group (8 rows). Pad rows (token id 0) run
    # through the LSTM independently and are sliced off at the end.
    Bp = max(SUBLANE, ((B + SUBLANE - 1) // SUBLANE) * SUBLANE)
    tok = tokens.T.astype(jnp.int32)                 # (S, B) — inputs.T
    if Bp != B:
        tok = jnp.pad(tok, ((0, 0), (0, Bp - B)))
    tok2d = tok.reshape(S * Bp, 1)

    # Embedding table stays f32 (one-hot matmul in-kernel); pad rows to 8.
    Vp = ((VOCAB + SUBLANE - 1) // SUBLANE) * SUBLANE
    table = params["embedding"].astype(jnp.float32)
    if Vp != VOCAB:
        table = jnp.pad(table, ((0, Vp - VOCAB), (0, 0)))

    wih0, whhf0, whhb0, b0 = _pack_layer(params["lstm"][0])
    wih1, whhf1, whhb1, b1 = _pack_layer(params["lstm"][1])
    dec_wt = params["dec_w"].T.astype(jnp.float32)   # (4H, 2)
    decw0 = dec_wt[0:2 * H]                          # applied to outputs[0]
    decw1 = dec_wt[2 * H:4 * H]                      # applied to outputs[-1]
    decb = params["dec_b"][None, :].astype(jnp.float32)

    kernel = functools.partial(_birnn_kernel, seq_len=S, batch=Bp,
                               hidden=H, vocab_pad=Vp)
    logits = pl.pallas_call(
        kernel,
        out_shape=jax.ShapeDtypeStruct((Bp, 2), jnp.float32),
        in_specs=[pl.BlockSpec(memory_space=pltpu.MemorySpace.VMEM)] * 13,
        out_specs=pl.BlockSpec(memory_space=pltpu.MemorySpace.VMEM),
        scratch_shapes=[
            pltpu.VMEM((S * Bp, 8 * H), jnp.float32),  # hoisted gate_x (shared)
            pltpu.VMEM((S * Bp, 4 * H), jnp.float32),  # [f0 | bw0 | f1 | bw1]
        ],
    )(tok2d, table, wih0, whhf0, whhb0, b0, wih1, whhf1, whhb1, b1,
      decw0, decw1, decb)
    return logits[:B]


# ----------------------------------------------------------------------------
# Parameters (deterministic synthetic init, PyTorch-shaped)
# ----------------------------------------------------------------------------
def init_params(key):
    keys = iter(jax.random.split(key, 64))
    u = lambda k, shape, s: jax.random.uniform(k, shape, jnp.float32, -s, s)
    scale = 1.0 / jnp.sqrt(HIDDEN)

    params = {"embedding": jax.random.normal(next(keys), (VOCAB, EMBED),
                                             jnp.float32) * 0.1}
    lstm = []
    for layer in range(NUM_LAYERS):
        in_size = EMBED if layer == 0 else 2 * HIDDEN
        layer_p = {}
        for direction in ("fwd", "bwd"):
            layer_p[direction] = (
                u(next(keys), (4 * HIDDEN, in_size), scale),   # weight_ih
                u(next(keys), (4 * HIDDEN, HIDDEN), scale),    # weight_hh
                u(next(keys), (4 * HIDDEN,), scale),           # bias_ih
                u(next(keys), (4 * HIDDEN,), scale),           # bias_hh
            )
        lstm.append(layer_p)
    params["lstm"] = lstm
    params["dec_w"] = u(next(keys), (2, 4 * HIDDEN), 1.0 / jnp.sqrt(4 * HIDDEN))
    params["dec_b"] = u(next(keys), (2,), 1.0 / jnp.sqrt(4 * HIDDEN))
    return params


# ----------------------------------------------------------------------------
# Pure-JAX reference (for correctness check)
# ----------------------------------------------------------------------------
def _ref_lstm_layer(x, w_ih, w_hh, b_ih, b_hh):
    H = w_hh.shape[1]
    prec = jax.lax.Precision.HIGHEST

    def step(carry, x_t):
        h, c = carry
        gates = (jnp.dot(x_t, w_ih.T, precision=prec)
                 + jnp.dot(h, w_hh.T, precision=prec) + b_ih + b_hh)
        i = jax.nn.sigmoid(gates[:, 0:H])
        f = jax.nn.sigmoid(gates[:, H:2 * H])
        g = jnp.tanh(gates[:, 2 * H:3 * H])
        o = jax.nn.sigmoid(gates[:, 3 * H:4 * H])
        c = f * c + i * g
        h = o * jnp.tanh(c)
        return (h, c), h

    B = x.shape[1]
    h0 = jnp.zeros((B, H), jnp.float32)
    _, hs = jax.lax.scan(step, (h0, h0), x)
    return hs


def birnn_reference(params, tokens):
    emb = jnp.take(params["embedding"], tokens.T, axis=0).astype(jnp.float32)
    x = emb
    for layer in range(NUM_LAYERS):
        pf = params["lstm"][layer]["fwd"]
        pb = params["lstm"][layer]["bwd"]
        hs_f = _ref_lstm_layer(x, *pf)
        hs_b = jnp.flip(_ref_lstm_layer(jnp.flip(x, axis=0), *pb), axis=0)
        x = jnp.concatenate([hs_f, hs_b], axis=-1)
    encoding = jnp.concatenate([x[0], x[-1]], axis=-1)
    return jnp.dot(encoding, params["dec_w"].T,
                   precision=jax.lax.Precision.HIGHEST) + params["dec_b"]


if __name__ == "__main__":
    key = jax.random.PRNGKey(0)
    pkey, tkey = jax.random.split(key)
    params = init_params(pkey)
    tokens = jax.random.randint(tkey, (BATCH, SEQ), 0, VOCAB, dtype=jnp.int32)

    forward = jax.jit(birnn_forward)
    out = jax.block_until_ready(forward(params, tokens))
    assert out.shape == (BATCH, 2) and out.dtype == jnp.float32

    ref = jax.block_until_ready(jax.jit(birnn_reference)(params, tokens))
    # Kernel uses bf16 MXU operands with f32 accumulation; reference is pure
    # f32 at Precision.HIGHEST, so allow ~1e-2 (observed deviation ~1e-3 on
    # logits of magnitude ~0.1).
    assert jnp.allclose(out, ref, rtol=1e-2, atol=1e-2), (out, ref)

    print("KERNEL_OK")
</pallas_src>

<mosaic_0001>
module attributes {stable_mosaic.version = 11 : i64} {
  func.func @_birnn_kernel(%arg0: memref<64x1xi32, #tpu.memory_space<vmem>>, %arg1: memref<56x32xf32, #tpu.memory_space<vmem>>, %arg2: memref<32x256xbf16, #tpu.memory_space<vmem>>, %arg3: memref<32x128xbf16, #tpu.memory_space<vmem>>, %arg4: memref<32x128xbf16, #tpu.memory_space<vmem>>, %arg5: memref<1x256xf32, #tpu.memory_space<vmem>>, %arg6: memref<64x256xbf16, #tpu.memory_space<vmem>>, %arg7: memref<32x128xbf16, #tpu.memory_space<vmem>>, %arg8: memref<32x128xbf16, #tpu.memory_space<vmem>>, %arg9: memref<1x256xf32, #tpu.memory_space<vmem>>, %arg10: memref<64x2xf32, #tpu.memory_space<vmem>>, %arg11: memref<64x2xf32, #tpu.memory_space<vmem>>, %arg12: memref<1x2xf32, #tpu.memory_space<vmem>>, %arg13: memref<8x2xf32, #tpu.memory_space<vmem>>, %arg14: memref<64x256xf32, #tpu.memory_space<vmem>>, %arg15: memref<64x128xf32, #tpu.memory_space<vmem>>) attributes {dimension_semantics = [], scalar_prefetch = 0 : i64, scratch_operands = 2 : i64, tpu.core_type = #tpu.core_type<tc>} {
    %c0 = arith.constant 0 : index
    %c0_0 = arith.constant 0 : index
    %0 = vector.load %arg0[%c0, %c0_0] : memref<64x1xi32, #tpu.memory_space<vmem>>, vector<64x1xi32>
    %1 = tpu.iota {dimensions = array<i32: 1>} : vector<64x56xi32>
    %2 = vector.broadcast %0 : vector<64x1xi32> to vector<64x56xi32>
    %3 = arith.cmpi eq, %2, %1 : vector<64x56xi32>
    %4 = arith.extui %3 : vector<64x56xi1> to vector<64x56xi32>
    %5 = arith.sitofp %4 : vector<64x56xi32> to vector<64x56xf32>
    %c0_1 = arith.constant 0 : index
    %c0_2 = arith.constant 0 : index
    %6 = vector.load %arg1[%c0_1, %c0_2] : memref<56x32xf32, #tpu.memory_space<vmem>>, vector<56x32xf32>
    %cst = arith.constant dense<0.000000e+00> : vector<64x32xf32>
    %7 = tpu.matmul %5, %6, %cst {dimension_numbers = #tpu.dot_dimension_numbers<[1], [0], [0], [1], [0, 0, 1, 1], [], []>} : vector<64x56xf32>, vector<56x32xf32>, vector<64x32xf32> -> vector<64x32xf32>
    %8 = arith.truncf %7 : vector<64x32xf32> to vector<64x32xbf16>
    %c0_3 = arith.constant 0 : index
    %c0_4 = arith.constant 0 : index
    %9 = vector.load %arg2[%c0_3, %c0_4] : memref<32x256xbf16, #tpu.memory_space<vmem>>, vector<32x256xbf16>
    %cst_5 = arith.constant dense<0.000000e+00> : vector<64x256xf32>
    %10 = tpu.matmul %8, %9, %cst_5 {dimension_numbers = #tpu.dot_dimension_numbers<[1], [0], [0], [1], [0, 0, 1, 1], [], []>} : vector<64x32xbf16>, vector<32x256xbf16>, vector<64x256xf32> -> vector<64x256xf32>
    %c0_6 = arith.constant 0 : index
    %c0_7 = arith.constant 0 : index
    %11 = vector.load %arg5[%c0_6, %c0_7] : memref<1x256xf32, #tpu.memory_space<vmem>>, vector<1x256xf32>
    %12 = vector.broadcast %11 : vector<1x256xf32> to vector<64x256xf32>
    %13 = arith.addf %10, %12 : vector<64x256xf32>
    %c0_8 = arith.constant 0 : index
    %c0_9 = arith.constant 0 : index
    %14 = vector.load %arg14[%c0_8, %c0_9] : memref<64x256xf32, #tpu.memory_space<vmem>>, vector<64x256xf32>
    tpu.vector_store %arg14[%c0_8, %c0_9], %13 {strides = array<i32>} : memref<64x256xf32, #tpu.memory_space<vmem>>, vector<64x256xf32>,
    %c0_10 = arith.constant 0 : index
    %c0_11 = arith.constant 0 : index
    %15 = vector.load %arg3[%c0_10, %c0_11] : memref<32x128xbf16, #tpu.memory_space<vmem>>, vector<32x128xbf16>
    %c0_12 = arith.constant 0 : index
    %c0_13 = arith.constant 0 : index
    %16 = vector.load %arg4[%c0_12, %c0_13] : memref<32x128xbf16, #tpu.memory_space<vmem>>, vector<32x128xbf16>
    %cst_14 = arith.constant 0.000000e+00 : f32
    %17 = vector.broadcast %cst_14 : f32 to vector<8x32xf32>
    %c0_i32 = arith.constant 0 : i32
    %c8_i32 = arith.constant 8 : i32
    %18 = arith.muli %c0_i32, %c8_i32 : i32
    %19 = tpu.assume_multiple %18, 8 : i32
    %c7_i32 = arith.constant 7 : i32
    %20 = arith.subi %c7_i32, %c0_i32 : i32
    %c8_i32_15 = arith.constant 8 : i32
    %21 = arith.muli %20, %c8_i32_15 : i32
    %22 = tpu.assume_multiple %21, 8 : i32
    %23 = arith.index_cast %19 : i32 to index
    %c0_16 = arith.constant 0 : index
    %24 = vector.load %arg14[%23, %c0_16] : memref<64x256xf32, #tpu.memory_space<vmem>>, vector<8x128xf32>
    %25 = arith.truncf %17 : vector<8x32xf32> to vector<8x32xbf16>
    %cst_17 = arith.constant dense<0.000000e+00> : vector<8x128xf32>
    %26 = tpu.matmul %25, %15, %cst_17 {dimension_numbers = #tpu.dot_dimension_numbers<[1], [0], [0], [1], [0, 0, 1, 1], [], []>} : vector<8x32xbf16>, vector<32x128xbf16>, vector<8x128xf32> -> vector<8x128xf32>
    %27 = arith.addf %24, %26 : vector<8x128xf32>
    %28 = arith.index_cast %22 : i32 to index
    %c128 = arith.constant 128 : index
    %29 = vector.load %arg14[%28, %c128] : memref<64x256xf32, #tpu.memory_space<vmem>>, vector<8x128xf32>
    %30 = arith.truncf %17 : vector<8x32xf32> to vector<8x32xbf16>
    %cst_18 = arith.constant dense<0.000000e+00> : vector<8x128xf32>
    %31 = tpu.matmul %30, %16, %cst_18 {dimension_numbers = #tpu.dot_dimension_numbers<[1], [0], [0], [1], [0, 0, 1, 1], [], []>} : vector<8x32xbf16>, vector<32x128xbf16>, vector<8x128xf32> -> vector<8x128xf32>
    %32 = arith.addf %29, %31 : vector<8x128xf32>
    %33 = arith.negf %27 : vector<8x128xf32>
    %34 = math.exp %33 : vector<8x128xf32>
    %cst_19 = arith.constant 1.000000e+00 : f32
    %35 = vector.broadcast %cst_19 : f32 to vector<8x128xf32>
    %36 = arith.addf %35, %34 : vector<8x128xf32>
    %37 = arith.divf %35, %36 : vector<8x128xf32>
    %38 = math.tanh %27 : vector<8x128xf32>
    %39 = vector.extract_strided_slice %37 {offsets = [0, 0], sizes = [8, 32], strides = [1, 1]} : vector<8x128xf32> to vector<8x32xf32>
    %40 = vector.extract_strided_slice %37 {offsets = [0, 32], sizes = [8, 32], strides = [1, 1]} : vector<8x128xf32> to vector<8x32xf32>
    %41 = vector.extract_strided_slice %38 {offsets = [0, 64], sizes = [8, 32], strides = [1, 1]} : vector<8x128xf32> to vector<8x32xf32>
    %42 = vector.extract_strided_slice %37 {offsets = [0, 96], sizes = [8, 32], strides = [1, 1]} : vector<8x128xf32> to vector<8x32xf32>
    %43 = arith.mulf %40, %17 : vector<8x32xf32>
    %44 = arith.mulf %39, %41 : vector<8x32xf32>
    %45 = arith.addf %43, %44 : vector<8x32xf32>
    %46 = math.tanh %45 : vector<8x32xf32>
    %47 = arith.mulf %42, %46 : vector<8x32xf32>
    %48 = arith.negf %32 : vector<8x128xf32>
    %49 = math.exp %48 : vector<8x128xf32>
    %cst_20 = arith.constant 1.000000e+00 : f32
    %50 = vector.broadcast %cst_20 : f32 to vector<8x128xf32>
    %51 = arith.addf %50, %49 : vector<8x128xf32>
    %52 = arith.divf %50, %51 : vector<8x128xf32>
    %53 = math.tanh %32 : vector<8x128xf32>
    %54 = vector.extract_strided_slice %52 {offsets = [0, 0], sizes = [8, 32], strides = [1, 1]} : vector<8x128xf32> to vector<8x32xf32>
    %55 = vector.extract_strided_slice %52 {offsets = [0, 32], sizes = [8, 32], strides = [1, 1]} : vector<8x128xf32> to vector<8x32xf32>
    %56 = vector.extract_strided_slice %53 {offsets = [0, 64], sizes = [8, 32], strides = [1, 1]} : vector<8x128xf32> to vector<8x32xf32>
    %57 = vector.extract_strided_slice %52 {offsets = [0, 96], sizes = [8, 32], strides = [1, 1]} : vector<8x128xf32> to vector<8x32xf32>
    %58 = arith.mulf %55, %17 : vector<8x32xf32>
    %59 = arith.mulf %54, %56 : vector<8x32xf32>
    %60 = arith.addf %58, %59 : vector<8x32xf32>
    %61 = math.tanh %60 : vector<8x32xf32>
    %62 = arith.mulf %57, %61 : vector<8x32xf32>
    %63 = arith.index_cast %19 : i32 to index
    %c0_21 = arith.constant 0 : index
    %64 = vector.load %arg15[%63, %c0_21] : memref<64x128xf32, #tpu.memory_space<vmem>>, vector<8x32xf32>
    tpu.vector_store %arg15[%63, %c0_21], %47 {strides = array<i32>} : memref<64x128xf32, #tpu.memory_space<vmem>>, vector<8x32xf32>,
    %65 = arith.index_cast %22 : i32 to index
    %c32 = arith.constant 32 : index
    %66 = vector.load %arg15[%65, %c32] : memref<64x128xf32, #tpu.memory_space<vmem>>, vector<8x32xf32>
    tpu.vector_store %arg15[%65, %c32], %62 {strides = array<i32>} : memref<64x128xf32, #tpu.memory_space<vmem>>, vector<8x32xf32>,
    %c1_i32 = arith.constant 1 : i32
    %c8_i32_22 = arith.constant 8 : i32
    %67 = arith.muli %c1_i32, %c8_i32_22 : i32
    %68 = tpu.assume_multiple %67, 8 : i32
    %c7_i32_23 = arith.constant 7 : i32
    %69 = arith.subi %c7_i32_23, %c1_i32 : i32
    %c8_i32_24 = arith.constant 8 : i32
    %70 = arith.muli %69, %c8_i32_24 : i32
    %71 = tpu.assume_multiple %70, 8 : i32
    %72 = arith.index_cast %68 : i32 to index
    %c0_25 = arith.constant 0 : index
    %73 = vector.load %arg14[%72, %c0_25] : memref<64x256xf32, #tpu.memory_space<vmem>>, vector<8x128xf32>
    %74 = arith.truncf %47 : vector<8x32xf32> to vector<8x32xbf16>
    %cst_26 = arith.constant dense<0.000000e+00> : vector<8x128xf32>
    %75 = tpu.matmul %74, %15, %cst_26 {dimension_numbers = #tpu.dot_dimension_numbers<[1], [0], [0], [1], [0, 0, 1, 1], [], []>} : vector<8x32xbf16>, vector<32x128xbf16>, vector<8x128xf32> -> vector<8x128xf32>
    %76 = arith.addf %73, %75 : vector<8x128xf32>
    %77 = arith.index_cast %71 : i32 to index
    %c128_27 = arith.constant 128 : index
    %78 = vector.load %arg14[%77, %c128_27] : memref<64x256xf32, #tpu.memory_space<vmem>>, vector<8x128xf32>
    %79 = arith.truncf %62 : vector<8x32xf32> to vector<8x32xbf16>
    %cst_28 = arith.constant dense<0.000000e+00> : vector<8x128xf32>
    %80 = tpu.matmul %79, %16, %cst_28 {dimension_numbers = #tpu.dot_dimension_numbers<[1], [0], [0], [1], [0, 0, 1, 1], [], []>} : vector<8x32xbf16>, vector<32x128xbf16>, vector<8x128xf32> -> vector<8x128xf32>
    %81 = arith.addf %78, %80 : vector<8x128xf32>
    %82 = arith.negf %76 : vector<8x128xf32>
    %83 = math.exp %82 : vector<8x128xf32>
    %cst_29 = arith.constant 1.000000e+00 : f32
    %84 = vector.broadcast %cst_29 : f32 to vector<8x128xf32>
    %85 = arith.addf %84, %83 : vector<8x128xf32>
    %86 = arith.divf %84, %85 : vector<8x128xf32>
    %87 = math.tanh %76 : vector<8x128xf32>
    %88 = vector.extract_strided_slice %86 {offsets = [0, 0], sizes = [8, 32], strides = [1, 1]} : vector<8x128xf32> to vector<8x32xf32>
    %89 = vector.extract_strided_slice %86 {offsets = [0, 32], sizes = [8, 32], strides = [1, 1]} : vector<8x128xf32> to vector<8x32xf32>
    %90 = vector.extract_strided_slice %87 {offsets = [0, 64], sizes = [8, 32], strides = [1, 1]} : vector<8x128xf32> to vector<8x32xf32>
    %91 = vector.extract_strided_slice %86 {offsets = [0, 96], sizes = [8, 32], strides = [1, 1]} : vector<8x128xf32> to vector<8x32xf32>
    %92 = arith.mulf %89, %45 : vector<8x32xf32>
    %93 = arith.mulf %88, %90 : vector<8x32xf32>
    %94 = arith.addf %92, %93 : vector<8x32xf32>
    %95 = math.tanh %94 : vector<8x32xf32>
    %96 = arith.mulf %91, %95 : vector<8x32xf32>
    %97 = arith.negf %81 : vector<8x128xf32>
    %98 = math.exp %97 : vector<8x128xf32>
    %cst_30 = arith.constant 1.000000e+00 : f32
    %99 = vector.broadcast %cst_30 : f32 to vector<8x128xf32>
    %100 = arith.addf %99, %98 : vector<8x128xf32>
    %101 = arith.divf %99, %100 : vector<8x128xf32>
    %102 = math.tanh %81 : vector<8x128xf32>
    %103 = vector.extract_strided_slice %101 {offsets = [0, 0], sizes = [8, 32], strides = [1, 1]} : vector<8x128xf32> to vector<8x32xf32>
    %104 = vector.extract_strided_slice %101 {offsets = [0, 32], sizes = [8, 32], strides = [1, 1]} : vector<8x128xf32> to vector<8x32xf32>
    %105 = vector.extract_strided_slice %102 {offsets = [0, 64], sizes = [8, 32], strides = [1, 1]} : vector<8x128xf32> to vector<8x32xf32>
    %106 = vector.extract_strided_slice %101 {offsets = [0, 96], sizes = [8, 32], strides = [1, 1]} : vector<8x128xf32> to vector<8x32xf32>
    %107 = arith.mulf %104, %60 : vector<8x32xf32>
    %108 = arith.mulf %103, %105 : vector<8x32xf32>
    %109 = arith.addf %107, %108 : vector<8x32xf32>
    %110 = math.tanh %109 : vector<8x32xf32>
    %111 = arith.mulf %106, %110 : vector<8x32xf32>
    %112 = arith.index_cast %68 : i32 to index
    %c0_31 = arith.constant 0 : index
    %113 = vector.load %arg15[%112, %c0_31] : memref<64x128xf32, #tpu.memory_space<vmem>>, vector<8x32xf32>
    tpu.vector_store %arg15[%112, %c0_31], %96 {strides = array<i32>} : memref<64x128xf32, #tpu.memory_space<vmem>>, vector<8x32xf32>,
    %114 = arith.index_cast %71 : i32 to index
    %c32_32 = arith.constant 32 : index
    %115 = vector.load %arg15[%114, %c32_32] : memref<64x128xf32, #tpu.memory_space<vmem>>, vector<8x32xf32>
    tpu.vector_store %arg15[%114, %c32_32], %111 {strides = array<i32>} : memref<64x128xf32, #tpu.memory_space<vmem>>, vector<8x32xf32>,
    %c2_i32 = arith.constant 2 : i32
    %c8_i32_33 = arith.constant 8 : i32
    %116 = arith.muli %c2_i32, %c8_i32_33 : i32
    %117 = tpu.assume_multiple %116, 8 : i32
    %c7_i32_34 = arith.constant 7 : i32
    %118 = arith.subi %c7_i32_34, %c2_i32 : i32
    %c8_i32_35 = arith.constant 8 : i32
    %119 = arith.muli %118, %c8_i32_35 : i32
    %120 = tpu.assume_multiple %119, 8 : i32
    %121 = arith.index_cast %117 : i32 to index
    %c0_36 = arith.constant 0 : index
    %122 = vector.load %arg14[%121, %c0_36] : memref<64x256xf32, #tpu.memory_space<vmem>>, vector<8x128xf32>
    %123 = arith.truncf %96 : vector<8x32xf32> to vector<8x32xbf16>
    %cst_37 = arith.constant dense<0.000000e+00> : vector<8x128xf32>
    %124 = tpu.matmul %123, %15, %cst_37 {dimension_numbers = #tpu.dot_dimension_numbers<[1], [0], [0], [1], [0, 0, 1, 1], [], []>} : vector<8x32xbf16>, vector<32x128xbf16>, vector<8x128xf32> -> vector<8x128xf32>
    %125 = arith.addf %122, %124 : vector<8x128xf32>
    %126 = arith.index_cast %120 : i32 to index
    %c128_38 = arith.constant 128 : index
    %127 = vector.load %arg14[%126, %c128_38] : memref<64x256xf32, #tpu.memory_space<vmem>>, vector<8x128xf32>
    %128 = arith.truncf %111 : vector<8x32xf32> to vector<8x32xbf16>
    %cst_39 = arith.constant dense<0.000000e+00> : vector<8x128xf32>
    %129 = tpu.matmul %128, %16, %cst_39 {dimension_numbers = #tpu.dot_dimension_numbers<[1], [0], [0], [1], [0, 0, 1, 1], [], []>} : vector<8x32xbf16>, vector<32x128xbf16>, vector<8x128xf32> -> vector<8x128xf32>
    %130 = arith.addf %127, %129 : vector<8x128xf32>
    %131 = arith.negf %125 : vector<8x128xf32>
    %132 = math.exp %131 : vector<8x128xf32>
    %cst_40 = arith.constant 1.000000e+00 : f32
    %133 = vector.broadcast %cst_40 : f32 to vector<8x128xf32>
    %134 = arith.addf %133, %132 : vector<8x128xf32>
    %135 = arith.divf %133, %134 : vector<8x128xf32>
    %136 = math.tanh %125 : vector<8x128xf32>
    %137 = vector.extract_strided_slice %135 {offsets = [0, 0], sizes = [8, 32], strides = [1, 1]} : vector<8x128xf32> to vector<8x32xf32>
    %138 = vector.extract_strided_slice %135 {offsets = [0, 32], sizes = [8, 32], strides = [1, 1]} : vector<8x128xf32> to vector<8x32xf32>
    %139 = vector.extract_strided_slice %136 {offsets = [0, 64], sizes = [8, 32], strides = [1, 1]} : vector<8x128xf32> to vector<8x32xf32>
    %140 = vector.extract_strided_slice %135 {offsets = [0, 96], sizes = [8, 32], strides = [1, 1]} : vector<8x128xf32> to vector<8x32xf32>
    %141 = arith.mulf %138, %94 : vector<8x32xf32>
    %142 = arith.mulf %137, %139 : vector<8x32xf32>
    %143 = arith.addf %141, %142 : vector<8x32xf32>
    %144 = math.tanh %143 : vector<8x32xf32>
    %145 = arith.mulf %140, %144 : vector<8x32xf32>
    %146 = arith.negf %130 : vector<8x128xf32>
    %147 = math.exp %146 : vector<8x128xf32>
    %cst_41 = arith.constant 1.000000e+00 : f32
    %148 = vector.broadcast %cst_41 : f32 to vector<8x128xf32>
    %149 = arith.addf %148, %147 : vector<8x128xf32>
    %150 = arith.divf %148, %149 : vector<8x128xf32>
    %151 = math.tanh %130 : vector<8x128xf32>
    %152 = vector.extract_strided_slice %150 {offsets = [0, 0], sizes = [8, 32], strides = [1, 1]} : vector<8x128xf32> to vector<8x32xf32>
    %153 = vector.extract_strided_slice %150 {offsets = [0, 32], sizes = [8, 32], strides = [1, 1]} : vector<8x128xf32> to vector<8x32xf32>
    %154 = vector.extract_strided_slice %151 {offsets = [0, 64], sizes = [8, 32], strides = [1, 1]} : vector<8x128xf32> to vector<8x32xf32>
    %155 = vector.extract_strided_slice %150 {offsets = [0, 96], sizes = [8, 32], strides = [1, 1]} : vector<8x128xf32> to vector<8x32xf32>
    %156 = arith.mulf %153, %109 : vector<8x32xf32>
    %157 = arith.mulf %152, %154 : vector<8x32xf32>
    %158 = arith.addf %156, %157 : vector<8x32xf32>
    %159 = math.tanh %158 : vector<8x32xf32>
    %160 = arith.mulf %155, %159 : vector<8x32xf32>
    %161 = arith.index_cast %117 : i32 to index
    %c0_42 = arith.constant 0 : index
    %162 = vector.load %arg15[%161, %c0_42] : memref<64x128xf32, #tpu.memory_space<vmem>>, vector<8x32xf32>
    tpu.vector_store %arg15[%161, %c0_42], %145 {strides = array<i32>} : memref<64x128xf32, #tpu.memory_space<vmem>>, vector<8x32xf32>,
    %163 = arith.index_cast %120 : i32 to index
    %c32_43 = arith.constant 32 : index
    %164 = vector.load %arg15[%163, %c32_43] : memref<64x128xf32, #tpu.memory_space<vmem>>, vector<8x32xf32>
    tpu.vector_store %arg15[%163, %c32_43], %160 {strides = array<i32>} : memref<64x128xf32, #tpu.memory_space<vmem>>, vector<8x32xf32>,
    %c3_i32 = arith.constant 3 : i32
    %c8_i32_44 = arith.constant 8 : i32
    %165 = arith.muli %c3_i32, %c8_i32_44 : i32
    %166 = tpu.assume_multiple %165, 8 : i32
    %c7_i32_45 = arith.constant 7 : i32
    %167 = arith.subi %c7_i32_45, %c3_i32 : i32
    %c8_i32_46 = arith.constant 8 : i32
    %168 = arith.muli %167, %c8_i32_46 : i32
    %169 = tpu.assume_multiple %168, 8 : i32
    %170 = arith.index_cast %166 : i32 to index
    %c0_47 = arith.constant 0 : index
    %171 = vector.load %arg14[%170, %c0_47] : memref<64x256xf32, #tpu.memory_space<vmem>>, vector<8x128xf32>
    %172 = arith.truncf %145 : vector<8x32xf32> to vector<8x32xbf16>
    %cst_48 = arith.constant dense<0.000000e+00> : vector<8x128xf32>
    %173 = tpu.matmul %172, %15, %cst_48 {dimension_numbers = #tpu.dot_dimension_numbers<[1], [0], [0], [1], [0, 0, 1, 1], [], []>} : vector<8x32xbf16>, vector<32x128xbf16>, vector<8x128xf32> -> vector<8x128xf32>
    %174 = arith.addf %171, %173 : vector<8x128xf32>
    %175 = arith.index_cast %169 : i32 to index
    %c128_49 = arith.constant 128 : index
    %176 = vector.load %arg14[%175, %c128_49] : memref<64x256xf32, #tpu.memory_space<vmem>>, vector<8x128xf32>
    %177 = arith.truncf %160 : vector<8x32xf32> to vector<8x32xbf16>
    %cst_50 = arith.constant dense<0.000000e+00> : vector<8x128xf32>
    %178 = tpu.matmul %177, %16, %cst_50 {dimension_numbers = #tpu.dot_dimension_numbers<[1], [0], [0], [1], [0, 0, 1, 1], [], []>} : vector<8x32xbf16>, vector<32x128xbf16>, vector<8x128xf32> -> vector<8x128xf32>
    %179 = arith.addf %176, %178 : vector<8x128xf32>
    %180 = arith.negf %174 : vector<8x128xf32>
    %181 = math.exp %180 : vector<8x128xf32>
    %cst_51 = arith.constant 1.000000e+00 : f32
    %182 = vector.broadcast %cst_51 : f32 to vector<8x128xf32>
    %183 = arith.addf %182, %181 : vector<8x128xf32>
    %184 = arith.divf %182, %183 : vector<8x128xf32>
    %185 = math.tanh %174 : vector<8x128xf32>
    %186 = vector.extract_strided_slice %184 {offsets = [0, 0], sizes = [8, 32], strides = [1, 1]} : vector<8x128xf32> to vector<8x32xf32>
    %187 = vector.extract_strided_slice %184 {offsets = [0, 32], sizes = [8, 32], strides = [1, 1]} : vector<8x128xf32> to vector<8x32xf32>
    %188 = vector.extract_strided_slice %185 {offsets = [0, 64], sizes = [8, 32], strides = [1, 1]} : vector<8x128xf32> to vector<8x32xf32>
    %189 = vector.extract_strided_slice %184 {offsets = [0, 96], sizes = [8, 32], strides = [1, 1]} : vector<8x128xf32> to vector<8x32xf32>
    %190 = arith.mulf %187, %143 : vector<8x32xf32>
    %191 = arith.mulf %186, %188 : vector<8x32xf32>
    %192 = arith.addf %190, %191 : vector<8x32xf32>
    %193 = math.tanh %192 : vector<8x32xf32>
    %194 = arith.mulf %189, %193 : vector<8x32xf32>
    %195 = arith.negf %179 : vector<8x128xf32>
    %196 = math.exp %195 : vector<8x128xf32>
    %cst_52 = arith.constant 1.000000e+00 : f32
    %197 = vector.broadcast %cst_52 : f32 to vector<8x128xf32>
    %198 = arith.addf %197, %196 : vector<8x128xf32>
    %199 = arith.divf %197, %198 : vector<8x128xf32>
    %200 = math.tanh %179 : vector<8x128xf32>
    %201 = vector.extract_strided_slice %199 {offsets = [0, 0], sizes = [8, 32], strides = [1, 1]} : vector<8x128xf32> to vector<8x32xf32>
    %202 = vector.extract_strided_slice %199 {offsets = [0, 32], sizes = [8, 32], strides = [1, 1]} : vector<8x128xf32> to vector<8x32xf32>
    %203 = vector.extract_strided_slice %200 {offsets = [0, 64], sizes = [8, 32], strides = [1, 1]} : vector<8x128xf32> to vector<8x32xf32>
    %204 = vector.extract_strided_slice %199 {offsets = [0, 96], sizes = [8, 32], strides = [1, 1]} : vector<8x128xf32> to vector<8x32xf32>
    %205 = arith.mulf %202, %158 : vector<8x32xf32>
    %206 = arith.mulf %201, %203 : vector<8x32xf32>
    %207 = arith.addf %205, %206 : vector<8x32xf32>
    %208 = math.tanh %207 : vector<8x32xf32>
    %209 = arith.mulf %204, %208 : vector<8x32xf32>
    %210 = arith.index_cast %166 : i32 to index
    %c0_53 = arith.constant 0 : index
    %211 = vector.load %arg15[%210, %c0_53] : memref<64x128xf32, #tpu.memory_space<vmem>>, vector<8x32xf32>
    tpu.vector_store %arg15[%210, %c0_53], %194 {strides = array<i32>} : memref<64x128xf32, #tpu.memory_space<vmem>>, vector<8x32xf32>,
    %212 = arith.index_cast %169 : i32 to index
    %c32_54 = arith.constant 32 : index
    %213 = vector.load %arg15[%212, %c32_54] : memref<64x128xf32, #tpu.memory_space<vmem>>, vector<8x32xf32>
    tpu.vector_store %arg15[%212, %c32_54], %209 {strides = array<i32>} : memref<64x128xf32, #tpu.memory_space<vmem>>, vector<8x32xf32>,
    %c4_i32 = arith.constant 4 : i32
    %c8_i32_55 = arith.constant 8 : i32
    %214 = arith.muli %c4_i32, %c8_i32_55 : i32
    %215 = tpu.assume_multiple %214, 8 : i32
    %c7_i32_56 = arith.constant 7 : i32
    %216 = arith.subi %c7_i32_56, %c4_i32 : i32
    %c8_i32_57 = arith.constant 8 : i32
    %217 = arith.muli %216, %c8_i32_57 : i32
    %218 = tpu.assume_multiple %217, 8 : i32
    %219 = arith.index_cast %215 : i32 to index
    %c0_58 = arith.constant 0 : index
    %220 = vector.load %arg14[%219, %c0_58] : memref<64x256xf32, #tpu.memory_space<vmem>>, vector<8x128xf32>
    %221 = arith.truncf %194 : vector<8x32xf32> to vector<8x32xbf16>
    %cst_59 = arith.constant dense<0.000000e+00> : vector<8x128xf32>
    %222 = tpu.matmul %221, %15, %cst_59 {dimension_numbers = #tpu.dot_dimension_numbers<[1], [0], [0], [1], [0, 0, 1, 1], [], []>} : vector<8x32xbf16>, vector<32x128xbf16>, vector<8x128xf32> -> vector<8x128xf32>
    %223 = arith.addf %220, %222 : vector<8x128xf32>
    %224 = arith.index_cast %218 : i32 to index
    %c128_60 = arith.constant 128 : index
    %225 = vector.load %arg14[%224, %c128_60] : memref<64x256xf32, #tpu.memory_space<vmem>>, vector<8x128xf32>
    %226 = arith.truncf %209 : vector<8x32xf32> to vector<8x32xbf16>
    %cst_61 = arith.constant dense<0.000000e+00> : vector<8x128xf32>
    %227 = tpu.matmul %226, %16, %cst_61 {dimension_numbers = #tpu.dot_dimension_numbers<[1], [0], [0], [1], [0, 0, 1, 1], [], []>} : vector<8x32xbf16>, vector<32x128xbf16>, vector<8x128xf32> -> vector<8x128xf32>
    %228 = arith.addf %225, %227 : vector<8x128xf32>
    %229 = arith.negf %223 : vector<8x128xf32>
    %230 = math.exp %229 : vector<8x128xf32>
    %cst_62 = arith.constant 1.000000e+00 : f32
    %231 = vector.broadcast %cst_62 : f32 to vector<8x128xf32>
    %232 = arith.addf %231, %230 : vector<8x128xf32>
    %233 = arith.divf %231, %232 : vector<8x128xf32>
    %234 = math.tanh %223 : vector<8x128xf32>
    %235 = vector.extract_strided_slice %233 {offsets = [0, 0], sizes = [8, 32], strides = [1, 1]} : vector<8x128xf32> to vector<8x32xf32>
    %236 = vector.extract_strided_slice %233 {offsets = [0, 32], sizes = [8, 32], strides = [1, 1]} : vector<8x128xf32> to vector<8x32xf32>
    %237 = vector.extract_strided_slice %234 {offsets = [0, 64], sizes = [8, 32], strides = [1, 1]} : vector<8x128xf32> to vector<8x32xf32>
    %238 = vector.extract_strided_slice %233 {offsets = [0, 96], sizes = [8, 32], strides = [1, 1]} : vector<8x128xf32> to vector<8x32xf32>
    %239 = arith.mulf %236, %192 : vector<8x32xf32>
    %240 = arith.mulf %235, %237 : vector<8x32xf32>
    %241 = arith.addf %239, %240 : vector<8x32xf32>
    %242 = math.tanh %241 : vector<8x32xf32>
    %243 = arith.mulf %238, %242 : vector<8x32xf32>
    %244 = arith.negf %228 : vector<8x128xf32>
    %245 = math.exp %244 : vector<8x128xf32>
    %cst_63 = arith.constant 1.000000e+00 : f32
    %246 = vector.broadcast %cst_63 : f32 to vector<8x128xf32>
    %247 = arith.addf %246, %245 : vector<8x128xf32>
    %248 = arith.divf %246, %247 : vector<8x128xf32>
    %249 = math.tanh %228 : vector<8x128xf32>
    %250 = vector.extract_strided_slice %248 {offsets = [0, 0], sizes = [8, 32], strides = [1, 1]} : vector<8x128xf32> to vector<8x32xf32>
    %251 = vector.extract_strided_slice %248 {offsets = [0, 32], sizes = [8, 32], strides = [1, 1]} : vector<8x128xf32> to vector<8x32xf32>
    %252 = vector.extract_strided_slice %249 {offsets = [0, 64], sizes = [8, 32], strides = [1, 1]} : vector<8x128xf32> to vector<8x32xf32>
    %253 = vector.extract_strided_slice %248 {offsets = [0, 96], sizes = [8, 32], strides = [1, 1]} : vector<8x128xf32> to vector<8x32xf32>
    %254 = arith.mulf %251, %207 : vector<8x32xf32>
    %255 = arith.mulf %250, %252 : vector<8x32xf32>
    %256 = arith.addf %254, %255 : vector<8x32xf32>
    %257 = math.tanh %256 : vector<8x32xf32>
    %258 = arith.mulf %253, %257 : vector<8x32xf32>
    %259 = arith.index_cast %215 : i32 to index
    %c0_64 = arith.constant 0 : index
    %260 = vector.load %arg15[%259, %c0_64] : memref<64x128xf32, #tpu.memory_space<vmem>>, vector<8x32xf32>
    tpu.vector_store %arg15[%259, %c0_64], %243 {strides = array<i32>} : memref<64x128xf32, #tpu.memory_space<vmem>>, vector<8x32xf32>,
    %261 = arith.index_cast %218 : i32 to index
    %c32_65 = arith.constant 32 : index
    %262 = vector.load %arg15[%261, %c32_65] : memref<64x128xf32, #tpu.memory_space<vmem>>, vector<8x32xf32>
    tpu.vector_store %arg15[%261, %c32_65], %258 {strides = array<i32>} : memref<64x128xf32, #tpu.memory_space<vmem>>, vector<8x32xf32>,
    %c5_i32 = arith.constant 5 : i32
    %c8_i32_66 = arith.constant 8 : i32
    %263 = arith.muli %c5_i32, %c8_i32_66 : i32
    %264 = tpu.assume_multiple %263, 8 : i32
    %c7_i32_67 = arith.constant 7 : i32
    %265 = arith.subi %c7_i32_67, %c5_i32 : i32
    %c8_i32_68 = arith.constant 8 : i32
    %266 = arith.muli %265, %c8_i32_68 : i32
    %267 = tpu.assume_multiple %266, 8 : i32
    %268 = arith.index_cast %264 : i32 to index
    %c0_69 = arith.constant 0 : index
    %269 = vector.load %arg14[%268, %c0_69] : memref<64x256xf32, #tpu.memory_space<vmem>>, vector<8x128xf32>
    %270 = arith.truncf %243 : vector<8x32xf32> to vector<8x32xbf16>
    %cst_70 = arith.constant dense<0.000000e+00> : vector<8x128xf32>
    %271 = tpu.matmul %270, %15, %cst_70 {dimension_numbers = #tpu.dot_dimension_numbers<[1], [0], [0], [1], [0, 0, 1, 1], [], []>} : vector<8x32xbf16>, vector<32x128xbf16>, vector<8x128xf32> -> vector<8x128xf32>
    %272 = arith.addf %269, %271 : vector<8x128xf32>
    %273 = arith.index_cast %267 : i32 to index
    %c128_71 = arith.constant 128 : index
    %274 = vector.load %arg14[%273, %c128_71] : memref<64x256xf32, #tpu.memory_space<vmem>>, vector<8x128xf32>
    %275 = arith.truncf %258 : vector<8x32xf32> to vector<8x32xbf16>
    %cst_72 = arith.constant dense<0.000000e+00> : vector<8x128xf32>
    %276 = tpu.matmul %275, %16, %cst_72 {dimension_numbers = #tpu.dot_dimension_numbers<[1], [0], [0], [1], [0, 0, 1, 1], [], []>} : vector<8x32xbf16>, vector<32x128xbf16>, vector<8x128xf32> -> vector<8x128xf32>
    %277 = arith.addf %274, %276 : vector<8x128xf32>
    %278 = arith.negf %272 : vector<8x128xf32>
    %279 = math.exp %278 : vector<8x128xf32>
    %cst_73 = arith.constant 1.000000e+00 : f32
    %280 = vector.broadcast %cst_73 : f32 to vector<8x128xf32>
    %281 = arith.addf %280, %279 : vector<8x128xf32>
    %282 = arith.divf %280, %281 : vector<8x128xf32>
    %283 = math.tanh %272 : vector<8x128xf32>
    %284 = vector.extract_strided_slice %282 {offsets = [0, 0], sizes = [8, 32], strides = [1, 1]} : vector<8x128xf32> to vector<8x32xf32>
    %285 = vector.extract_strided_slice %282 {offsets = [0, 32], sizes = [8, 32], strides = [1, 1]} : vector<8x128xf32> to vector<8x32xf32>
    %286 = vector.extract_strided_slice %283 {offsets = [0, 64], sizes = [8, 32], strides = [1, 1]} : vector<8x128xf32> to vector<8x32xf32>
    %287 = vector.extract_strided_slice %282 {offsets = [0, 96], sizes = [8, 32], strides = [1, 1]} : vector<8x128xf32> to vector<8x32xf32>
    %288 = arith.mulf %285, %241 : vector<8x32xf32>
    %289 = arith.mulf %284, %286 : vector<8x32xf32>
    %290 = arith.addf %288, %289 : vector<8x32xf32>
    %291 = math.tanh %290 : vector<8x32xf32>
    %292 = arith.mulf %287, %291 : vector<8x32xf32>
    %293 = arith.negf %277 : vector<8x128xf32>
    %294 = math.exp %293 : vector<8x128xf32>
    %cst_74 = arith.constant 1.000000e+00 : f32
    %295 = vector.broadcast %cst_74 : f32 to vector<8x128xf32>
    %296 = arith.addf %295, %294 : vector<8x128xf32>
    %297 = arith.divf %295, %296 : vector<8x128xf32>
    %298 = math.tanh %277 : vector<8x128xf32>
    %299 = vector.extract_strided_slice %297 {offsets = [0, 0], sizes = [8, 32], strides = [1, 1]} : vector<8x128xf32> to vector<8x32xf32>
    %300 = vector.extract_strided_slice %297 {offsets = [0, 32], sizes = [8, 32], strides = [1, 1]} : vector<8x128xf32> to vector<8x32xf32>
    %301 = vector.extract_strided_slice %298 {offsets = [0, 64], sizes = [8, 32], strides = [1, 1]} : vector<8x128xf32> to vector<8x32xf32>
    %302 = vector.extract_strided_slice %297 {offsets = [0, 96], sizes = [8, 32], strides = [1, 1]} : vector<8x128xf32> to vector<8x32xf32>
    %303 = arith.mulf %300, %256 : vector<8x32xf32>
    %304 = arith.mulf %299, %301 : vector<8x32xf32>
    %305 = arith.addf %303, %304 : vector<8x32xf32>
    %306 = math.tanh %305 : vector<8x32xf32>
    %307 = arith.mulf %302, %306 : vector<8x32xf32>
    %308 = arith.index_cast %264 : i32 to index
    %c0_75 = arith.constant 0 : index
    %309 = vector.load %arg15[%308, %c0_75] : memref<64x128xf32, #tpu.memory_space<vmem>>, vector<8x32xf32>
    tpu.vector_store %arg15[%308, %c0_75], %292 {strides = array<i32>} : memref<64x128xf32, #tpu.memory_space<vmem>>, vector<8x32xf32>,
    %310 = arith.index_cast %267 : i32 to index
    %c32_76 = arith.constant 32 : index
    %311 = vector.load %arg15[%310, %c32_76] : memref<64x128xf32, #tpu.memory_space<vmem>>, vector<8x32xf32>
    tpu.vector_store %arg15[%310, %c32_76], %307 {strides = array<i32>} : memref<64x128xf32, #tpu.memory_space<vmem>>, vector<8x32xf32>,
    %c6_i32 = arith.constant 6 : i32
    %c8_i32_77 = arith.constant 8 : i32
    %312 = arith.muli %c6_i32, %c8_i32_77 : i32
    %313 = tpu.assume_multiple %312, 8 : i32
    %c7_i32_78 = arith.constant 7 : i32
    %314 = arith.subi %c7_i32_78, %c6_i32 : i32
    %c8_i32_79 = arith.constant 8 : i32
    %315 = arith.muli %314, %c8_i32_79 : i32
    %316 = tpu.assume_multiple %315, 8 : i32
    %317 = arith.index_cast %313 : i32 to index
    %c0_80 = arith.constant 0 : index
    %318 = vector.load %arg14[%317, %c0_80] : memref<64x256xf32, #tpu.memory_space<vmem>>, vector<8x128xf32>
    %319 = arith.truncf %292 : vector<8x32xf32> to vector<8x32xbf16>
    %cst_81 = arith.constant dense<0.000000e+00> : vector<8x128xf32>
    %320 = tpu.matmul %319, %15, %cst_81 {dimension_numbers = #tpu.dot_dimension_numbers<[1], [0], [0], [1], [0, 0, 1, 1], [], []>} : vector<8x32xbf16>, vector<32x128xbf16>, vector<8x128xf32> -> vector<8x128xf32>
    %321 = arith.addf %318, %320 : vector<8x128xf32>
    %322 = arith.index_cast %316 : i32 to index
    %c128_82 = arith.constant 128 : index
    %323 = vector.load %arg14[%322, %c128_82] : memref<64x256xf32, #tpu.memory_space<vmem>>, vector<8x128xf32>
    %324 = arith.truncf %307 : vector<8x32xf32> to vector<8x32xbf16>
    %cst_83 = arith.constant dense<0.000000e+00> : vector<8x128xf32>
    %325 = tpu.matmul %324, %16, %cst_83 {dimension_numbers = #tpu.dot_dimension_numbers<[1], [0], [0], [1], [0, 0, 1, 1], [], []>} : vector<8x32xbf16>, vector<32x128xbf16>, vector<8x128xf32> -> vector<8x128xf32>
    %326 = arith.addf %323, %325 : vector<8x128xf32>
    %327 = arith.negf %321 : vector<8x128xf32>
    %328 = math.exp %327 : vector<8x128xf32>
    %cst_84 = arith.constant 1.000000e+00 : f32
    %329 = vector.broadcast %cst_84 : f32 to vector<8x128xf32>
    %330 = arith.addf %329, %328 : vector<8x128xf32>
    %331 = arith.divf %329, %330 : vector<8x128xf32>
    %332 = math.tanh %321 : vector<8x128xf32>
    %333 = vector.extract_strided_slice %331 {offsets = [0, 0], sizes = [8, 32], strides = [1, 1]} : vector<8x128xf32> to vector<8x32xf32>
    %334 = vector.extract_strided_slice %331 {offsets = [0, 32], sizes = [8, 32], strides = [1, 1]} : vector<8x128xf32> to vector<8x32xf32>
    %335 = vector.extract_strided_slice %332 {offsets = [0, 64], sizes = [8, 32], strides = [1, 1]} : vector<8x128xf32> to vector<8x32xf32>
    %336 = vector.extract_strided_slice %331 {offsets = [0, 96], sizes = [8, 32], strides = [1, 1]} : vector<8x128xf32> to vector<8x32xf32>
    %337 = arith.mulf %334, %290 : vector<8x32xf32>
    %338 = arith.mulf %333, %335 : vector<8x32xf32>
    %339 = arith.addf %337, %338 : vector<8x32xf32>
    %340 = math.tanh %339 : vector<8x32xf32>
    %341 = arith.mulf %336, %340 : vector<8x32xf32>
    %342 = arith.negf %326 : vector<8x128xf32>
    %343 = math.exp %342 : vector<8x128xf32>
    %cst_85 = arith.constant 1.000000e+00 : f32
    %344 = vector.broadcast %cst_85 : f32 to vector<8x128xf32>
    %345 = arith.addf %344, %343 : vector<8x128xf32>
    %346 = arith.divf %344, %345 : vector<8x128xf32>
    %347 = math.tanh %326 : vector<8x128xf32>
    %348 = vector.extract_strided_slice %346 {offsets = [0, 0], sizes = [8, 32], strides = [1, 1]} : vector<8x128xf32> to vector<8x32xf32>
    %349 = vector.extract_strided_slice %346 {offsets = [0, 32], sizes = [8, 32], strides = [1, 1]} : vector<8x128xf32> to vector<8x32xf32>
    %350 = vector.extract_strided_slice %347 {offsets = [0, 64], sizes = [8, 32], strides = [1, 1]} : vector<8x128xf32> to vector<8x32xf32>
    %351 = vector.extract_strided_slice %346 {offsets = [0, 96], sizes = [8, 32], strides = [1, 1]} : vector<8x128xf32> to vector<8x32xf32>
    %352 = arith.mulf %349, %305 : vector<8x32xf32>
    %353 = arith.mulf %348, %350 : vector<8x32xf32>
    %354 = arith.addf %352, %353 : vector<8x32xf32>
    %355 = math.tanh %354 : vector<8x32xf32>
    %356 = arith.mulf %351, %355 : vector<8x32xf32>
    %357 = arith.index_cast %313 : i32 to index
    %c0_86 = arith.constant 0 : index
    %358 = vector.load %arg15[%357, %c0_86] : memref<64x128xf32, #tpu.memory_space<vmem>>, vector<8x32xf32>
    tpu.vector_store %arg15[%357, %c0_86], %341 {strides = array<i32>} : memref<64x128xf32, #tpu.memory_space<vmem>>, vector<8x32xf32>,
    %359 = arith.index_cast %316 : i32 to index
    %c32_87 = arith.constant 32 : index
    %360 = vector.load %arg15[%359, %c32_87] : memref<64x128xf32, #tpu.memory_space<vmem>>, vector<8x32xf32>
    tpu.vector_store %arg15[%359, %c32_87], %356 {strides = array<i32>} : memref<64x128xf32, #tpu.memory_space<vmem>>, vector<8x32xf32>,
    %c7_i32_88 = arith.constant 7 : i32
    %c8_i32_89 = arith.constant 8 : i32
    %361 = arith.muli %c7_i32_88, %c8_i32_89 : i32
    %362 = tpu.assume_multiple %361, 8 : i32
    %c7_i32_90 = arith.constant 7 : i32
    %363 = arith.subi %c7_i32_90, %c7_i32_88 : i32
    %c8_i32_91 = arith.constant 8 : i32
    %364 = arith.muli %363, %c8_i32_91 : i32
    %365 = tpu.assume_multiple %364, 8 : i32
    %366 = arith.index_cast %362 : i32 to index
    %c0_92 = arith.constant 0 : index
    %367 = vector.load %arg14[%366, %c0_92] : memref<64x256xf32, #tpu.memory_space<vmem>>, vector<8x128xf32>
    %368 = arith.truncf %341 : vector<8x32xf32> to vector<8x32xbf16>
    %cst_93 = arith.constant dense<0.000000e+00> : vector<8x128xf32>
    %369 = tpu.matmul %368, %15, %cst_93 {dimension_numbers = #tpu.dot_dimension_numbers<[1], [0], [0], [1], [0, 0, 1, 1], [], []>} : vector<8x32xbf16>, vector<32x128xbf16>, vector<8x128xf32> -> vector<8x128xf32>
    %370 = arith.addf %367, %369 : vector<8x128xf32>
    %371 = arith.index_cast %365 : i32 to index
    %c128_94 = arith.constant 128 : index
    %372 = vector.load %arg14[%371, %c128_94] : memref<64x256xf32, #tpu.memory_space<vmem>>, vector<8x128xf32>
    %373 = arith.truncf %356 : vector<8x32xf32> to vector<8x32xbf16>
    %cst_95 = arith.constant dense<0.000000e+00> : vector<8x128xf32>
    %374 = tpu.matmul %373, %16, %cst_95 {dimension_numbers = #tpu.dot_dimension_numbers<[1], [0], [0], [1], [0, 0, 1, 1], [], []>} : vector<8x32xbf16>, vector<32x128xbf16>, vector<8x128xf32> -> vector<8x128xf32>
    %375 = arith.addf %372, %374 : vector<8x128xf32>
    %376 = arith.negf %370 : vector<8x128xf32>
    %377 = math.exp %376 : vector<8x128xf32>
    %cst_96 = arith.constant 1.000000e+00 : f32
    %378 = vector.broadcast %cst_96 : f32 to vector<8x128xf32>
    %379 = arith.addf %378, %377 : vector<8x128xf32>
    %380 = arith.divf %378, %379 : vector<8x128xf32>
    %381 = math.tanh %370 : vector<8x128xf32>
    %382 = vector.extract_strided_slice %380 {offsets = [0, 0], sizes = [8, 32], strides = [1, 1]} : vector<8x128xf32> to vector<8x32xf32>
    %383 = vector.extract_strided_slice %380 {offsets = [0, 32], sizes = [8, 32], strides = [1, 1]} : vector<8x128xf32> to vector<8x32xf32>
    %384 = vector.extract_strided_slice %381 {offsets = [0, 64], sizes = [8, 32], strides = [1, 1]} : vector<8x128xf32> to vector<8x32xf32>
    %385 = vector.extract_strided_slice %380 {offsets = [0, 96], sizes = [8, 32], strides = [1, 1]} : vector<8x128xf32> to vector<8x32xf32>
    %386 = arith.mulf %383, %339 : vector<8x32xf32>
    %387 = arith.mulf %382, %384 : vector<8x32xf32>
    %388 = arith.addf %386, %387 : vector<8x32xf32>
    %389 = math.tanh %388 : vector<8x32xf32>
    %390 = arith.mulf %385, %389 : vector<8x32xf32>
    %391 = arith.negf %375 : vector<8x128xf32>
    %392 = math.exp %391 : vector<8x128xf32>
    %cst_97 = arith.constant 1.000000e+00 : f32
    %393 = vector.broadcast %cst_97 : f32 to vector<8x128xf32>
    %394 = arith.addf %393, %392 : vector<8x128xf32>
    %395 = arith.divf %393, %394 : vector<8x128xf32>
    %396 = math.tanh %375 : vector<8x128xf32>
    %397 = vector.extract_strided_slice %395 {offsets = [0, 0], sizes = [8, 32], strides = [1, 1]} : vector<8x128xf32> to vector<8x32xf32>
    %398 = vector.extract_strided_slice %395 {offsets = [0, 32], sizes = [8, 32], strides = [1, 1]} : vector<8x128xf32> to vector<8x32xf32>
    %399 = vector.extract_strided_slice %396 {offsets = [0, 64], sizes = [8, 32], strides = [1, 1]} : vector<8x128xf32> to vector<8x32xf32>
    %400 = vector.extract_strided_slice %395 {offsets = [0, 96], sizes = [8, 32], strides = [1, 1]} : vector<8x128xf32> to vector<8x32xf32>
    %401 = arith.mulf %398, %354 : vector<8x32xf32>
    %402 = arith.mulf %397, %399 : vector<8x32xf32>
    %403 = arith.addf %401, %402 : vector<8x32xf32>
    %404 = math.tanh %403 : vector<8x32xf32>
    %405 = arith.mulf %400, %404 : vector<8x32xf32>
    %406 = arith.index_cast %362 : i32 to index
    %c0_98 = arith.constant 0 : index
    %407 = vector.load %arg15[%406, %c0_98] : memref<64x128xf32, #tpu.memory_space<vmem>>, vector<8x32xf32>
    tpu.vector_store %arg15[%406, %c0_98], %390 {strides = array<i32>} : memref<64x128xf32, #tpu.memory_space<vmem>>, vector<8x32xf32>,
    %408 = arith.index_cast %365 : i32 to index
    %c32_99 = arith.constant 32 : index
    %409 = vector.load %arg15[%408, %c32_99] : memref<64x128xf32, #tpu.memory_space<vmem>>, vector<8x32xf32>
    tpu.vector_store %arg15[%408, %c32_99], %405 {strides = array<i32>} : memref<64x128xf32, #tpu.memory_space<vmem>>, vector<8x32xf32>,
    %c8_i32_100 = arith.constant 8 : i32
    %c0_101 = arith.constant 0 : index
    %c0_102 = arith.constant 0 : index
    %410 = vector.load %arg15[%c0_101, %c0_102] : memref<64x128xf32, #tpu.memory_space<vmem>>, vector<64x64xf32>
    %411 = arith.truncf %410 : vector<64x64xf32> to vector<64x64xbf16>
    %c0_103 = arith.constant 0 : index
    %c0_104 = arith.constant 0 : index
    %412 = vector.load %arg6[%c0_103, %c0_104] : memref<64x256xbf16, #tpu.memory_space<vmem>>, vector<64x256xbf16>
    %cst_105 = arith.constant dense<0.000000e+00> : vector<64x256xf32>
    %413 = tpu.matmul %411, %412, %cst_105 {dimension_numbers = #tpu.dot_dimension_numbers<[1], [0], [0], [1], [0, 0, 1, 1], [], []>} : vector<64x64xbf16>, vector<64x256xbf16>, vector<64x256xf32> -> vector<64x256xf32>
    %c0_106 = arith.constant 0 : index
    %c0_107 = arith.constant 0 : index
    %414 = vector.load %arg9[%c0_106, %c0_107] : memref<1x256xf32, #tpu.memory_space<vmem>>, vector<1x256xf32>
    %415 = vector.broadcast %414 : vector<1x256xf32> to vector<64x256xf32>
    %416 = arith.addf %413, %415 : vector<64x256xf32>
    %c0_108 = arith.constant 0 : index
    %c0_109 = arith.constant 0 : index
    %417 = vector.load %arg14[%c0_108, %c0_109] : memref<64x256xf32, #tpu.memory_space<vmem>>, vector<64x256xf32>
    tpu.vector_store %arg14[%c0_108, %c0_109], %416 {strides = array<i32>} : memref<64x256xf32, #tpu.memory_space<vmem>>, vector<64x256xf32>,
    %c0_110 = arith.constant 0 : index
    %c0_111 = arith.constant 0 : index
    %418 = vector.load %arg7[%c0_110, %c0_111] : memref<32x128xbf16, #tpu.memory_space<vmem>>, vector<32x128xbf16>
    %c0_112 = arith.constant 0 : index
    %c0_113 = arith.constant 0 : index
    %419 = vector.load %arg8[%c0_112, %c0_113] : memref<32x128xbf16, #tpu.memory_space<vmem>>, vector<32x128xbf16>
    %cst_114 = arith.constant 0.000000e+00 : f32
    %420 = vector.broadcast %cst_114 : f32 to vector<8x32xf32>
    %c0_i32_115 = arith.constant 0 : i32
    %c8_i32_116 = arith.constant 8 : i32
    %421 = arith.muli %c0_i32_115, %c8_i32_116 : i32
    %422 = tpu.assume_multiple %421, 8 : i32
    %c7_i32_117 = arith.constant 7 : i32
    %423 = arith.subi %c7_i32_117, %c0_i32_115 : i32
    %c8_i32_118 = arith.constant 8 : i32
    %424 = arith.muli %423, %c8_i32_118 : i32
    %425 = tpu.assume_multiple %424, 8 : i32
    %426 = arith.index_cast %422 : i32 to index
    %c0_119 = arith.constant 0 : index
    %427 = vector.load %arg14[%426, %c0_119] : memref<64x256xf32, #tpu.memory_space<vmem>>, vector<8x128xf32>
    %428 = arith.truncf %420 : vector<8x32xf32> to vector<8x32xbf16>
    %cst_120 = arith.constant dense<0.000000e+00> : vector<8x128xf32>
    %429 = tpu.matmul %428, %418, %cst_120 {dimension_numbers = #tpu.dot_dimension_numbers<[1], [0], [0], [1], [0, 0, 1, 1], [], []>} : vector<8x32xbf16>, vector<32x128xbf16>, vector<8x128xf32> -> vector<8x128xf32>
    %430 = arith.addf %427, %429 : vector<8x128xf32>
    %431 = arith.index_cast %425 : i32 to index
    %c128_121 = arith.constant 128 : index
    %432 = vector.load %arg14[%431, %c128_121] : memref<64x256xf32, #tpu.memory_space<vmem>>, vector<8x128xf32>
    %433 = arith.truncf %420 : vector<8x32xf32> to vector<8x32xbf16>
    %cst_122 = arith.constant dense<0.000000e+00> : vector<8x128xf32>
    %434 = tpu.matmul %433, %419, %cst_122 {dimension_numbers = #tpu.dot_dimension_numbers<[1], [0], [0], [1], [0, 0, 1, 1], [], []>} : vector<8x32xbf16>, vector<32x128xbf16>, vector<8x128xf32> -> vector<8x128xf32>
    %435 = arith.addf %432, %434 : vector<8x128xf32>
    %436 = arith.negf %430 : vector<8x128xf32>
    %437 = math.exp %436 : vector<8x128xf32>
    %cst_123 = arith.constant 1.000000e+00 : f32
    %438 = vector.broadcast %cst_123 : f32 to vector<8x128xf32>
    %439 = arith.addf %438, %437 : vector<8x128xf32>
    %440 = arith.divf %438, %439 : vector<8x128xf32>
    %441 = math.tanh %430 : vector<8x128xf32>
    %442 = vector.extract_strided_slice %440 {offsets = [0, 0], sizes = [8, 32], strides = [1, 1]} : vector<8x128xf32> to vector<8x32xf32>
    %443 = vector.extract_strided_slice %440 {offsets = [0, 32], sizes = [8, 32], strides = [1, 1]} : vector<8x128xf32> to vector<8x32xf32>
    %444 = vector.extract_strided_slice %441 {offsets = [0, 64], sizes = [8, 32], strides = [1, 1]} : vector<8x128xf32> to vector<8x32xf32>
    %445 = vector.extract_strided_slice %440 {offsets = [0, 96], sizes = [8, 32], strides = [1, 1]} : vector<8x128xf32> to vector<8x32xf32>
    %446 = arith.mulf %443, %420 : vector<8x32xf32>
    %447 = arith.mulf %442, %444 : vector<8x32xf32>
    %448 = arith.addf %446, %447 : vector<8x32xf32>
    %449 = math.tanh %448 : vector<8x32xf32>
    %450 = arith.mulf %445, %449 : vector<8x32xf32>
    %451 = arith.negf %435 : vector<8x128xf32>
    %452 = math.exp %451 : vector<8x128xf32>
    %cst_124 = arith.constant 1.000000e+00 : f32
    %453 = vector.broadcast %cst_124 : f32 to vector<8x128xf32>
    %454 = arith.addf %453, %452 : vector<8x128xf32>
    %455 = arith.divf %453, %454 : vector<8x128xf32>
    %456 = math.tanh %435 : vector<8x128xf32>
    %457 = vector.extract_strided_slice %455 {offsets = [0, 0], sizes = [8, 32], strides = [1, 1]} : vector<8x128xf32> to vector<8x32xf32>
    %458 = vector.extract_strided_slice %455 {offsets = [0, 32], sizes = [8, 32], strides = [1, 1]} : vector<8x128xf32> to vector<8x32xf32>
    %459 = vector.extract_strided_slice %456 {offsets = [0, 64], sizes = [8, 32], strides = [1, 1]} : vector<8x128xf32> to vector<8x32xf32>
    %460 = vector.extract_strided_slice %455 {offsets = [0, 96], sizes = [8, 32], strides = [1, 1]} : vector<8x128xf32> to vector<8x32xf32>
    %461 = arith.mulf %458, %420 : vector<8x32xf32>
    %462 = arith.mulf %457, %459 : vector<8x32xf32>
    %463 = arith.addf %461, %462 : vector<8x32xf32>
    %464 = math.tanh %463 : vector<8x32xf32>
    %465 = arith.mulf %460, %464 : vector<8x32xf32>
    %466 = arith.index_cast %422 : i32 to index
    %c64 = arith.constant 64 : index
    %467 = vector.load %arg15[%466, %c64] : memref<64x128xf32, #tpu.memory_space<vmem>>, vector<8x32xf32>
    tpu.vector_store %arg15[%466, %c64], %450 {strides = array<i32>} : memref<64x128xf32, #tpu.memory_space<vmem>>, vector<8x32xf32>,
    %468 = arith.index_cast %425 : i32 to index
    %c96 = arith.constant 96 : index
    %469 = vector.load %arg15[%468, %c96] : memref<64x128xf32, #tpu.memory_space<vmem>>, vector<8x32xf32>
    tpu.vector_store %arg15[%468, %c96], %465 {strides = array<i32>} : memref<64x128xf32, #tpu.memory_space<vmem>>, vector<8x32xf32>,
    %c1_i32_125 = arith.constant 1 : i32
    %c8_i32_126 = arith.constant 8 : i32
    %470 = arith.muli %c1_i32_125, %c8_i32_126 : i32
    %471 = tpu.assume_multiple %470, 8 : i32
    %c7_i32_127 = arith.constant 7 : i32
    %472 = arith.subi %c7_i32_127, %c1_i32_125 : i32
    %c8_i32_128 = arith.constant 8 : i32
    %473 = arith.muli %472, %c8_i32_128 : i32
    %474 = tpu.assume_multiple %473, 8 : i32
    %475 = arith.index_cast %471 : i32 to index
    %c0_129 = arith.constant 0 : index
    %476 = vector.load %arg14[%475, %c0_129] : memref<64x256xf32, #tpu.memory_space<vmem>>, vector<8x128xf32>
    %477 = arith.truncf %450 : vector<8x32xf32> to vector<8x32xbf16>
    %cst_130 = arith.constant dense<0.000000e+00> : vector<8x128xf32>
    %478 = tpu.matmul %477, %418, %cst_130 {dimension_numbers = #tpu.dot_dimension_numbers<[1], [0], [0], [1], [0, 0, 1, 1], [], []>} : vector<8x32xbf16>, vector<32x128xbf16>, vector<8x128xf32> -> vector<8x128xf32>
    %479 = arith.addf %476, %478 : vector<8x128xf32>
    %480 = arith.index_cast %474 : i32 to index
    %c128_131 = arith.constant 128 : index
    %481 = vector.load %arg14[%480, %c128_131] : memref<64x256xf32, #tpu.memory_space<vmem>>, vector<8x128xf32>
    %482 = arith.truncf %465 : vector<8x32xf32> to vector<8x32xbf16>
    %cst_132 = arith.constant dense<0.000000e+00> : vector<8x128xf32>
    %483 = tpu.matmul %482, %419, %cst_132 {dimension_numbers = #tpu.dot_dimension_numbers<[1], [0], [0], [1], [0, 0, 1, 1], [], []>} : vector<8x32xbf16>, vector<32x128xbf16>, vector<8x128xf32> -> vector<8x128xf32>
    %484 = arith.addf %481, %483 : vector<8x128xf32>
    %485 = arith.negf %479 : vector<8x128xf32>
    %486 = math.exp %485 : vector<8x128xf32>
    %cst_133 = arith.constant 1.000000e+00 : f32
    %487 = vector.broadcast %cst_133 : f32 to vector<8x128xf32>
    %488 = arith.addf %487, %486 : vector<8x128xf32>
    %489 = arith.divf %487, %488 : vector<8x128xf32>
    %490 = math.tanh %479 : vector<8x128xf32>
    %491 = vector.extract_strided_slice %489 {offsets = [0, 0], sizes = [8, 32], strides = [1, 1]} : vector<8x128xf32> to vector<8x32xf32>
    %492 = vector.extract_strided_slice %489 {offsets = [0, 32], sizes = [8, 32], strides = [1, 1]} : vector<8x128xf32> to vector<8x32xf32>
    %493 = vector.extract_strided_slice %490 {offsets = [0, 64], sizes = [8, 32], strides = [1, 1]} : vector<8x128xf32> to vector<8x32xf32>
    %494 = vector.extract_strided_slice %489 {offsets = [0, 96], sizes = [8, 32], strides = [1, 1]} : vector<8x128xf32> to vector<8x32xf32>
    %495 = arith.mulf %492, %448 : vector<8x32xf32>
    %496 = arith.mulf %491, %493 : vector<8x32xf32>
    %497 = arith.addf %495, %496 : vector<8x32xf32>
    %498 = math.tanh %497 : vector<8x32xf32>
    %499 = arith.mulf %494, %498 : vector<8x32xf32>
    %500 = arith.negf %484 : vector<8x128xf32>
    %501 = math.exp %500 : vector<8x128xf32>
    %cst_134 = arith.constant 1.000000e+00 : f32
    %502 = vector.broadcast %cst_134 : f32 to vector<8x128xf32>
    %503 = arith.addf %502, %501 : vector<8x128xf32>
    %504 = arith.divf %502, %503 : vector<8x128xf32>
    %505 = math.tanh %484 : vector<8x128xf32>
    %506 = vector.extract_strided_slice %504 {offsets = [0, 0], sizes = [8, 32], strides = [1, 1]} : vector<8x128xf32> to vector<8x32xf32>
    %507 = vector.extract_strided_slice %504 {offsets = [0, 32], sizes = [8, 32], strides = [1, 1]} : vector<8x128xf32> to vector<8x32xf32>
    %508 = vector.extract_strided_slice %505 {offsets = [0, 64], sizes = [8, 32], strides = [1, 1]} : vector<8x128xf32> to vector<8x32xf32>
    %509 = vector.extract_strided_slice %504 {offsets = [0, 96], sizes = [8, 32], strides = [1, 1]} : vector<8x128xf32> to vector<8x32xf32>
    %510 = arith.mulf %507, %463 : vector<8x32xf32>
    %511 = arith.mulf %506, %508 : vector<8x32xf32>
    %512 = arith.addf %510, %511 : vector<8x32xf32>
    %513 = math.tanh %512 : vector<8x32xf32>
    %514 = arith.mulf %509, %513 : vector<8x32xf32>
    %515 = arith.index_cast %471 : i32 to index
    %c64_135 = arith.constant 64 : index
    %516 = vector.load %arg15[%515, %c64_135] : memref<64x128xf32, #tpu.memory_space<vmem>>, vector<8x32xf32>
    tpu.vector_store %arg15[%515, %c64_135], %499 {strides = array<i32>} : memref<64x128xf32, #tpu.memory_space<vmem>>, vector<8x32xf32>,
    %517 = arith.index_cast %474 : i32 to index
    %c96_136 = arith.constant 96 : index
    %518 = vector.load %arg15[%517, %c96_136] : memref<64x128xf32, #tpu.memory_space<vmem>>, vector<8x32xf32>
    tpu.vector_store %arg15[%517, %c96_136], %514 {strides = array<i32>} : memref<64x128xf32, #tpu.memory_space<vmem>>, vector<8x32xf32>,
    %c2_i32_137 = arith.constant 2 : i32
    %c8_i32_138 = arith.constant 8 : i32
    %519 = arith.muli %c2_i32_137, %c8_i32_138 : i32
    %520 = tpu.assume_multiple %519, 8 : i32
    %c7_i32_139 = arith.constant 7 : i32
    %521 = arith.subi %c7_i32_139, %c2_i32_137 : i32
    %c8_i32_140 = arith.constant 8 : i32
    %522 = arith.muli %521, %c8_i32_140 : i32
    %523 = tpu.assume_multiple %522, 8 : i32
    %524 = arith.index_cast %520 : i32 to index
    %c0_141 = arith.constant 0 : index
    %525 = vector.load %arg14[%524, %c0_141] : memref<64x256xf32, #tpu.memory_space<vmem>>, vector<8x128xf32>
    %526 = arith.truncf %499 : vector<8x32xf32> to vector<8x32xbf16>
    %cst_142 = arith.constant dense<0.000000e+00> : vector<8x128xf32>
    %527 = tpu.matmul %526, %418, %cst_142 {dimension_numbers = #tpu.dot_dimension_numbers<[1], [0], [0], [1], [0, 0, 1, 1], [], []>} : vector<8x32xbf16>, vector<32x128xbf16>, vector<8x128xf32> -> vector<8x128xf32>
    %528 = arith.addf %525, %527 : vector<8x128xf32>
    %529 = arith.index_cast %523 : i32 to index
    %c128_143 = arith.constant 128 : index
    %530 = vector.load %arg14[%529, %c128_143] : memref<64x256xf32, #tpu.memory_space<vmem>>, vector<8x128xf32>
    %531 = arith.truncf %514 : vector<8x32xf32> to vector<8x32xbf16>
    %cst_144 = arith.constant dense<0.000000e+00> : vector<8x128xf32>
    %532 = tpu.matmul %531, %419, %cst_144 {dimension_numbers = #tpu.dot_dimension_numbers<[1], [0], [0], [1], [0, 0, 1, 1], [], []>} : vector<8x32xbf16>, vector<32x128xbf16>, vector<8x128xf32> -> vector<8x128xf32>
    %533 = arith.addf %530, %532 : vector<8x128xf32>
    %534 = arith.negf %528 : vector<8x128xf32>
    %535 = math.exp %534 : vector<8x128xf32>
    %cst_145 = arith.constant 1.000000e+00 : f32
    %536 = vector.broadcast %cst_145 : f32 to vector<8x128xf32>
    %537 = arith.addf %536, %535 : vector<8x128xf32>
    %538 = arith.divf %536, %537 : vector<8x128xf32>
    %539 = math.tanh %528 : vector<8x128xf32>
    %540 = vector.extract_strided_slice %538 {offsets = [0, 0], sizes = [8, 32], strides = [1, 1]} : vector<8x128xf32> to vector<8x32xf32>
    %541 = vector.extract_strided_slice %538 {offsets = [0, 32], sizes = [8, 32], strides = [1, 1]} : vector<8x128xf32> to vector<8x32xf32>
    %542 = vector.extract_strided_slice %539 {offsets = [0, 64], sizes = [8, 32], strides = [1, 1]} : vector<8x128xf32> to vector<8x32xf32>
    %543 = vector.extract_strided_slice %538 {offsets = [0, 96], sizes = [8, 32], strides = [1, 1]} : vector<8x128xf32> to vector<8x32xf32>
    %544 = arith.mulf %541, %497 : vector<8x32xf32>
    %545 = arith.mulf %540, %542 : vector<8x32xf32>
    %546 = arith.addf %544, %545 : vector<8x32xf32>
    %547 = math.tanh %546 : vector<8x32xf32>
    %548 = arith.mulf %543, %547 : vector<8x32xf32>
    %549 = arith.negf %533 : vector<8x128xf32>
    %550 = math.exp %549 : vector<8x128xf32>
    %cst_146 = arith.constant 1.000000e+00 : f32
    %551 = vector.broadcast %cst_146 : f32 to vector<8x128xf32>
    %552 = arith.addf %551, %550 : vector<8x128xf32>
    %553 = arith.divf %551, %552 : vector<8x128xf32>
    %554 = math.tanh %533 : vector<8x128xf32>
    %555 = vector.extract_strided_slice %553 {offsets = [0, 0], sizes = [8, 32], strides = [1, 1]} : vector<8x128xf32> to vector<8x32xf32>
    %556 = vector.extract_strided_slice %553 {offsets = [0, 32], sizes = [8, 32], strides = [1, 1]} : vector<8x128xf32> to vector<8x32xf32>
    %557 = vector.extract_strided_slice %554 {offsets = [0, 64], sizes = [8, 32], strides = [1, 1]} : vector<8x128xf32> to vector<8x32xf32>
    %558 = vector.extract_strided_slice %553 {offsets = [0, 96], sizes = [8, 32], strides = [1, 1]} : vector<8x128xf32> to vector<8x32xf32>
    %559 = arith.mulf %556, %512 : vector<8x32xf32>
    %560 = arith.mulf %555, %557 : vector<8x32xf32>
    %561 = arith.addf %559, %560 : vector<8x32xf32>
    %562 = math.tanh %561 : vector<8x32xf32>
    %563 = arith.mulf %558, %562 : vector<8x32xf32>
    %564 = arith.index_cast %520 : i32 to index
    %c64_147 = arith.constant 64 : index
    %565 = vector.load %arg15[%564, %c64_147] : memref<64x128xf32, #tpu.memory_space<vmem>>, vector<8x32xf32>
    tpu.vector_store %arg15[%564, %c64_147], %548 {strides = array<i32>} : memref<64x128xf32, #tpu.memory_space<vmem>>, vector<8x32xf32>,
    %566 = arith.index_cast %523 : i32 to index
    %c96_148 = arith.constant 96 : index
    %567 = vector.load %arg15[%566, %c96_148] : memref<64x128xf32, #tpu.memory_space<vmem>>, vector<8x32xf32>
    tpu.vector_store %arg15[%566, %c96_148], %563 {strides = array<i32>} : memref<64x128xf32, #tpu.memory_space<vmem>>, vector<8x32xf32>,
    %c3_i32_149 = arith.constant 3 : i32
    %c8_i32_150 = arith.constant 8 : i32
    %568 = arith.muli %c3_i32_149, %c8_i32_150 : i32
    %569 = tpu.assume_multiple %568, 8 : i32
    %c7_i32_151 = arith.constant 7 : i32
    %570 = arith.subi %c7_i32_151, %c3_i32_149 : i32
    %c8_i32_152 = arith.constant 8 : i32
    %571 = arith.muli %570, %c8_i32_152 : i32
    %572 = tpu.assume_multiple %571, 8 : i32
    %573 = arith.index_cast %569 : i32 to index
    %c0_153 = arith.constant 0 : index
    %574 = vector.load %arg14[%573, %c0_153] : memref<64x256xf32, #tpu.memory_space<vmem>>, vector<8x128xf32>
    %575 = arith.truncf %548 : vector<8x32xf32> to vector<8x32xbf16>
    %cst_154 = arith.constant dense<0.000000e+00> : vector<8x128xf32>
    %576 = tpu.matmul %575, %418, %cst_154 {dimension_numbers = #tpu.dot_dimension_numbers<[1], [0], [0], [1], [0, 0, 1, 1], [], []>} : vector<8x32xbf16>, vector<32x128xbf16>, vector<8x128xf32> -> vector<8x128xf32>
    %577 = arith.addf %574, %576 : vector<8x128xf32>
    %578 = arith.index_cast %572 : i32 to index
    %c128_155 = arith.constant 128 : index
    %579 = vector.load %arg14[%578, %c128_155] : memref<64x256xf32, #tpu.memory_space<vmem>>, vector<8x128xf32>
    %580 = arith.truncf %563 : vector<8x32xf32> to vector<8x32xbf16>
    %cst_156 = arith.constant dense<0.000000e+00> : vector<8x128xf32>
    %581 = tpu.matmul %580, %419, %cst_156 {dimension_numbers = #tpu.dot_dimension_numbers<[1], [0], [0], [1], [0, 0, 1, 1], [], []>} : vector<8x32xbf16>, vector<32x128xbf16>, vector<8x128xf32> -> vector<8x128xf32>
    %582 = arith.addf %579, %581 : vector<8x128xf32>
    %583 = arith.negf %577 : vector<8x128xf32>
    %584 = math.exp %583 : vector<8x128xf32>
    %cst_157 = arith.constant 1.000000e+00 : f32
    %585 = vector.broadcast %cst_157 : f32 to vector<8x128xf32>
    %586 = arith.addf %585, %584 : vector<8x128xf32>
    %587 = arith.divf %585, %586 : vector<8x128xf32>
    %588 = math.tanh %577 : vector<8x128xf32>
    %589 = vector.extract_strided_slice %587 {offsets = [0, 0], sizes = [8, 32], strides = [1, 1]} : vector<8x128xf32> to vector<8x32xf32>
    %590 = vector.extract_strided_slice %587 {offsets = [0, 32], sizes = [8, 32], strides = [1, 1]} : vector<8x128xf32> to vector<8x32xf32>
    %591 = vector.extract_strided_slice %588 {offsets = [0, 64], sizes = [8, 32], strides = [1, 1]} : vector<8x128xf32> to vector<8x32xf32>
    %592 = vector.extract_strided_slice %587 {offsets = [0, 96], sizes = [8, 32], strides = [1, 1]} : vector<8x128xf32> to vector<8x32xf32>
    %593 = arith.mulf %590, %546 : vector<8x32xf32>
    %594 = arith.mulf %589, %591 : vector<8x32xf32>
    %595 = arith.addf %593, %594 : vector<8x32xf32>
    %596 = math.tanh %595 : vector<8x32xf32>
    %597 = arith.mulf %592, %596 : vector<8x32xf32>
    %598 = arith.negf %582 : vector<8x128xf32>
    %599 = math.exp %598 : vector<8x128xf32>
    %cst_158 = arith.constant 1.000000e+00 : f32
    %600 = vector.broadcast %cst_158 : f32 to vector<8x128xf32>
    %601 = arith.addf %600, %599 : vector<8x128xf32>
    %602 = arith.divf %600, %601 : vector<8x128xf32>
    %603 = math.tanh %582 : vector<8x128xf32>
    %604 = vector.extract_strided_slice %602 {offsets = [0, 0], sizes = [8, 32], strides = [1, 1]} : vector<8x128xf32> to vector<8x32xf32>
    %605 = vector.extract_strided_slice %602 {offsets = [0, 32], sizes = [8, 32], strides = [1, 1]} : vector<8x128xf32> to vector<8x32xf32>
    %606 = vector.extract_strided_slice %603 {offsets = [0, 64], sizes = [8, 32], strides = [1, 1]} : vector<8x128xf32> to vector<8x32xf32>
    %607 = vector.extract_strided_slice %602 {offsets = [0, 96], sizes = [8, 32], strides = [1, 1]} : vector<8x128xf32> to vector<8x32xf32>
    %608 = arith.mulf %605, %561 : vector<8x32xf32>
    %609 = arith.mulf %604, %606 : vector<8x32xf32>
    %610 = arith.addf %608, %609 : vector<8x32xf32>
    %611 = math.tanh %610 : vector<8x32xf32>
    %612 = arith.mulf %607, %611 : vector<8x32xf32>
    %613 = arith.index_cast %569 : i32 to index
    %c64_159 = arith.constant 64 : index
    %614 = vector.load %arg15[%613, %c64_159] : memref<64x128xf32, #tpu.memory_space<vmem>>, vector<8x32xf32>
    tpu.vector_store %arg15[%613, %c64_159], %597 {strides = array<i32>} : memref<64x128xf32, #tpu.memory_space<vmem>>, vector<8x32xf32>,
    %615 = arith.index_cast %572 : i32 to index
    %c96_160 = arith.constant 96 : index
    %616 = vector.load %arg15[%615, %c96_160] : memref<64x128xf32, #tpu.memory_space<vmem>>, vector<8x32xf32>
    tpu.vector_store %arg15[%615, %c96_160], %612 {strides = array<i32>} : memref<64x128xf32, #tpu.memory_space<vmem>>, vector<8x32xf32>,
    %c4_i32_161 = arith.constant 4 : i32
    %c8_i32_162 = arith.constant 8 : i32
    %617 = arith.muli %c4_i32_161, %c8_i32_162 : i32
    %618 = tpu.assume_multiple %617, 8 : i32
    %c7_i32_163 = arith.constant 7 : i32
    %619 = arith.subi %c7_i32_163, %c4_i32_161 : i32
    %c8_i32_164 = arith.constant 8 : i32
    %620 = arith.muli %619, %c8_i32_164 : i32
    %621 = tpu.assume_multiple %620, 8 : i32
    %622 = arith.index_cast %618 : i32 to index
    %c0_165 = arith.constant 0 : index
    %623 = vector.load %arg14[%622, %c0_165] : memref<64x256xf32, #tpu.memory_space<vmem>>, vector<8x128xf32>
    %624 = arith.truncf %597 : vector<8x32xf32> to vector<8x32xbf16>
    %cst_166 = arith.constant dense<0.000000e+00> : vector<8x128xf32>
    %625 = tpu.matmul %624, %418, %cst_166 {dimension_numbers = #tpu.dot_dimension_numbers<[1], [0], [0], [1], [0, 0, 1, 1], [], []>} : vector<8x32xbf16>, vector<32x128xbf16>, vector<8x128xf32> -> vector<8x128xf32>
    %626 = arith.addf %623, %625 : vector<8x128xf32>
    %627 = arith.index_cast %621 : i32 to index
    %c128_167 = arith.constant 128 : index
    %628 = vector.load %arg14[%627, %c128_167] : memref<64x256xf32, #tpu.memory_space<vmem>>, vector<8x128xf32>
    %629 = arith.truncf %612 : vector<8x32xf32> to vector<8x32xbf16>
    %cst_168 = arith.constant dense<0.000000e+00> : vector<8x128xf32>
    %630 = tpu.matmul %629, %419, %cst_168 {dimension_numbers = #tpu.dot_dimension_numbers<[1], [0], [0], [1], [0, 0, 1, 1], [], []>} : vector<8x32xbf16>, vector<32x128xbf16>, vector<8x128xf32> -> vector<8x128xf32>
    %631 = arith.addf %628, %630 : vector<8x128xf32>
    %632 = arith.negf %626 : vector<8x128xf32>
    %633 = math.exp %632 : vector<8x128xf32>
    %cst_169 = arith.constant 1.000000e+00 : f32
    %634 = vector.broadcast %cst_169 : f32 to vector<8x128xf32>
    %635 = arith.addf %634, %633 : vector<8x128xf32>
    %636 = arith.divf %634, %635 : vector<8x128xf32>
    %637 = math.tanh %626 : vector<8x128xf32>
    %638 = vector.extract_strided_slice %636 {offsets = [0, 0], sizes = [8, 32], strides = [1, 1]} : vector<8x128xf32> to vector<8x32xf32>
    %639 = vector.extract_strided_slice %636 {offsets = [0, 32], sizes = [8, 32], strides = [1, 1]} : vector<8x128xf32> to vector<8x32xf32>
    %640 = vector.extract_strided_slice %637 {offsets = [0, 64], sizes = [8, 32], strides = [1, 1]} : vector<8x128xf32> to vector<8x32xf32>
    %641 = vector.extract_strided_slice %636 {offsets = [0, 96], sizes = [8, 32], strides = [1, 1]} : vector<8x128xf32> to vector<8x32xf32>
    %642 = arith.mulf %639, %595 : vector<8x32xf32>
    %643 = arith.mulf %638, %640 : vector<8x32xf32>
    %644 = arith.addf %642, %643 : vector<8x32xf32>
    %645 = math.tanh %644 : vector<8x32xf32>
    %646 = arith.mulf %641, %645 : vector<8x32xf32>
    %647 = arith.negf %631 : vector<8x128xf32>
    %648 = math.exp %647 : vector<8x128xf32>
    %cst_170 = arith.constant 1.000000e+00 : f32
    %649 = vector.broadcast %cst_170 : f32 to vector<8x128xf32>
    %650 = arith.addf %649, %648 : vector<8x128xf32>
    %651 = arith.divf %649, %650 : vector<8x128xf32>
    %652 = math.tanh %631 : vector<8x128xf32>
    %653 = vector.extract_strided_slice %651 {offsets = [0, 0], sizes = [8, 32], strides = [1, 1]} : vector<8x128xf32> to vector<8x32xf32>
    %654 = vector.extract_strided_slice %651 {offsets = [0, 32], sizes = [8, 32], strides = [1, 1]} : vector<8x128xf32> to vector<8x32xf32>
    %655 = vector.extract_strided_slice %652 {offsets = [0, 64], sizes = [8, 32], strides = [1, 1]} : vector<8x128xf32> to vector<8x32xf32>
    %656 = vector.extract_strided_slice %651 {offsets = [0, 96], sizes = [8, 32], strides = [1, 1]} : vector<8x128xf32> to vector<8x32xf32>
    %657 = arith.mulf %654, %610 : vector<8x32xf32>
    %658 = arith.mulf %653, %655 : vector<8x32xf32>
    %659 = arith.addf %657, %658 : vector<8x32xf32>
    %660 = math.tanh %659 : vector<8x32xf32>
    %661 = arith.mulf %656, %660 : vector<8x32xf32>
    %662 = arith.index_cast %618 : i32 to index
    %c64_171 = arith.constant 64 : index
    %663 = vector.load %arg15[%662, %c64_171] : memref<64x128xf32, #tpu.memory_space<vmem>>, vector<8x32xf32>
    tpu.vector_store %arg15[%662, %c64_171], %646 {strides = array<i32>} : memref<64x128xf32, #tpu.memory_space<vmem>>, vector<8x32xf32>,
    %664 = arith.index_cast %621 : i32 to index
    %c96_172 = arith.constant 96 : index
    %665 = vector.load %arg15[%664, %c96_172] : memref<64x128xf32, #tpu.memory_space<vmem>>, vector<8x32xf32>
    tpu.vector_store %arg15[%664, %c96_172], %661 {strides = array<i32>} : memref<64x128xf32, #tpu.memory_space<vmem>>, vector<8x32xf32>,
    %c5_i32_173 = arith.constant 5 : i32
    %c8_i32_174 = arith.constant 8 : i32
    %666 = arith.muli %c5_i32_173, %c8_i32_174 : i32
    %667 = tpu.assume_multiple %666, 8 : i32
    %c7_i32_175 = arith.constant 7 : i32
    %668 = arith.subi %c7_i32_175, %c5_i32_173 : i32
    %c8_i32_176 = arith.constant 8 : i32
    %669 = arith.muli %668, %c8_i32_176 : i32
    %670 = tpu.assume_multiple %669, 8 : i32
    %671 = arith.index_cast %667 : i32 to index
    %c0_177 = arith.constant 0 : index
    %672 = vector.load %arg14[%671, %c0_177] : memref<64x256xf32, #tpu.memory_space<vmem>>, vector<8x128xf32>
    %673 = arith.truncf %646 : vector<8x32xf32> to vector<8x32xbf16>
    %cst_178 = arith.constant dense<0.000000e+00> : vector<8x128xf32>
    %674 = tpu.matmul %673, %418, %cst_178 {dimension_numbers = #tpu.dot_dimension_numbers<[1], [0], [0], [1], [0, 0, 1, 1], [], []>} : vector<8x32xbf16>, vector<32x128xbf16>, vector<8x128xf32> -> vector<8x128xf32>
    %675 = arith.addf %672, %674 : vector<8x128xf32>
    %676 = arith.index_cast %670 : i32 to index
    %c128_179 = arith.constant 128 : index
    %677 = vector.load %arg14[%676, %c128_179] : memref<64x256xf32, #tpu.memory_space<vmem>>, vector<8x128xf32>
    %678 = arith.truncf %661 : vector<8x32xf32> to vector<8x32xbf16>
    %cst_180 = arith.constant dense<0.000000e+00> : vector<8x128xf32>
    %679 = tpu.matmul %678, %419, %cst_180 {dimension_numbers = #tpu.dot_dimension_numbers<[1], [0], [0], [1], [0, 0, 1, 1], [], []>} : vector<8x32xbf16>, vector<32x128xbf16>, vector<8x128xf32> -> vector<8x128xf32>
    %680 = arith.addf %677, %679 : vector<8x128xf32>
    %681 = arith.negf %675 : vector<8x128xf32>
    %682 = math.exp %681 : vector<8x128xf32>
    %cst_181 = arith.constant 1.000000e+00 : f32
    %683 = vector.broadcast %cst_181 : f32 to vector<8x128xf32>
    %684 = arith.addf %683, %682 : vector<8x128xf32>
    %685 = arith.divf %683, %684 : vector<8x128xf32>
    %686 = math.tanh %675 : vector<8x128xf32>
    %687 = vector.extract_strided_slice %685 {offsets = [0, 0], sizes = [8, 32], strides = [1, 1]} : vector<8x128xf32> to vector<8x32xf32>
    %688 = vector.extract_strided_slice %685 {offsets = [0, 32], sizes = [8, 32], strides = [1, 1]} : vector<8x128xf32> to vector<8x32xf32>
    %689 = vector.extract_strided_slice %686 {offsets = [0, 64], sizes = [8, 32], strides = [1, 1]} : vector<8x128xf32> to vector<8x32xf32>
    %690 = vector.extract_strided_slice %685 {offsets = [0, 96], sizes = [8, 32], strides = [1, 1]} : vector<8x128xf32> to vector<8x32xf32>
    %691 = arith.mulf %688, %644 : vector<8x32xf32>
    %692 = arith.mulf %687, %689 : vector<8x32xf32>
    %693 = arith.addf %691, %692 : vector<8x32xf32>
    %694 = math.tanh %693 : vector<8x32xf32>
    %695 = arith.mulf %690, %694 : vector<8x32xf32>
    %696 = arith.negf %680 : vector<8x128xf32>
    %697 = math.exp %696 : vector<8x128xf32>
    %cst_182 = arith.constant 1.000000e+00 : f32
    %698 = vector.broadcast %cst_182 : f32 to vector<8x128xf32>
    %699 = arith.addf %698, %697 : vector<8x128xf32>
    %700 = arith.divf %698, %699 : vector<8x128xf32>
    %701 = math.tanh %680 : vector<8x128xf32>
    %702 = vector.extract_strided_slice %700 {offsets = [0, 0], sizes = [8, 32], strides = [1, 1]} : vector<8x128xf32> to vector<8x32xf32>
    %703 = vector.extract_strided_slice %700 {offsets = [0, 32], sizes = [8, 32], strides = [1, 1]} : vector<8x128xf32> to vector<8x32xf32>
    %704 = vector.extract_strided_slice %701 {offsets = [0, 64], sizes = [8, 32], strides = [1, 1]} : vector<8x128xf32> to vector<8x32xf32>
    %705 = vector.extract_strided_slice %700 {offsets = [0, 96], sizes = [8, 32], strides = [1, 1]} : vector<8x128xf32> to vector<8x32xf32>
    %706 = arith.mulf %703, %659 : vector<8x32xf32>
    %707 = arith.mulf %702, %704 : vector<8x32xf32>
    %708 = arith.addf %706, %707 : vector<8x32xf32>
    %709 = math.tanh %708 : vector<8x32xf32>
    %710 = arith.mulf %705, %709 : vector<8x32xf32>
    %711 = arith.index_cast %667 : i32 to index
    %c64_183 = arith.constant 64 : index
    %712 = vector.load %arg15[%711, %c64_183] : memref<64x128xf32, #tpu.memory_space<vmem>>, vector<8x32xf32>
    tpu.vector_store %arg15[%711, %c64_183], %695 {strides = array<i32>} : memref<64x128xf32, #tpu.memory_space<vmem>>, vector<8x32xf32>,
    %713 = arith.index_cast %670 : i32 to index
    %c96_184 = arith.constant 96 : index
    %714 = vector.load %arg15[%713, %c96_184] : memref<64x128xf32, #tpu.memory_space<vmem>>, vector<8x32xf32>
    tpu.vector_store %arg15[%713, %c96_184], %710 {strides = array<i32>} : memref<64x128xf32, #tpu.memory_space<vmem>>, vector<8x32xf32>,
    %c6_i32_185 = arith.constant 6 : i32
    %c8_i32_186 = arith.constant 8 : i32
    %715 = arith.muli %c6_i32_185, %c8_i32_186 : i32
    %716 = tpu.assume_multiple %715, 8 : i32
    %c7_i32_187 = arith.constant 7 : i32
    %717 = arith.subi %c7_i32_187, %c6_i32_185 : i32
    %c8_i32_188 = arith.constant 8 : i32
    %718 = arith.muli %717, %c8_i32_188 : i32
    %719 = tpu.assume_multiple %718, 8 : i32
    %720 = arith.index_cast %716 : i32 to index
    %c0_189 = arith.constant 0 : index
    %721 = vector.load %arg14[%720, %c0_189] : memref<64x256xf32, #tpu.memory_space<vmem>>, vector<8x128xf32>
    %722 = arith.truncf %695 : vector<8x32xf32> to vector<8x32xbf16>
    %cst_190 = arith.constant dense<0.000000e+00> : vector<8x128xf32>
    %723 = tpu.matmul %722, %418, %cst_190 {dimension_numbers = #tpu.dot_dimension_numbers<[1], [0], [0], [1], [0, 0, 1, 1], [], []>} : vector<8x32xbf16>, vector<32x128xbf16>, vector<8x128xf32> -> vector<8x128xf32>
    %724 = arith.addf %721, %723 : vector<8x128xf32>
    %725 = arith.index_cast %719 : i32 to index
    %c128_191 = arith.constant 128 : index
    %726 = vector.load %arg14[%725, %c128_191] : memref<64x256xf32, #tpu.memory_space<vmem>>, vector<8x128xf32>
    %727 = arith.truncf %710 : vector<8x32xf32> to vector<8x32xbf16>
    %cst_192 = arith.constant dense<0.000000e+00> : vector<8x128xf32>
    %728 = tpu.matmul %727, %419, %cst_192 {dimension_numbers = #tpu.dot_dimension_numbers<[1], [0], [0], [1], [0, 0, 1, 1], [], []>} : vector<8x32xbf16>, vector<32x128xbf16>, vector<8x128xf32> -> vector<8x128xf32>
    %729 = arith.addf %726, %728 : vector<8x128xf32>
    %730 = arith.negf %724 : vector<8x128xf32>
    %731 = math.exp %730 : vector<8x128xf32>
    %cst_193 = arith.constant 1.000000e+00 : f32
    %732 = vector.broadcast %cst_193 : f32 to vector<8x128xf32>
    %733 = arith.addf %732, %731 : vector<8x128xf32>
    %734 = arith.divf %732, %733 : vector<8x128xf32>
    %735 = math.tanh %724 : vector<8x128xf32>
    %736 = vector.extract_strided_slice %734 {offsets = [0, 0], sizes = [8, 32], strides = [1, 1]} : vector<8x128xf32> to vector<8x32xf32>
    %737 = vector.extract_strided_slice %734 {offsets = [0, 32], sizes = [8, 32], strides = [1, 1]} : vector<8x128xf32> to vector<8x32xf32>
    %738 = vector.extract_strided_slice %735 {offsets = [0, 64], sizes = [8, 32], strides = [1, 1]} : vector<8x128xf32> to vector<8x32xf32>
    %739 = vector.extract_strided_slice %734 {offsets = [0, 96], sizes = [8, 32], strides = [1, 1]} : vector<8x128xf32> to vector<8x32xf32>
    %740 = arith.mulf %737, %693 : vector<8x32xf32>
    %741 = arith.mulf %736, %738 : vector<8x32xf32>
    %742 = arith.addf %740, %741 : vector<8x32xf32>
    %743 = math.tanh %742 : vector<8x32xf32>
    %744 = arith.mulf %739, %743 : vector<8x32xf32>
    %745 = arith.negf %729 : vector<8x128xf32>
    %746 = math.exp %745 : vector<8x128xf32>
    %cst_194 = arith.constant 1.000000e+00 : f32
    %747 = vector.broadcast %cst_194 : f32 to vector<8x128xf32>
    %748 = arith.addf %747, %746 : vector<8x128xf32>
    %749 = arith.divf %747, %748 : vector<8x128xf32>
    %750 = math.tanh %729 : vector<8x128xf32>
    %751 = vector.extract_strided_slice %749 {offsets = [0, 0], sizes = [8, 32], strides = [1, 1]} : vector<8x128xf32> to vector<8x32xf32>
    %752 = vector.extract_strided_slice %749 {offsets = [0, 32], sizes = [8, 32], strides = [1, 1]} : vector<8x128xf32> to vector<8x32xf32>
    %753 = vector.extract_strided_slice %750 {offsets = [0, 64], sizes = [8, 32], strides = [1, 1]} : vector<8x128xf32> to vector<8x32xf32>
    %754 = vector.extract_strided_slice %749 {offsets = [0, 96], sizes = [8, 32], strides = [1, 1]} : vector<8x128xf32> to vector<8x32xf32>
    %755 = arith.mulf %752, %708 : vector<8x32xf32>
    %756 = arith.mulf %751, %753 : vector<8x32xf32>
    %757 = arith.addf %755, %756 : vector<8x32xf32>
    %758 = math.tanh %757 : vector<8x32xf32>
    %759 = arith.mulf %754, %758 : vector<8x32xf32>
    %760 = arith.index_cast %716 : i32 to index
    %c64_195 = arith.constant 64 : index
    %761 = vector.load %arg15[%760, %c64_195] : memref<64x128xf32, #tpu.memory_space<vmem>>, vector<8x32xf32>
    tpu.vector_store %arg15[%760, %c64_195], %744 {strides = array<i32>} : memref<64x128xf32, #tpu.memory_space<vmem>>, vector<8x32xf32>,
    %762 = arith.index_cast %719 : i32 to index
    %c96_196 = arith.constant 96 : index
    %763 = vector.load %arg15[%762, %c96_196] : memref<64x128xf32, #tpu.memory_space<vmem>>, vector<8x32xf32>
    tpu.vector_store %arg15[%762, %c96_196], %759 {strides = array<i32>} : memref<64x128xf32, #tpu.memory_space<vmem>>, vector<8x32xf32>,
    %c7_i32_197 = arith.constant 7 : i32
    %c8_i32_198 = arith.constant 8 : i32
    %764 = arith.muli %c7_i32_197, %c8_i32_198 : i32
    %765 = tpu.assume_multiple %764, 8 : i32
    %c7_i32_199 = arith.constant 7 : i32
    %766 = arith.subi %c7_i32_199, %c7_i32_197 : i32
    %c8_i32_200 = arith.constant 8 : i32
    %767 = arith.muli %766, %c8_i32_200 : i32
    %768 = tpu.assume_multiple %767, 8 : i32
    %769 = arith.index_cast %765 : i32 to index
    %c0_201 = arith.constant 0 : index
    %770 = vector.load %arg14[%769, %c0_201] : memref<64x256xf32, #tpu.memory_space<vmem>>, vector<8x128xf32>
    %771 = arith.truncf %744 : vector<8x32xf32> to vector<8x32xbf16>
    %cst_202 = arith.constant dense<0.000000e+00> : vector<8x128xf32>
    %772 = tpu.matmul %771, %418, %cst_202 {dimension_numbers = #tpu.dot_dimension_numbers<[1], [0], [0], [1], [0, 0, 1, 1], [], []>} : vector<8x32xbf16>, vector<32x128xbf16>, vector<8x128xf32> -> vector<8x128xf32>
    %773 = arith.addf %770, %772 : vector<8x128xf32>
    %774 = arith.index_cast %768 : i32 to index
    %c128_203 = arith.constant 128 : index
    %775 = vector.load %arg14[%774, %c128_203] : memref<64x256xf32, #tpu.memory_space<vmem>>, vector<8x128xf32>
    %776 = arith.truncf %759 : vector<8x32xf32> to vector<8x32xbf16>
    %cst_204 = arith.constant dense<0.000000e+00> : vector<8x128xf32>
    %777 = tpu.matmul %776, %419, %cst_204 {dimension_numbers = #tpu.dot_dimension_numbers<[1], [0], [0], [1], [0, 0, 1, 1], [], []>} : vector<8x32xbf16>, vector<32x128xbf16>, vector<8x128xf32> -> vector<8x128xf32>
    %778 = arith.addf %775, %777 : vector<8x128xf32>
    %779 = arith.negf %773 : vector<8x128xf32>
    %780 = math.exp %779 : vector<8x128xf32>
    %cst_205 = arith.constant 1.000000e+00 : f32
    %781 = vector.broadcast %cst_205 : f32 to vector<8x128xf32>
    %782 = arith.addf %781, %780 : vector<8x128xf32>
    %783 = arith.divf %781, %782 : vector<8x128xf32>
    %784 = math.tanh %773 : vector<8x128xf32>
    %785 = vector.extract_strided_slice %783 {offsets = [0, 0], sizes = [8, 32], strides = [1, 1]} : vector<8x128xf32> to vector<8x32xf32>
    %786 = vector.extract_strided_slice %783 {offsets = [0, 32], sizes = [8, 32], strides = [1, 1]} : vector<8x128xf32> to vector<8x32xf32>
    %787 = vector.extract_strided_slice %784 {offsets = [0, 64], sizes = [8, 32], strides = [1, 1]} : vector<8x128xf32> to vector<8x32xf32>
    %788 = vector.extract_strided_slice %783 {offsets = [0, 96], sizes = [8, 32], strides = [1, 1]} : vector<8x128xf32> to vector<8x32xf32>
    %789 = arith.mulf %786, %742 : vector<8x32xf32>
    %790 = arith.mulf %785, %787 : vector<8x32xf32>
    %791 = arith.addf %789, %790 : vector<8x32xf32>
    %792 = math.tanh %791 : vector<8x32xf32>
    %793 = arith.mulf %788, %792 : vector<8x32xf32>
    %794 = arith.negf %778 : vector<8x128xf32>
    %795 = math.exp %794 : vector<8x128xf32>
    %cst_206 = arith.constant 1.000000e+00 : f32
    %796 = vector.broadcast %cst_206 : f32 to vector<8x128xf32>
    %797 = arith.addf %796, %795 : vector<8x128xf32>
    %798 = arith.divf %796, %797 : vector<8x128xf32>
    %799 = math.tanh %778 : vector<8x128xf32>
    %800 = vector.extract_strided_slice %798 {offsets = [0, 0], sizes = [8, 32], strides = [1, 1]} : vector<8x128xf32> to vector<8x32xf32>
    %801 = vector.extract_strided_slice %798 {offsets = [0, 32], sizes = [8, 32], strides = [1, 1]} : vector<8x128xf32> to vector<8x32xf32>
    %802 = vector.extract_strided_slice %799 {offsets = [0, 64], sizes = [8, 32], strides = [1, 1]} : vector<8x128xf32> to vector<8x32xf32>
    %803 = vector.extract_strided_slice %798 {offsets = [0, 96], sizes = [8, 32], strides = [1, 1]} : vector<8x128xf32> to vector<8x32xf32>
    %804 = arith.mulf %801, %757 : vector<8x32xf32>
    %805 = arith.mulf %800, %802 : vector<8x32xf32>
    %806 = arith.addf %804, %805 : vector<8x32xf32>
    %807 = math.tanh %806 : vector<8x32xf32>
    %808 = arith.mulf %803, %807 : vector<8x32xf32>
    %809 = arith.index_cast %765 : i32 to index
    %c64_207 = arith.constant 64 : index
    %810 = vector.load %arg15[%809, %c64_207] : memref<64x128xf32, #tpu.memory_space<vmem>>, vector<8x32xf32>
    tpu.vector_store %arg15[%809, %c64_207], %793 {strides = array<i32>} : memref<64x128xf32, #tpu.memory_space<vmem>>, vector<8x32xf32>,
    %811 = arith.index_cast %768 : i32 to index
    %c96_208 = arith.constant 96 : index
    %812 = vector.load %arg15[%811, %c96_208] : memref<64x128xf32, #tpu.memory_space<vmem>>, vector<8x32xf32>
    tpu.vector_store %arg15[%811, %c96_208], %808 {strides = array<i32>} : memref<64x128xf32, #tpu.memory_space<vmem>>, vector<8x32xf32>,
    %c8_i32_209 = arith.constant 8 : i32
    %c0_210 = arith.constant 0 : index
    %c64_211 = arith.constant 64 : index
    %813 = vector.load %arg15[%c0_210, %c64_211] : memref<64x128xf32, #tpu.memory_space<vmem>>, vector<8x64xf32>
    %c0_212 = arith.constant 0 : index
    %c0_213 = arith.constant 0 : index
    %814 = vector.load %arg10[%c0_212, %c0_213] : memref<64x2xf32, #tpu.memory_space<vmem>>, vector<64x2xf32>
    %cst_214 = arith.constant dense<0.000000e+00> : vector<8x2xf32>
    %815 = tpu.matmul %813, %814, %cst_214 {dimension_numbers = #tpu.dot_dimension_numbers<[1], [0], [0], [1], [0, 0, 1, 1], [], []>} : vector<8x64xf32>, vector<64x2xf32>, vector<8x2xf32> -> vector<8x2xf32>
    %c56 = arith.constant 56 : index
    %c64_215 = arith.constant 64 : index
    %816 = vector.load %arg15[%c56, %c64_215] : memref<64x128xf32, #tpu.memory_space<vmem>>, vector<8x64xf32>
    %c0_216 = arith.constant 0 : index
    %c0_217 = arith.constant 0 : index
    %817 = vector.load %arg11[%c0_216, %c0_217] : memref<64x2xf32, #tpu.memory_space<vmem>>, vector<64x2xf32>
    %cst_218 = arith.constant dense<0.000000e+00> : vector<8x2xf32>
    %818 = tpu.matmul %816, %817, %cst_218 {dimension_numbers = #tpu.dot_dimension_numbers<[1], [0], [0], [1], [0, 0, 1, 1], [], []>} : vector<8x64xf32>, vector<64x2xf32>, vector<8x2xf32> -> vector<8x2xf32>
    %819 = arith.addf %815, %818 : vector<8x2xf32>
    %c0_219 = arith.constant 0 : index
    %c0_220 = arith.constant 0 : index
    %820 = vector.load %arg12[%c0_219, %c0_220] : memref<1x2xf32, #tpu.memory_space<vmem>>, vector<1x2xf32>
    %821 = vector.broadcast %820 : vector<1x2xf32> to vector<8x2xf32>
    %822 = arith.addf %819, %821 : vector<8x2xf32>
    %c0_221 = arith.constant 0 : index
    %c0_222 = arith.constant 0 : index
    %823 = vector.load %arg13[%c0_221, %c0_222] : memref<8x2xf32, #tpu.memory_space<vmem>>, vector<8x2xf32>
    tpu.vector_store %arg13[%c0_221, %c0_222], %822 {strides = array<i32>} : memref<8x2xf32, #tpu.memory_space<vmem>>, vector<8x2xf32>,
    return
  }
}

</mosaic_0001>

<bundles_post_ra>
// kernel: birnn_forward.1
= control target key start
LH: loop header
LB: loop body
LE: loop exit
PB: predicated region body
PF: predicated region fallthrough
CT: control target
= control target key end

     0   :  { %v4168_v0 = vmov 0   ;;  %v4169_v20 = vmov 0.0   ;;  %v53_v22 = vlaneseq  ;;  %vm110_vm0 = vcmask 457728   ;;  %s4172_s18 = smov 32   ;;  %s5192_s0 = inlined_call_operand.vmem [shape: s32[64,1], index: 0, kind: input, shape index: {}]   ;;  %s5193_s1 = inlined_call_operand.vmem [shape: f32[56,32], index: 1, kind: input, shape index: {}]   ;;  %s5194_s2 = inlined_call_operand.vmem [shape: bf16[32,256], index: 2, kind: input, shape index: {}]   ;;  %s5195_s3 = inlined_call_operand.vmem [shape: bf16[32,128], index: 3, kind: input, shape index: {}]   ;;  %s5196_s4 = inlined_call_operand.vmem [shape: bf16[32,128], index: 4, kind: input, shape index: {}]   ;;  %s5197_s5 = inlined_call_operand.vmem [shape: f32[1,256], index: 5, kind: input, shape index: {}]   ;;  %s5198_s6 = inlined_call_operand.vmem [shape: bf16[64,256], index: 6, kind: input, shape index: {}]   ;;  %s5199_s7 = inlined_call_operand.vmem [shape: bf16[32,128], index: 7, kind: input, shape index: {}]   ;;  %s5200_s8 = inlined_call_operand.vmem [shape: bf16[32,128], index: 8, kind: input, shape index: {}]   ;;  %s5201_s9 = inlined_call_operand.vmem [shape: f32[1,256], index: 9, kind: input, shape index: {}]   ;;  %s5202_s10 = inlined_call_operand.vmem [shape: f32[64,2], index: 10, kind: input, shape index: {}]   ;;  %s5203_s11 = inlined_call_operand.vmem [shape: f32[64,2], index: 11, kind: input, shape index: {}]   ;;  %s5204_s12 = inlined_call_operand.vmem [shape: f32[1,2], index: 12, kind: input, shape index: {}]   ;;  %s5205_s13 = inlined_call_operand.vmem [shape: f32[8,2], index: 13, kind: output, shape index: {}]  }
   0x1   :  { %3882 = vset.pattern.permute.xlu1 %v4168_v0  ;;  %3881 = vset.pattern.permute.xlu0 %v4168_v0  ;;  %v47_v1 = vld [vmem:[%s5192_s0 + $0x10] sm:$0xff]  ;;  %v45_v2 = vld [vmem:[%s5192_s0] sm:$0xff]  ;;  %v48_v3 = vld [vmem:[%s5192_s0 + $0x18] sm:$0xff]  ;;  %vm4170_vm9 = vmmov 0   ;;  %vm280_vm10 = vcmask 261120   ;;  %vm565_vm11 = vcmask 523520  }
   0x2   :  { %62 = vperm.xlu1 %3882, %v47_v1   ;;  %56 = vperm.xlu0 %3881, %v45_v2   ;;  %v46_v4 = vld [vmem:[%s5192_s0 + $0x8] sm:$0xff]  ;;  %v103_v5 = vld [vmem:[%s5193_s1] sm:$0xff]  ;;  %v105_v7 = vld [vmem:[%s5193_s1 + $0x10] sm:$0xff]  ;;  %v54_v23 = vand.u32 127, %v53_v22  ;;  %vm1755_vm12 = vcmask 523264   ;;  %vm2027_vm13 = vcmask 1048320  }
   0x3   :  { %325 = vmatprep.mubr.bf16.mxu1 %v4168_v0  ;;  %v104_v6 = vld [vmem:[%s5193_s1 + $0x8] sm:$0xff]  ;;  %v106_v8 = vld [vmem:[%s5193_s1 + $0x18] sm:$0xff]  ;;  %v107_v11 = vld [vmem:[%s5193_s1 + $0x20] sm:$0xff]  ;;  %vm2025_vm14 = vcmask 785920   ;;  %vm3269_vm15 = vcmask 15360  }
   0x4   :  { %v3838_v9 = vpack.c.bf16 %v104_v6, %v103_v5  ;;  %v3842_v10 = vpack.c.bf16 %v106_v8, %v105_v7  ;;  %v108_v12 = vld [vmem:[%s5193_s1 + $0x28] sm:$0xff]  ;;  %v49_v14 = vld [vmem:[%s5192_s0 + $0x20] sm:$0xff]  ;;  %v52_v16 = vld [vmem:[%s5192_s0 + $0x38] sm:$0xff] }
   0x5   :  { %v50_v13 = vld [vmem:[%s5192_s0 + $0x28] sm:$0xff]  ;;  %v3846_v15 = vpack.c.bf16 %v108_v12, %v107_v11  ;;  %v51_v17 = vld [vmem:[%s5192_s0 + $0x30] sm:$0xff]  ;;  %v4306_v29 = vld [vmem:[%s5195_s3] sm:$0xff]  }
   0x6   :  { %65 = vperm.xlu1 %3882, %v48_v3   ;;  %59 = vperm.xlu0 %3881, %v46_v4   ;;  %v109_v18 = vld [vmem:[%s5193_s1 + $0x30] sm:$0xff]  ;;  %v3883_v19 = vld [vmem:[%s5194_s2 + $0x4] ss:$8 sps:$4 sm:$0xff]   ;;  %v3885_v21 = vld [vmem:[%s5194_s2] ss:$8 sps:$4 sm:$0xff]   ;;  %v4378_v3 = vshrl.u32 %v53_v22, 7 }
   0x7   :  { %3839 = vmatprep.subr.bf16.mxu0 %v3838_v9  ;;  %293 = vmatprep.subr.bf16.mxu1 %v3883_v19  ;;  %v3887_v41 = vld [vmem:[%s5194_s2 + $0x14] ss:$8 sps:$4 sm:$0xff]   ;;  %v3889_v42 = vld [vmem:[%s5194_s2 + $0x10] ss:$8 sps:$4 sm:$0xff]   ;;  %v4333_v43 = vld [vmem:[%s5195_s3 + $0x8] sm:$0xff]  }
   0x8   :  { %3841 = vmatpush3.bf16.msra.mxu0 %v3838_v9  ;;  %294 = vmatpush1.bf16.msra.mxu1 %v3885_v21  ;;  %v4346_v44 = vld [vmem:[%s5196_s4] sm:$0xff]   ;;  %v4352_v45 = vld [vmem:[%s5196_s4 + $0x8] sm:$0xff]   ;;  %v252_v4 = vsub.s32 0, %v4378_v3  ;;  %v256_v6 = vsub.s32 1, %v4378_v3 }
   0x9   :  { %3843 = vmatprep.subr.bf16.mxu0 %v3842_v10  ;;  %295 = vmatprep.subr.bf16.mxu1 %v3887_v41  ;;  %v248_v5 = vld [vmem:[%s5197_s5] sm:$0x3]  ;;  %s4171_s5 = smov 64  }
   0xa   :  { %71 = vperm.xlu1 %3882, %v50_v13   ;;  %68 = vperm.xlu0 %3881, %v49_v14   ;;  %v253_v7 = vrot.slane %v248_v5, %v252_v4  ;;  %v257_v8 = vrot.slane %v248_v5, %v256_v6 }
   0xc   :  { %3845 = vmatpush3.bf16.msra.mxu0 %v3842_v10  ;;  %296 = vmatpush1.bf16.msra.mxu1 %v3889_v42 }
   0xd   :  { %3847 = vmatprep.subr.bf16.mxu0 %v3846_v15  ;;  %3560 = vmatprep.subr.bf16.mxu1 %v4169_v20 }
   0xe   :  { %77 = vperm.xlu1 %3882, %v52_v16   ;;  %74 = vperm.xlu0 %3881, %v51_v17  }
  0x10   :  { %3849 = vmatpush3.bf16.msra.mxu0 %v3846_v15 }
  0x11   :  { %3530 = vmatprep.subr.mxu0 %v109_v18 }
  0x14   :  { %3531 = vmatpush3.msra.mxu0 %v109_v18 }
  0x15   :  { %3544 = vmatprep.subr.bf16.mxu0 %v4169_v20 }
  0x81   :  { %v63_v24 = vpop.permute.xlu1 %62  ;;  %v57_v25 = vpop.permute.xlu0 %56 }
  0x82   :  { %vm79_vm1 = vcmp.eq.s32.totalorder %v57_v25, %v54_v23  ;;  %vm81_vm2 = vcmp.eq.s32.totalorder %v63_v24, %v54_v23 }
  0x83   :  { %v3282_v26 = vsel %vm79_vm1, 1.0, %v4169_v20  ;;  %v3284_v30 = vsel %vm81_vm2, 1.0, %v4169_v20 }
  0x84   :  { %3532 = vmatprep.mubr.msk.f32.mxu0 %vm110_vm0, %v3282_v26 }
  0x85   :  { %v66_v27 = vpop.permute.xlu1 %65  ;;  %v60_v28 = vpop.permute.xlu0 %59 }
  0x86   :  { %vm82_vm3 = vcmp.eq.s32.totalorder %v66_v27, %v54_v23  ;;  %vm80_vm4 = vcmp.eq.s32.totalorder %v60_v28, %v54_v23 }
  0x87   :  { %v3283_v31 = vsel %vm80_vm4, 1.0, %v4169_v20  ;;  %v3285_v32 = vsel %vm82_vm3, 1.0, %v4169_v20 }
  0x88   :  { %3533 = vmatmul.mubr.msk.f32.vlgmr.msra.gmra.mrb[0].mxu0 %vm110_vm0, %v3283_v31 }
  0x89   :  { %v72_v33 = vpop.permute.xlu1 %71  ;;  %v69_v34 = vpop.permute.xlu0 %68  ;;  %3535 = vmatprep.mubr.msk.f32.mxu0 %vm110_vm0, %v3284_v30  ;;  %3545 = vmatpush3.bf16.msra.mxu0 %v4306_v29 }
  0x8a   :  { %vm83_vm5 = vcmp.eq.s32.totalorder %v69_v34, %v54_v23  ;;  %3546 = vmatprep.subr.bf16.mxu0 %v4169_v20  ;;  %vm84_vm6 = vcmp.eq.s32.totalorder %v72_v33, %v54_v23 }
  0x8b   :  { %v3286_v35 = vsel %vm83_vm5, 1.0, %v4169_v20  ;;  %v3287_v38 = vsel %vm84_vm6, 1.0, %v4169_v20 }
  0x8c   :  { %3536 = vmatmul.mubr.msk.f32.gmra.mrb[2].mxu0 %vm110_vm0, %v3285_v32 }
  0x8d   :  { %v78_v36 = vpop.permute.xlu1 %77  ;;  %3538 = vmatprep.mubr.msk.f32.mxu0 %vm110_vm0, %v3286_v35  ;;  %v75_v37 = vpop.permute.xlu0 %74  ;;  %3547 = vmatpush3.bf16.msra.mxu0 %v4333_v43 }
  0x8e   :  { %vm85_vm7 = vcmp.eq.s32.totalorder %v75_v37, %v54_v23  ;;  %vm86_vm8 = vcmp.eq.s32.totalorder %v78_v36, %v54_v23  ;;  %3552 = vmatprep.subr.bf16.mxu0 %v4169_v20 }
  0x8f   :  { %v3288_v39 = vsel %vm85_vm7, 1.0, %v4169_v20  ;;  %v3289_v40 = vsel %vm86_vm8, 1.0, %v4169_v20 }
  0x90   :  { %3539 = vmatmul.mubr.msk.f32.gmra.mrb[4].mxu0 %vm110_vm0, %v3287_v38 }
  0x91   :  { %3541 = vmatprep.mubr.msk.f32.mxu0 %vm110_vm0, %v3288_v39 }
  0x94   :  { %3542 = vmatmul.mubr.msk.f32.gmra.mrb[6].mxu0 %vm110_vm0, %v3289_v40 }
  0x95   :  { %3548 = vmatprep.mubr.msk.bf16.mxu0 %vm4170_vm9, %v4169_v20 }
  0x98   :  { %3549 = vmatmul.mubr.bf16.vlgmr.msra.gmra.mrb[8].mxu0 %v4168_v0 }
  0x99   :  { %3556 = vmatprep.mubr.msk.bf16.mxu0 %vm4170_vm9, %v4169_v20  ;;  %3553 = vmatpush3.bf16.msra.mxu0 %v4346_v44 }
  0x9a   :  { %3554 = vmatprep.subr.bf16.mxu0 %v4169_v20 }
  0x9d   :  { %3555 = vmatpush3.bf16.msra.mxu0 %v4352_v45 }
  0x9e   :  { %3568 = vmatprep.subr.bf16.mxu0 %v4169_v20 }
  0xa0   :  { %3557 = vmatmul.mubr.bf16.vlgmr.msra.gmra.mrb[12].mxu0 %v4168_v0 }
  0xa1   :  { %3569 = vmatpush3.bf16.msra.mxu0 %v4346_v44  ;;  %3572 = vmatprep.mubr.msk.bf16.mxu0 %vm4170_vm9, %v4169_v20 }
  0xa2   :  { %3570 = vmatprep.subr.bf16.mxu0 %v4169_v20 }
  0xa5   :  { %3571 = vmatpush3.bf16.msra.mxu0 %v4352_v45 }
  0xa6   :  { %3584 = vmatprep.subr.bf16.mxu0 %v4169_v20 }
 0x15b   :  { %v3534_v46 = vpop.f32.mrb[0].mxu0 }
 0x15c   :  { %v201_v47 = vpop.f32.mrb[1].mxu0 }
 0x15d   :  { %v240_v48 = vpack.c.bf16 %v3534_v46, %v201_v47 }
 0x15f   :  { %v3537_v49 = vpop.f32.mrb[2].mxu0  ;;  %3302 = vmatmul.mubr.msk.bf16.vlgmr.msra.gmra.mrb[0].mxu1 %vm280_vm10, %v240_v48 }
 0x160   :  { %v211_v50 = vpop.f32.mrb[3].mxu0  ;;  %335 = vmatprep.mubr.bf16.mxu1 %v4168_v0  ;;  %3561 = vmatpush3.bf16.msra.mxu1 %v4306_v29 }
 0x161   :  { %v241_v51 = vpack.c.bf16 %v3537_v49, %v211_v50  ;;  %3562 = vmatprep.subr.bf16.mxu1 %v4169_v20 }
 0x163   :  { %v3540_v52 = vpop.f32.mrb[4].mxu0 }
 0x164   :  { %v221_v53 = vpop.f32.mrb[5].mxu0  ;;  %3563 = vmatpush3.bf16.msra.mxu1 %v4333_v43 }
 0x165   :  { %v242_v54 = vpack.c.bf16 %v3540_v52, %v221_v53  ;;  %3576 = vmatprep.subr.bf16.mxu1 %v4169_v20 }
 0x167   :  { %v3543_v55 = vpop.f32.mrb[6].mxu0  ;;  %3303 = vmatmul.mubr.msk.bf16.gmra.mrb[4].mxu1 %vm280_vm10, %v241_v51 }
 0x168   :  { %v231_v56 = vpop.f32.mrb[7].mxu0  ;;  %345 = vmatprep.mubr.bf16.mxu1 %v4168_v0 }
 0x169   :  { %v243_v57 = vpack.c.bf16 %v3543_v55, %v231_v56 }
 0x16b   :  { %v443_v58 = vpop.f32.mrb[8].mxu0 }
 0x16c   :  { %v3550_v59 = vpop.f32.mrb[9].mxu0 }
 0x16d   :  { %v446_v60 = vpop.f32.mrb[10].mxu0 }
 0x16e   :  { %v3551_v61 = vpop.f32.mrb[11].mxu0 }
 0x16f   :  { %3304 = vmatmul.mubr.msk.bf16.gmra.mrb[8].mxu1 %vm280_vm10, %v242_v54 }
 0x170   :  { %355 = vmatprep.mubr.bf16.mxu1 %v4168_v0 }
 0x173   :  { %v500_v62 = vpop.f32.mrb[12].mxu0 }
 0x174   :  { %v3558_v63 = vpop.f32.mrb[13].mxu0 }
 0x175   :  { %v503_v1 = vpop.f32.mrb[14].mxu0 }
 0x176   :  { %v3559_v2 = vpop.f32.mrb[15].mxu0 }
 0x177   :  { %3305 = vmatmul.mubr.msk.bf16.gmra.mrb[12].mxu1 %vm280_vm10, %v243_v57 }
 0x178   :  { %3564 = vmatprep.mubr.msk.bf16.mxu1 %vm4170_vm9, %v4169_v20 }
 0x232   :  { %v327_v9 = vpop.f32.mrb[0].mxu1 }
 0x233   :  { %v328_v10 = vadd.f32 %v327_v9, %v253_v7  ;;  %v329_v11 = vpop.f32.mrb[1].mxu1 }
 0x234   :  { %v4389_v12 = vadd.f32 %v329_v11, %v257_v8  ;;  %v331_v13 = vpop.f32.mrb[2].mxu1 }
 0x235   :  { %v4391_v14 = vadd.f32 %v331_v13, %v253_v7  ;;  %v449_v15 = vadd.f32 %v443_v58, %v328_v10  ;;  %v333_v16 = vpop.f32.mrb[3].mxu1 }
 0x236   :  { %v4393_v17 = vadd.f32 %v333_v16, %v257_v8 }
 0x237   :  { %3909 = vtanh.f32 %v449_v15  ;;  %v3310_v50 = vmul.f32 -1.442695, %v449_v15 }
 0x23a   :  { %v337_v18 = vpop.f32.mrb[4].mxu1 }
 0x23b   :  { %v4395_v19 = vadd.f32 %v337_v18, %v253_v7  ;;  %v339_v21 = vpop.f32.mrb[5].mxu1 }
 0x23c   :  { %v4397_v22 = vadd.f32 %v339_v21, %v257_v8  ;;  %v341_v23 = vpop.f32.mrb[6].mxu1 }
 0x23d   :  { %v4399_v24 = vadd.f32 %v341_v23, %v253_v7  ;;  %v343_v25 = vpop.f32.mrb[7].mxu1 }
 0x23e   :  { %v4401_v26 = vadd.f32 %v343_v25, %v257_v8 }
 0x241   :  { %v3910_v27 = vpop.eup %3909 }
 0x242   :  { %v347_v28 = vpop.f32.mrb[8].mxu1  ;;  %516 = vrot.lane.b32.xlu1 %v3910_v27, %s4171_s5 }
 0x243   :  { %v4404_v30 = vadd.f32 %v347_v28, %v253_v7  ;;  %v349_v31 = vpop.f32.mrb[9].mxu1 }
 0x244   :  { %v4406_v32 = vadd.f32 %v349_v31, %v257_v8  ;;  %v351_v33 = vpop.f32.mrb[10].mxu1 }
 0x245   :  { %v4408_v34 = vadd.f32 %v351_v33, %v253_v7  ;;  %v353_v35 = vpop.f32.mrb[11].mxu1 }
 0x246   :  { %v4410_v36 = vadd.f32 %v353_v35, %v257_v8 }
 0x24a   :  { %v357_v37 = vpop.f32.mrb[12].mxu1 }
 0x24b   :  { %v4412_v38 = vadd.f32 %v357_v37, %v253_v7  ;;  %v359_v39 = vpop.f32.mrb[13].mxu1 }
 0x24c   :  { %v4414_v40 = vadd.f32 %v359_v39, %v257_v8  ;;  %v361_v41 = vpop.f32.mrb[14].mxu1 }
 0x24d   :  { %v4416_v42 = vadd.f32 %v361_v41, %v253_v7  ;;  %v363_v46 = vpop.f32.mrb[15].mxu1 }
 0x24e   :  { %v364_v47 = vadd.f32 %v363_v46, %v257_v8 }
 0x250   :  { %v506_v48 = vadd.f32 %v500_v62, %v364_v47 }
 0x252   :  { %3911 = vtanh.f32 %v506_v48  ;;  %v3311_v53 = vmul.f32 -1.442695, %v506_v48 }
 0x253   :  { %3913 = vpow2.f32 %v3310_v50 }
 0x25c   :  { %v3912_v49 = vpop.eup %3911 }
 0x25d   :  { %540 = vrot.lane.b32.xlu0 %v3912_v49, %s4171_s5  ;;  %v3914_v51 = vpop.eup %3913 }
 0x25e   :  { %v510_v52 = vadd.f32 1.0, %v3914_v51 }
 0x260   :  { %3915 = vrcp.f32 %v510_v52 }
 0x261   :  { %3917 = vpow2.f32 %v3311_v53 }
 0x26a   :  { %v3916_v54 = vpop.eup %3915 }
 0x26b   :  { %v3918_v57 = vpop.eup %3917  ;;  %v514_v62 = vmul.f32 0.0, %v3916_v54 }
 0x26c   :  { %v534_v58 = vadd.f32 1.0, %v3918_v57 }
 0x26e   :  { %3919 = vrcp.f32 %v534_v58 }
 0x278   :  { %v3920_v59 = vpop.eup %3919 }
 0x279   :  { %v538_v5 = vmul.f32 0.0, %v3920_v59 }
 0x2b4   :  { %v517_v55 = vpop.permute.xlu1 %516 }
 0x2b5   :  { %v519_v56 = vmul.f32 %v3916_v54, %v517_v55 }
 0x2b7   :  { %521 = vrot.lane.b32.xlu1 %v519_v56, %s4172_s18 }
 0x2cf   :  { %v541_v60 = vpop.permute.xlu0 %540 }
 0x2d0   :  { %v543_v61 = vmul.f32 %v3920_v59, %v541_v60 }
 0x2d2   :  { %545 = vrot.lane.b32.xlu0 %v543_v61, %s4172_s18 }
 0x329   :  { %v522_v63 = vpop.permute.xlu1 %521 }
 0x32a   :  { %v4421_v1 = vadd.f32 %v522_v63, %v514_v62 }
 0x32c   :  { %3921 = vtanh.f32 %v4421_v1 }
 0x336   :  { %v3922_v2 = vpop.eup %3921 }
 0x337   :  { %527 = vrot.lane.b32.xlu1 %v3922_v2, %s4171_s5 }
 0x344   :  { %v546_v7 = vpop.permute.xlu0 %545 }
 0x345   :  { %v4425_v8 = vadd.f32 %v546_v7, %v538_v5 }
 0x347   :  { %3923 = vtanh.f32 %v4425_v8 }
 0x351   :  { %v3924_v9 = vpop.eup %3923 }
 0x352   :  { %551 = vrot.lane.b32.xlu0 %v3924_v9, %s4171_s5 }
 0x3a9   :  { %v528_v10 = vpop.permute.xlu1 %527 }
 0x3aa   :  { %v4429_v11 = vmul.f32 %v3916_v54, %v528_v10 }
 0x3ac   :  { %v571_v13 = vpack.c.bf16 %v4429_v11, %v4429_v11 }
 0x3ae   :  { %573 = vrot.lane.b32.xlu1 %v571_v13, %s4172_s18 }
 0x3c4   :  { %v552_v15 = vpop.permute.xlu0 %551 }
 0x3c5   :  { %v4434_v16 = vmul.f32 %v3920_v59, %v552_v15 }
 0x3c7   :  { %v623_v18 = vpack.c.bf16 %v4434_v16, %v4434_v16 }
 0x3c9   :  { %625 = vrot.lane.b32.xlu0 %v623_v18, %s4172_s18 }
 0x420   :  { %v574_v21 = vpop.permute.xlu1 %573 }
 0x421   :  { %3565 = vmatmul.mubr.msk.bf16.vlgmr.msra.gmra.mrb[16].mxu1 %vm280_vm10, %v574_v21 }
 0x422   :  { %3577 = vmatpush3.bf16.msra.mxu1 %v4306_v29  ;;  %3580 = vmatprep.mubr.msk.bf16.mxu1 %vm4170_vm9, %v4169_v20 }
 0x423   :  { %3578 = vmatprep.subr.bf16.mxu1 %v4169_v20 }
 0x426   :  { %3579 = vmatpush3.bf16.msra.mxu1 %v4333_v43 }
 0x427   :  { %3592 = vmatprep.subr.bf16.mxu1 %v4169_v20 }
 0x43b   :  { %v626_v23 = vpop.permute.xlu0 %625 }
 0x43c   :  { %3573 = vmatmul.mubr.msk.bf16.vlgmr.msra.gmra.mrb[16].mxu0 %vm280_vm10, %v626_v23 }
 0x43d   :  { %3585 = vmatpush3.bf16.msra.mxu0 %v4346_v44  ;;  %3588 = vmatprep.mubr.msk.bf16.mxu0 %vm4170_vm9, %v4169_v20 }
 0x43e   :  { %3586 = vmatprep.subr.bf16.mxu0 %v4169_v20 }
 0x441   :  { %3587 = vmatpush3.bf16.msra.mxu0 %v4352_v45 }
 0x442   :  { %3600 = vmatprep.subr.bf16.mxu0 %v4169_v20 }
 0x4f4   :  { %v612_v25 = vpop.f32.mrb[16].mxu1 }
 0x4f5   :  { %v618_v27 = vadd.f32 %v612_v25, %v4391_v14  ;;  %v3566_v28 = vpop.f32.mrb[17].mxu1 }
 0x4f6   :  { %v615_v31 = vpop.f32.mrb[18].mxu1 }
 0x4f7   :  { %3925 = vtanh.f32 %v618_v27  ;;  %v3567_v33 = vpop.f32.mrb[19].mxu1  ;;  %v3314_v49 = vmul.f32 -1.442695, %v618_v27 }
 0x501   :  { %v3926_v35 = vpop.eup %3925 }
 0x502   :  { %680 = vrot.lane.b32.xlu1 %v3926_v35, %s4171_s5 }
 0x50f   :  { %v664_v37 = vpop.f32.mrb[16].mxu0 }
 0x510   :  { %v670_v39 = vadd.f32 %v664_v37, %v4414_v40  ;;  %v3574_v41 = vpop.f32.mrb[17].mxu0 }
 0x511   :  { %v667_v46 = vpop.f32.mrb[18].mxu0 }
 0x512   :  { %3927 = vtanh.f32 %v670_v39  ;;  %v3575_v47 = vpop.f32.mrb[19].mxu0  ;;  %v3315_v51 = vmul.f32 -1.442695, %v670_v39 }
 0x513   :  { %3929 = vpow2.f32 %v3314_v49 }
 0x51c   :  { %v3928_v48 = vpop.eup %3927 }
 0x51d   :  { %704 = vrot.lane.b32.xlu0 %v3928_v48, %s4171_s5  ;;  %v3930_v14 = vpop.eup %3929 }
 0x51e   :  { %v674_v50 = vadd.f32 1.0, %v3930_v14 }
 0x520   :  { %3931 = vrcp.f32 %v674_v50 }
 0x521   :  { %3933 = vpow2.f32 %v3315_v51 }
 0x52a   :  { %v3932_v52 = vpop.eup %3931 }
 0x52b   :  { %v3934_v40 = vpop.eup %3933  ;;  %v678_v59 = vmul.f32 %v3932_v52, %v4421_v1 }
 0x52c   :  { %v698_v55 = vadd.f32 1.0, %v3934_v40 }
 0x52e   :  { %3935 = vrcp.f32 %v698_v55 }
 0x538   :  { %v3936_v56 = vpop.eup %3935 }
 0x539   :  { %v702_v63 = vmul.f32 %v3936_v56, %v4425_v8 }
 0x574   :  { %v681_v53 = vpop.permute.xlu1 %680 }
 0x575   :  { %v683_v54 = vmul.f32 %v3932_v52, %v681_v53 }
 0x577   :  { %685 = vrot.lane.b32.xlu1 %v683_v54, %s4172_s18 }
 0x58f   :  { %v705_v57 = vpop.permute.xlu0 %704 }
 0x590   :  { %v707_v58 = vmul.f32 %v3936_v56, %v705_v57 }
 0x592   :  { %709 = vrot.lane.b32.xlu0 %v707_v58, %s4172_s18 }
 0x5e9   :  { %v686_v60 = vpop.permute.xlu1 %685 }
 0x5ea   :  { %v4460_v61 = vadd.f32 %v686_v60, %v678_v59 }
 0x5ec   :  { %3937 = vtanh.f32 %v4460_v61 }
 0x5f6   :  { %v3938_v62 = vpop.eup %3937 }
 0x5f7   :  { %691 = vrot.lane.b32.xlu1 %v3938_v62, %s4171_s5 }
 0x604   :  { %v710_v2 = vpop.permute.xlu0 %709 }
 0x605   :  { %v4465_v5 = vadd.f32 %v710_v2, %v702_v63 }
 0x607   :  { %3939 = vtanh.f32 %v4465_v5 }
 0x611   :  { %v3940_v7 = vpop.eup %3939 }
 0x612   :  { %715 = vrot.lane.b32.xlu0 %v3940_v7, %s4171_s5 }
 0x669   :  { %v692_v9 = vpop.permute.xlu1 %691 }
 0x66a   :  { %v4469_v1 = vmul.f32 %v3932_v52, %v692_v9 }
 0x66c   :  { %v735_v10 = vpack.c.bf16 %v4469_v1, %v4469_v1 }
 0x66e   :  { %737 = vrot.lane.b32.xlu1 %v735_v10, %s4172_s18 }
 0x684   :  { %v716_v13 = vpop.permute.xlu0 %715 }
 0x685   :  { %v4474_v15 = vmul.f32 %v3936_v56, %v716_v13 }
 0x687   :  { %v787_v8 = vpack.c.bf16 %v4474_v15, %v4474_v15 }
 0x689   :  { %789 = vrot.lane.b32.xlu0 %v787_v8, %s4172_s18 }
 0x6e0   :  { %v738_v18 = vpop.permute.xlu1 %737 }
 0x6e1   :  { %3581 = vmatmul.mubr.msk.bf16.vlgmr.msra.gmra.mrb[20].mxu1 %vm280_vm10, %v738_v18 }
 0x6e2   :  { %3593 = vmatpush3.bf16.msra.mxu1 %v4306_v29  ;;  %3596 = vmatprep.mubr.msk.bf16.mxu1 %vm4170_vm9, %v4169_v20 }
 0x6e3   :  { %3594 = vmatprep.subr.bf16.mxu1 %v4169_v20 }
 0x6e6   :  { %3595 = vmatpush3.bf16.msra.mxu1 %v4333_v43 }
 0x6e7   :  { %3608 = vmatprep.subr.bf16.mxu1 %v4169_v20 }
 0x6fb   :  { %v790_v21 = vpop.permute.xlu0 %789 }
 0x6fc   :  { %3589 = vmatmul.mubr.msk.bf16.vlgmr.msra.gmra.mrb[20].mxu0 %vm280_vm10, %v790_v21 }
 0x6fd   :  { %3601 = vmatpush3.bf16.msra.mxu0 %v4346_v44  ;;  %3604 = vmatprep.mubr.msk.bf16.mxu0 %vm4170_vm9, %v4169_v20 }
 0x6fe   :  { %3602 = vmatprep.subr.bf16.mxu0 %v4169_v20 }
 0x701   :  { %3603 = vmatpush3.bf16.msra.mxu0 %v4352_v45 }
 0x702   :  { %3616 = vmatprep.subr.bf16.mxu0 %v4169_v20 }
 0x7b4   :  { %v776_v23 = vpop.f32.mrb[20].mxu1 }
 0x7b5   :  { %v782_v25 = vadd.f32 %v776_v23, %v4395_v19  ;;  %v3582_v27 = vpop.f32.mrb[21].mxu1 }
 0x7b6   :  { %v779_v28 = vpop.f32.mrb[22].mxu1 }
 0x7b7   :  { %3941 = vtanh.f32 %v782_v25  ;;  %v3583_v31 = vpop.f32.mrb[23].mxu1  ;;  %v3318_v48 = vmul.f32 -1.442695, %v782_v25 }
 0x7c1   :  { %v3942_v33 = vpop.eup %3941 }
 0x7c2   :  { %844 = vrot.lane.b32.xlu1 %v3942_v33, %s4171_s5 }
 0x7cf   :  { %v828_v35 = vpop.f32.mrb[20].mxu0 }
 0x7d0   :  { %v834_v37 = vadd.f32 %v828_v35, %v4410_v36  ;;  %v3590_v39 = vpop.f32.mrb[21].mxu0 }
 0x7d1   :  { %v831_v41 = vpop.f32.mrb[22].mxu0 }
 0x7d2   :  { %3943 = vtanh.f32 %v834_v37  ;;  %v3591_v46 = vpop.f32.mrb[23].mxu0  ;;  %v3319_v14 = vmul.f32 -1.442695, %v834_v37 }
 0x7d3   :  { %3945 = vpow2.f32 %v3318_v48 }
 0x7dc   :  { %v3944_v47 = vpop.eup %3943 }
 0x7dd   :  { %868 = vrot.lane.b32.xlu0 %v3944_v47, %s4171_s5  ;;  %v3946_v19 = vpop.eup %3945 }
 0x7de   :  { %v838_v49 = vadd.f32 1.0, %v3946_v19 }
 0x7e0   :  { %3947 = vrcp.f32 %v838_v49 }
 0x7e1   :  { %3949 = vpow2.f32 %v3319_v14 }
 0x7ea   :  { %v3948_v50 = vpop.eup %3947 }
 0x7eb   :  { %v3950_v36 = vpop.eup %3949  ;;  %v842_v56 = vmul.f32 %v3948_v50, %v4460_v61 }
 0x7ec   :  { %v862_v53 = vadd.f32 1.0, %v3950_v36 }
 0x7ee   :  { %3951 = vrcp.f32 %v862_v53 }
 0x7f8   :  { %v3952_v54 = vpop.eup %3951 }
 0x7f9   :  { %v866_v60 = vmul.f32 %v3952_v54, %v4465_v5 }
 0x834   :  { %v845_v51 = vpop.permute.xlu1 %844 }
 0x835   :  { %v847_v52 = vmul.f32 %v3948_v50, %v845_v51 }
 0x837   :  { %849 = vrot.lane.b32.xlu1 %v847_v52, %s4172_s18 }
 0x84f   :  { %v869_v40 = vpop.permute.xlu0 %868 }
 0x850   :  { %v871_v55 = vmul.f32 %v3952_v54, %v869_v40 }
 0x852   :  { %873 = vrot.lane.b32.xlu0 %v871_v55, %s4172_s18 }
 0x8a9   :  { %v850_v57 = vpop.permute.xlu1 %849 }
 0x8aa   :  { %v4500_v58 = vadd.f32 %v850_v57, %v842_v56 }
 0x8ac   :  { %3953 = vtanh.f32 %v4500_v58 }
 0x8b6   :  { %v3954_v59 = vpop.eup %3953 }
 0x8b7   :  { %855 = vrot.lane.b32.xlu1 %v3954_v59, %s4171_s5 }
 0x8c4   :  { %v874_v62 = vpop.permute.xlu0 %873 }
 0x8c5   :  { %v4505_v63 = vadd.f32 %v874_v62, %v866_v60 }
 0x8c7   :  { %3955 = vtanh.f32 %v4505_v63 }
 0x8d1   :  { %v3956_v2 = vpop.eup %3955 }
 0x8d2   :  { %879 = vrot.lane.b32.xlu0 %v3956_v2, %s4171_s5 }
 0x929   :  { %v856_v7 = vpop.permute.xlu1 %855 }
 0x92a   :  { %v4509_v61 = vmul.f32 %v3948_v50, %v856_v7 }
 0x92c   :  { %v899_v9 = vpack.c.bf16 %v4509_v61, %v4509_v61 }
 0x92e   :  { %901 = vrot.lane.b32.xlu1 %v899_v9, %s4172_s18 }
 0x944   :  { %v880_v10 = vpop.permute.xlu0 %879 }
 0x945   :  { %v4514_v13 = vmul.f32 %v3952_v54, %v880_v10 }
 0x947   :  { %v951_v5 = vpack.c.bf16 %v4514_v13, %v4514_v13 }
 0x949   :  { %953 = vrot.lane.b32.xlu0 %v951_v5, %s4172_s18 }
 0x9a0   :  { %v902_v8 = vpop.permute.xlu1 %901 }
 0x9a1   :  { %3597 = vmatmul.mubr.msk.bf16.vlgmr.msra.gmra.mrb[24].mxu1 %vm280_vm10, %v902_v8 }
 0x9a2   :  { %3609 = vmatpush3.bf16.msra.mxu1 %v4306_v29  ;;  %3612 = vmatprep.mubr.msk.bf16.mxu1 %vm4170_vm9, %v4169_v20 }
 0x9a3   :  { %3610 = vmatprep.subr.bf16.mxu1 %v4169_v20 }
 0x9a6   :  { %3611 = vmatpush3.bf16.msra.mxu1 %v4333_v43 }
 0x9a7   :  { %3624 = vmatprep.subr.bf16.mxu1 %v4169_v20 }
 0x9bb   :  { %v954_v18 = vpop.permute.xlu0 %953 }
 0x9bc   :  { %3605 = vmatmul.mubr.msk.bf16.vlgmr.msra.gmra.mrb[24].mxu0 %vm280_vm10, %v954_v18 }
 0x9bd   :  { %3617 = vmatpush3.bf16.msra.mxu0 %v4346_v44  ;;  %3620 = vmatprep.mubr.msk.bf16.mxu0 %vm4170_vm9, %v4169_v20 }
 0x9be   :  { %3618 = vmatprep.subr.bf16.mxu0 %v4169_v20 }
 0x9c1   :  { %3619 = vmatpush3.bf16.msra.mxu0 %v4352_v45 }
 0x9c2   :  { %3632 = vmatprep.subr.bf16.mxu0 %v4169_v20 }
 0xa74   :  { %v940_v21 = vpop.f32.mrb[24].mxu1 }
 0xa75   :  { %v946_v23 = vadd.f32 %v940_v21, %v4399_v24  ;;  %v3598_v25 = vpop.f32.mrb[25].mxu1 }
 0xa76   :  { %v943_v27 = vpop.f32.mrb[26].mxu1 }
 0xa77   :  { %3957 = vtanh.f32 %v946_v23  ;;  %v3599_v28 = vpop.f32.mrb[27].mxu1  ;;  %v3322_v47 = vmul.f32 -1.442695, %v946_v23 }
 0xa81   :  { %v3958_v31 = vpop.eup %3957 }
 0xa82   :  { %1008 = vrot.lane.b32.xlu1 %v3958_v31, %s4171_s5 }
 0xa8f   :  { %v992_v33 = vpop.f32.mrb[24].mxu0 }
 0xa90   :  { %v998_v35 = vadd.f32 %v992_v33, %v4406_v32  ;;  %v3606_v37 = vpop.f32.mrb[25].mxu0 }
 0xa91   :  { %v995_v39 = vpop.f32.mrb[26].mxu0 }
 0xa92   :  { %3959 = vtanh.f32 %v998_v35  ;;  %v3607_v41 = vpop.f32.mrb[27].mxu0  ;;  %v3323_v19 = vmul.f32 -1.442695, %v998_v35 }
 0xa93   :  { %3961 = vpow2.f32 %v3322_v47 }
 0xa9c   :  { %v3960_v46 = vpop.eup %3959 }
 0xa9d   :  { %1032 = vrot.lane.b32.xlu0 %v3960_v46, %s4171_s5  ;;  %v3962_v24 = vpop.eup %3961 }
 0xa9e   :  { %v1002_v48 = vadd.f32 1.0, %v3962_v24 }
 0xaa0   :  { %3963 = vrcp.f32 %v1002_v48 }
 0xaa1   :  { %3965 = vpow2.f32 %v3323_v19 }
 0xaaa   :  { %v3964_v49 = vpop.eup %3963 }
 0xaab   :  { %v3966_v32 = vpop.eup %3965  ;;  %v1006_v54 = vmul.f32 %v3964_v49, %v4500_v58 }
 0xaac   :  { %v1026_v51 = vadd.f32 1.0, %v3966_v32 }
 0xaae   :  { %3967 = vrcp.f32 %v1026_v51 }
 0xab8   :  { %v3968_v52 = vpop.eup %3967 }
 0xab9   :  { %v1030_v57 = vmul.f32 %v3968_v52, %v4505_v63 }
 0xaf4   :  { %v1009_v14 = vpop.permute.xlu1 %1008 }
 0xaf5   :  { %v1011_v50 = vmul.f32 %v3964_v49, %v1009_v14 }
 0xaf7   :  { %1013 = vrot.lane.b32.xlu1 %v1011_v50, %s4172_s18 }
 0xb0f   :  { %v1033_v36 = vpop.permute.xlu0 %1032 }
 0xb10   :  { %v1035_v53 = vmul.f32 %v3968_v52, %v1033_v36 }
 0xb12   :  { %1037 = vrot.lane.b32.xlu0 %v1035_v53, %s4172_s18 }
 0xb69   :  { %v1014_v40 = vpop.permute.xlu1 %1013 }
 0xb6a   :  { %v4540_v55 = vadd.f32 %v1014_v40, %v1006_v54 }
 0xb6c   :  { %3969 = vtanh.f32 %v4540_v55 }
 0xb76   :  { %v3970_v56 = vpop.eup %3969 }
 0xb77   :  { %1019 = vrot.lane.b32.xlu1 %v3970_v56, %s4171_s5 }
 0xb84   :  { %v1038_v59 = vpop.permute.xlu0 %1037 }
 0xb85   :  { %v4545_v60 = vadd.f32 %v1038_v59, %v1030_v57 }
 0xb87   :  { %3971 = vtanh.f32 %v4545_v60 }
 0xb91   :  { %v3972_v62 = vpop.eup %3971 }
 0xb92   :  { %1043 = vrot.lane.b32.xlu0 %v3972_v62, %s4171_s5 }
 0xbe9   :  { %v1020_v2 = vpop.permute.xlu1 %1019 }
 0xbea   :  { %v4549_v58 = vmul.f32 %v3964_v49, %v1020_v2 }
 0xbec   :  { %v1060_v7 = vpack.c.bf16 %v4549_v58, %v4549_v58 }
 0xbee   :  { %1062 = vrot.lane.b32.xlu1 %v1060_v7, %s4172_s18 }
 0xc04   :  { %v1044_v9 = vpop.permute.xlu0 %1043 }
 0xc05   :  { %v4554_v10 = vmul.f32 %v3968_v52, %v1044_v9 }
 0xc07   :  { %v1109_v63 = vpack.c.bf16 %v4554_v10, %v4554_v10 }
 0xc09   :  { %1111 = vrot.lane.b32.xlu0 %v1109_v63, %s4172_s18 }
 0xc60   :  { %v1063_v5 = vpop.permute.xlu1 %1062 }
 0xc61   :  { %3613 = vmatmul.mubr.msk.bf16.vlgmr.msra.gmra.mrb[28].mxu1 %vm280_vm10, %v1063_v5 }
 0xc62   :  { %3625 = vmatpush3.bf16.msra.mxu1 %v4306_v29  ;;  %3628 = vmatprep.mubr.msk.bf16.mxu1 %vm4170_vm9, %v4169_v20 }
 0xc63   :  { %3626 = vmatprep.subr.bf16.mxu1 %v4169_v20 }
 0xc66   :  { %3627 = vmatpush3.bf16.msra.mxu1 %v4333_v43 }
 0xc67   :  { %3640 = vmatprep.subr.bf16.mxu1 %v4169_v20 }
 0xc7b   :  { %v1112_v8 = vpop.permute.xlu0 %1111 }
 0xc7c   :  { %3621 = vmatmul.mubr.msk.bf16.vlgmr.msra.gmra.mrb[28].mxu0 %vm280_vm10, %v1112_v8 }
 0xc7d   :  { %3633 = vmatpush3.bf16.msra.mxu0 %v4346_v44  ;;  %3636 = vmatprep.mubr.msk.bf16.mxu0 %vm4170_vm9, %v4169_v20 }
 0xc7e   :  { %3634 = vmatprep.subr.bf16.mxu0 %v4169_v20 }
 0xc81   :  { %3635 = vmatpush3.bf16.msra.mxu0 %v4352_v45 }
 0xc82   :  { %3648 = vmatprep.subr.bf16.mxu0 %v4169_v20 }
 0xd34   :  { %v1101_v18 = vpop.f32.mrb[28].mxu1 }
 0xd35   :  { %v1107_v21 = vadd.f32 %v1101_v18, %v4404_v30  ;;  %v3614_v23 = vpop.f32.mrb[29].mxu1 }
 0xd36   :  { %v1104_v25 = vpop.f32.mrb[30].mxu1 }
 0xd37   :  { %3973 = vtanh.f32 %v1107_v21  ;;  %v3615_v27 = vpop.f32.mrb[31].mxu1  ;;  %v3326_v46 = vmul.f32 -1.442695, %v1107_v21 }
 0xd41   :  { %v3974_v28 = vpop.eup %3973 }
 0xd42   :  { %1166 = vrot.lane.b32.xlu1 %v3974_v28, %s4171_s5 }
 0xd4f   :  { %v1150_v31 = vpop.f32.mrb[28].mxu0 }
 0xd50   :  { %v1156_v33 = vadd.f32 %v1150_v31, %v4401_v26  ;;  %v3622_v35 = vpop.f32.mrb[29].mxu0 }
 0xd51   :  { %v1153_v37 = vpop.f32.mrb[30].mxu0 }
 0xd52   :  { %3975 = vtanh.f32 %v1156_v33  ;;  %v3623_v39 = vpop.f32.mrb[31].mxu0  ;;  %v3327_v24 = vmul.f32 -1.442695, %v1156_v33 }
 0xd53   :  { %3977 = vpow2.f32 %v3326_v46 }
 0xd5c   :  { %v3976_v41 = vpop.eup %3975 }
 0xd5d   :  { %1190 = vrot.lane.b32.xlu0 %v3976_v41, %s4171_s5  ;;  %v3978_v30 = vpop.eup %3977 }
 0xd5e   :  { %v1160_v47 = vadd.f32 1.0, %v3978_v30 }
 0xd60   :  { %3979 = vrcp.f32 %v1160_v47 }
 0xd61   :  { %3981 = vpow2.f32 %v3327_v24 }
 0xd6a   :  { %v3980_v48 = vpop.eup %3979 }
 0xd6b   :  { %v3982_v26 = vpop.eup %3981  ;;  %v1164_v52 = vmul.f32 %v3980_v48, %v4540_v55 }
 0xd6c   :  { %v1184_v14 = vadd.f32 1.0, %v3982_v26 }
 0xd6e   :  { %3983 = vrcp.f32 %v1184_v14 }
 0xd78   :  { %v3984_v50 = vpop.eup %3983 }
 0xd79   :  { %v1188_v40 = vmul.f32 %v3984_v50, %v4545_v60 }
 0xdb4   :  { %v1167_v19 = vpop.permute.xlu1 %1166 }
 0xdb5   :  { %v1169_v49 = vmul.f32 %v3980_v48, %v1167_v19 }
 0xdb7   :  { %1171 = vrot.lane.b32.xlu1 %v1169_v49, %s4172_s18 }
 0xdcf   :  { %v1191_v32 = vpop.permute.xlu0 %1190 }
 0xdd0   :  { %v1193_v51 = vmul.f32 %v3984_v50, %v1191_v32 }
 0xdd2   :  { %1195 = vrot.lane.b32.xlu0 %v1193_v51, %s4172_s18 }
 0xe29   :  { %v1172_v36 = vpop.permute.xlu1 %1171 }
 0xe2a   :  { %v4580_v53 = vadd.f32 %v1172_v36, %v1164_v52 }
 0xe2c   :  { %3985 = vtanh.f32 %v4580_v53 }
 0xe36   :  { %v3986_v54 = vpop.eup %3985 }
 0xe37   :  { %1177 = vrot.lane.b32.xlu1 %v3986_v54, %s4171_s5 }
 0xe44   :  { %v1196_v56 = vpop.permute.xlu0 %1195 }
 0xe45   :  { %v4585_v57 = vadd.f32 %v1196_v56, %v1188_v40 }
 0xe47   :  { %3987 = vtanh.f32 %v4585_v57 }
 0xe51   :  { %v3988_v59 = vpop.eup %3987 }
 0xe52   :  { %1201 = vrot.lane.b32.xlu0 %v3988_v59, %s4171_s5 }
 0xea9   :  { %v1178_v62 = vpop.permute.xlu1 %1177 }
 0xeaa   :  { %v4589_v55 = vmul.f32 %v3980_v48, %v1178_v62 }
 0xeac   :  { %v1216_v2 = vpack.c.bf16 %v4589_v55, %v4589_v55 }
 0xeae   :  { %1218 = vrot.lane.b32.xlu1 %v1216_v2, %s4172_s18 }
 0xec4   :  { %v1202_v7 = vpop.permute.xlu0 %1201 }
 0xec5   :  { %v4594_v9 = vmul.f32 %v3984_v50, %v1202_v7 }
 0xec7   :  { %v1265_v60 = vpack.c.bf16 %v4594_v9, %v4594_v9 }
 0xec9   :  { %1267 = vrot.lane.b32.xlu0 %v1265_v60, %s4172_s18  ;;  %v4165_v60 = vld [vmem:[%s5195_s3] sm:$0xff]  }
 0xf20   :  { %v1219_v63 = vpop.permute.xlu1 %1218 }
 0xf21   :  { %3629 = vmatmul.mubr.msk.bf16.vlgmr.msra.gmra.mrb[32].mxu1 %vm280_vm10, %v1219_v63 }
 0xf22   :  { %3641 = vmatpush3.bf16.msra.mxu1 %v4306_v29  ;;  %3644 = vmatprep.mubr.msk.bf16.mxu1 %vm4170_vm9, %v4169_v20 }
 0xf23   :  { %3642 = vmatprep.subr.bf16.mxu1 %v4169_v20 }
 0xf26   :  { %3643 = vmatpush3.bf16.msra.mxu1 %v4333_v43 }
 0xf27   :  { %3656 = vmatprep.subr.bf16.mxu1 %v4169_v20 }
 0xf3b   :  { %v1268_v5 = vpop.permute.xlu0 %1267 }
 0xf3c   :  { %3637 = vmatmul.mubr.msk.bf16.vlgmr.msra.gmra.mrb[32].mxu0 %vm280_vm10, %v1268_v5 }
 0xf3d   :  { %3649 = vmatpush3.bf16.msra.mxu0 %v4346_v44  ;;  %3652 = vmatprep.mubr.msk.bf16.mxu0 %vm4170_vm9, %v4169_v20 }
 0xf3e   :  { %3650 = vmatprep.subr.bf16.mxu0 %v4169_v20 }
 0xf41   :  { %3651 = vmatpush3.bf16.msra.mxu0 %v4352_v45 }
 0xf42   :  { %3664 = vmatprep.subr.bf16.mxu0 %v4169_v20 }
 0xff4   :  { %v1257_v29 = vpop.f32.mrb[32].mxu1 }
 0xff5   :  { %v1263_v8 = vadd.f32 %v1257_v29, %v4408_v34  ;;  %v3630_v18 = vpop.f32.mrb[33].mxu1 }
 0xff6   :  { %v1260_v21 = vpop.f32.mrb[34].mxu1 }
 0xff7   :  { %3989 = vtanh.f32 %v1263_v8  ;;  %v3631_v23 = vpop.f32.mrb[35].mxu1  ;;  %v3330_v39 = vmul.f32 -1.442695, %v1263_v8 }
0x1001   :  { %v3990_v25 = vpop.eup %3989 }
0x1002   :  { %1322 = vrot.lane.b32.xlu1 %v3990_v25, %s4171_s5 }
0x100f   :  { %v1306_v27 = vpop.f32.mrb[32].mxu0 }
0x1010   :  { %v1312_v28 = vadd.f32 %v1306_v27, %v4397_v22  ;;  %v3638_v31 = vpop.f32.mrb[33].mxu0 }
0x1011   :  { %v1309_v33 = vpop.f32.mrb[34].mxu0 }
0x1012   :  { %3991 = vtanh.f32 %v1312_v28  ;;  %v3639_v35 = vpop.f32.mrb[35].mxu0  ;;  %v3331_v46 = vmul.f32 -1.442695, %v1312_v28 }
0x1013   :  { %3993 = vpow2.f32 %v3330_v39 }
0x101c   :  { %v3992_v37 = vpop.eup %3991 }
0x101d   :  { %1346 = vrot.lane.b32.xlu0 %v3992_v37, %s4171_s5  ;;  %v3994_v34 = vpop.eup %3993 }
0x101e   :  { %v1316_v41 = vadd.f32 1.0, %v3994_v34 }
0x1020   :  { %3995 = vrcp.f32 %v1316_v41 }
0x1021   :  { %3997 = vpow2.f32 %v3331_v46 }
0x102a   :  { %v3996_v30 = vpop.eup %3995 }
0x102b   :  { %v3998_v22 = vpop.eup %3997  ;;  %v1320_v14 = vmul.f32 %v3996_v30, %v4580_v53 }
0x102c   :  { %v1340_v48 = vadd.f32 1.0, %v3998_v22 }
0x102e   :  { %3999 = vrcp.f32 %v1340_v48 }
0x1038   :  { %v4000_v19 = vpop.eup %3999 }
0x1039   :  { %v1344_v52 = vmul.f32 %v4000_v19, %v4585_v57 }
0x1074   :  { %v1323_v47 = vpop.permute.xlu1 %1322 }
0x1075   :  { %v1325_v24 = vmul.f32 %v3996_v30, %v1323_v47 }
0x1077   :  { %1327 = vrot.lane.b32.xlu1 %v1325_v24, %s4172_s18 }
0x108f   :  { %v1347_v49 = vpop.permute.xlu0 %1346 }
0x1090   :  { %v1349_v26 = vmul.f32 %v4000_v19, %v1347_v49 }
0x1092   :  { %1351 = vrot.lane.b32.xlu0 %v1349_v26, %s4172_s18 }
0x10e9   :  { %v1328_v50 = vpop.permute.xlu1 %1327 }
0x10ea   :  { %v4620_v32 = vadd.f32 %v1328_v50, %v1320_v14 }
0x10ec   :  { %4001 = vtanh.f32 %v4620_v32 }
0x10f6   :  { %v4002_v51 = vpop.eup %4001 }
0x10f7   :  { %1333 = vrot.lane.b32.xlu1 %v4002_v51, %s4171_s5 }
0x1104   :  { %v1352_v36 = vpop.permute.xlu0 %1351 }
0x1105   :  { %v4625_v54 = vadd.f32 %v1352_v36, %v1344_v52 }
0x1107   :  { %4003 = vtanh.f32 %v4625_v54 }
0x1111   :  { %v4004_v40 = vpop.eup %4003 }
0x1112   :  { %1357 = vrot.lane.b32.xlu0 %v4004_v40, %s4171_s5 }
0x1169   :  { %v1334_v56 = vpop.permute.xlu1 %1333 }
0x116a   :  { %v4629_v53 = vmul.f32 %v3996_v30, %v1334_v56 }
0x116c   :  { %v1372_v59 = vpack.c.bf16 %v4629_v53, %v4629_v53 }
0x116e   :  { %1374 = vrot.lane.b32.xlu1 %v1372_v59, %s4172_s18 }
0x1184   :  { %v1358_v62 = vpop.permute.xlu0 %1357 }
0x1185   :  { %v4634_v2 = vmul.f32 %v4000_v19, %v1358_v62 }
0x1187   :  { %v1421_v57 = vpack.c.bf16 %v4634_v2, %v4634_v2 }
0x1189   :  { %1423 = vrot.lane.b32.xlu0 %v1421_v57, %s4172_s18 }
0x11e0   :  { %v1375_v7 = vpop.permute.xlu1 %1374 }
0x11e1   :  { %3645 = vmatmul.mubr.msk.bf16.vlgmr.msra.gmra.mrb[36].mxu1 %vm280_vm10, %v1375_v7 }
0x11e2   :  { %3657 = vmatpush3.bf16.msra.mxu1 %v4165_v60  ;;  %3660 = vmatprep.mubr.msk.bf16.mxu1 %vm4170_vm9, %v4169_v20 }
0x11e3   :  { %3658 = vmatprep.subr.bf16.mxu1 %v4169_v20 }
0x11e6   :  { %3659 = vmatpush3.bf16.msra.mxu1 %v4333_v43 }
0x11fb   :  { %v1424_v63 = vpop.permute.xlu0 %1423 }
0x11fc   :  { %3653 = vmatmul.mubr.msk.bf16.vlgmr.msra.gmra.mrb[36].mxu0 %vm280_vm10, %v1424_v63 }
0x11fd   :  { %3665 = vmatpush3.bf16.msra.mxu0 %v4346_v44  ;;  %3668 = vmatprep.mubr.msk.bf16.mxu0 %vm4170_vm9, %v4169_v20 }
0x11fe   :  { %3666 = vmatprep.subr.bf16.mxu0 %v4169_v20 }
0x1201   :  { %3667 = vmatpush3.bf16.msra.mxu0 %v4352_v45 }
0x1202   :  { %3672 = vmatprep.subr.bf16.mxu0 %v4169_v20 }
0x12b4   :  { %v1413_v5 = vpop.f32.mrb[36].mxu1 }
0x12b5   :  { %v1419_v29 = vadd.f32 %v1413_v5, %v4412_v38  ;;  %v3646_v8 = vpop.f32.mrb[37].mxu1 }
0x12b6   :  { %v1416_v18 = vpop.f32.mrb[38].mxu1 }
0x12b7   :  { %4005 = vtanh.f32 %v1419_v29  ;;  %v3647_v43 = vpop.f32.mrb[39].mxu1  ;;  %v3334_v31 = vmul.f32 -1.442695, %v1419_v29 }
0x12c1   :  { %v4006_v21 = vpop.eup %4005 }
0x12c2   :  { %1478 = vrot.lane.b32.xlu1 %v4006_v21, %s4171_s5 }
0x12cf   :  { %v1462_v44 = vpop.f32.mrb[36].mxu0 }
0x12d0   :  { %v1468_v23 = vadd.f32 %v1462_v44, %v4393_v17  ;;  %v3654_v25 = vpop.f32.mrb[37].mxu0 }
0x12d1   :  { %v1465_v27 = vpop.f32.mrb[38].mxu0 }
0x12d2   :  { %4007 = vtanh.f32 %v1468_v23  ;;  %v3655_v28 = vpop.f32.mrb[39].mxu0  ;;  %v3335_v35 = vmul.f32 -1.442695, %v1468_v23 }
0x12d3   :  { %4009 = vpow2.f32 %v3334_v31 }
0x12dc   :  { %v4008_v45 = vpop.eup %4007 }
0x12dd   :  { %1502 = vrot.lane.b32.xlu0 %v4008_v45, %s4171_s5  ;;  %v4010_v38 = vpop.eup %4009 }
0x12de   :  { %v1472_v33 = vadd.f32 1.0, %v4010_v38 }
0x12e0   :  { %4011 = vrcp.f32 %v1472_v33 }
0x12e1   :  { %4013 = vpow2.f32 %v3335_v35 }
0x12ea   :  { %v4012_v37 = vpop.eup %4011 }
0x12eb   :  { %v4014_v17 = vpop.eup %4013  ;;  %v1476_v24 = vmul.f32 %v4012_v37, %v4620_v32 }
0x12ec   :  { %v1496_v41 = vadd.f32 1.0, %v4014_v17 }
0x12ee   :  { %4015 = vrcp.f32 %v1496_v41 }
0x12f8   :  { %v4016_v46 = vpop.eup %4015 }
0x12f9   :  { %v1500_v49 = vmul.f32 %v4016_v46, %v4625_v54 }
0x1334   :  { %v1479_v39 = vpop.permute.xlu1 %1478 }
0x1335   :  { %v1481_v34 = vmul.f32 %v4012_v37, %v1479_v39 }
0x1337   :  { %1483 = vrot.lane.b32.xlu1 %v1481_v34, %s4172_s18 }
0x134f   :  { %v1503_v30 = vpop.permute.xlu0 %1502 }
0x1350   :  { %v1505_v47 = vmul.f32 %v4016_v46, %v1503_v30 }
0x1352   :  { %1507 = vrot.lane.b32.xlu0 %v1505_v47, %s4172_s18 }
0x13a9   :  { %v1484_v22 = vpop.permute.xlu1 %1483 }
0x13aa   :  { %v1486_v48 = vadd.f32 %v1484_v22, %v1476_v24  ;;  %v3895_v22 = vld [vmem:[%s5198_s6 + $0x4] ss:$8 sps:$4 sm:$0xff]  }
0x13ab   :  { %1768 = vmatprep.subr.bf16.mxu1 %v3895_v22 }
0x13ac   :  { %4017 = vtanh.f32 %v1486_v48 }
0x13b6   :  { %v4018_v19 = vpop.eup %4017 }
0x13b7   :  { %1489 = vrot.lane.b32.xlu1 %v4018_v19, %s4171_s5  ;;  %v4726_v19 = vld [vmem:[%s5199_s7] sm:$0xff]  }
0x13c4   :  { %v1508_v26 = vpop.permute.xlu0 %1507 }
0x13c5   :  { %v1510_v14 = vadd.f32 %v1508_v26, %v1500_v49  ;;  %v4736_v49 = vld [vmem:[%s5199_s7 + $0x8] sm:$0xff]   ;;  %v3903_v26 = vld [vmem:[%s5198_s6 + $0x30] ss:$8 sps:$4 sm:$0xff]  }
0x13c7   :  { %4019 = vtanh.f32 %v1510_v14 }
0x13d1   :  { %v4020_v50 = vpop.eup %4019 }
0x13d2   :  { %1513 = vrot.lane.b32.xlu0 %v4020_v50, %s4171_s5 }
0x1429   :  { %v1490_v51 = vpop.permute.xlu1 %1489 }
0x142a   :  { %v4664_v52 = vmul.f32 %v4012_v37, %v1490_v51 }
0x142c   :  { %v1528_v32 = vpack.c.bf16 %v4664_v52, %v4664_v52 }
0x142e   :  { %1530 = vrot.lane.b32.xlu1 %v1528_v32, %s4172_s18 }
0x1444   :  { %v1514_v36 = vpop.permute.xlu0 %1513 }
0x1445   :  { %v1516_v40 = vmul.f32 %v4016_v46, %v1514_v36 }
0x1447   :  { %v1577_v56 = vpack.c.bf16 %v1516_v40, %v1516_v40 }
0x1449   :  { %1579 = vrot.lane.b32.xlu0 %v1577_v56, %s4172_s18 }
0x14a0   :  { %v1531_v54 = vpop.permute.xlu1 %1530 }
0x14a1   :  { %3661 = vmatmul.mubr.msk.bf16.vlgmr.msra.gmra.mrb[40].mxu1 %vm280_vm10, %v1531_v54 }
0x14a2   :  { %1800 = vmatprep.mubr.bf16.mxu1 %v4168_v0 }
0x14bb   :  { %v1580_v59 = vpop.permute.xlu0 %1579 }
0x14bc   :  { %3669 = vmatmul.mubr.msk.bf16.vlgmr.msra.gmra.mrb[40].mxu0 %vm280_vm10, %v1580_v59 }
0x14bd   :  { %3676 = vmatprep.mubr.msk.bf16.mxu0 %vm4170_vm9, %v4169_v20  ;;  %3673 = vmatpush3.bf16.msra.mxu0 %v4726_v19 }
0x14be   :  { %3674 = vmatprep.subr.bf16.mxu0 %v4169_v20 }
0x14c1   :  { %3675 = vmatpush3.bf16.msra.mxu0 %v4736_v49 }
0x14c2   :  { %3680 = vmatprep.subr.bf16.mxu0 %v4169_v20 }
0x14c4   :  { %3677 = vmatmul.mubr.bf16.vlgmr.msra.gmra.mrb[44].mxu0 %v4168_v0 }
0x14c5   :  { %3684 = vmatprep.mubr.msk.bf16.mxu0 %vm4170_vm9, %v4169_v20 }
0x1574   :  { %v1569_v62 = vpop.f32.mrb[40].mxu1 }
0x1575   :  { %v1575_v57 = vadd.f32 %v1569_v62, %v4416_v42  ;;  %v3662_v7 = vpop.f32.mrb[41].mxu1 }
0x1576   :  { %v1572_v60 = vpop.f32.mrb[42].mxu1 }
0x1577   :  { %4021 = vtanh.f32 %v1575_v57  ;;  %v3663_v63 = vpop.f32.mrb[43].mxu1  ;;  %v3338_v23 = vmul.f32 -1.442695, %v1575_v57 }
0x1581   :  { %v4022_v5 = vpop.eup %4021 }
0x1582   :  { %1634 = vrot.lane.b32.xlu1 %v4022_v5, %s4171_s5 }
0x158f   :  { %v1618_v29 = vpop.f32.mrb[40].mxu0 }
0x1590   :  { %v1624_v8 = vadd.f32 %v1618_v29, %v4389_v12  ;;  %v3670_v18 = vpop.f32.mrb[41].mxu0 }
0x1591   :  { %v1621_v43 = vpop.f32.mrb[42].mxu0 }
0x1592   :  { %4023 = vtanh.f32 %v1624_v8  ;;  %v3671_v21 = vpop.f32.mrb[43].mxu0  ;;  %v3339_v27 = vmul.f32 -1.442695, %v1624_v8 }
0x1593   :  { %4025 = vpow2.f32 %v3338_v23 }
0x159c   :  { %v4024_v44 = vpop.eup %4023 }
0x159d   :  { %1658 = vrot.lane.b32.xlu0 %v4024_v44, %s4171_s5  ;;  %v4026_v42 = vpop.eup %4025 }
0x159e   :  { %v1628_v25 = vadd.f32 1.0, %v4026_v42 }
0x15a0   :  { %4027 = vrcp.f32 %v1628_v25 }
0x15a1   :  { %4029 = vpow2.f32 %v3339_v27 }
0x15aa   :  { %v4679_v28 = vpop.eup %4027 }
0x15ab   :  { %v4030_v12 = vpop.eup %4029  ;;  %v1632_v39 = vmul.f32 %v4679_v28, %v1486_v48  ;;  %v3899_v48 = vld [vmem:[%s5198_s6 + $0x20] ss:$8 sps:$4 sm:$0xff]  }
0x15ac   :  { %v1652_v38 = vadd.f32 1.0, %v4030_v12 }
0x15ae   :  { %4031 = vrcp.f32 %v1652_v38 }
0x15b8   :  { %v4032_v33 = vpop.eup %4031 }
0x15b9   :  { %v1656_v46 = vmul.f32 %v4032_v33, %v1510_v14 }
0x15f4   :  { %v1635_v45 = vpop.permute.xlu1 %1634 }
0x15f5   :  { %v1637_v31 = vmul.f32 %v4679_v28, %v1635_v45  ;;  %v1912_v45 = vpop.f32.mrb[44].mxu0 }
0x15f7   :  { %1639 = vrot.lane.b32.xlu1 %v1637_v31, %s4172_s18  ;;  %v3678_v31 = vpop.f32.mrb[45].mxu0 }
0x15f8   :  { %v1915_v12 = vpop.f32.mrb[46].mxu0 }
0x15f9   :  { %v3679_v38 = vpop.f32.mrb[47].mxu0 }
0x160f   :  { %v1659_v35 = vpop.permute.xlu0 %1658 }
0x1610   :  { %v1661_v37 = vmul.f32 %v4032_v33, %v1659_v35 }
0x1612   :  { %1663 = vrot.lane.b32.xlu0 %v1661_v37, %s4172_s18 }
0x1669   :  { %v1640_v34 = vpop.permute.xlu1 %1639 }
0x166a   :  { %v1642_v17 = vadd.f32 %v1640_v34, %v1632_v39 }
0x166c   :  { %4033 = vtanh.f32 %v1642_v17 }
0x1676   :  { %v4034_v41 = vpop.eup %4033 }
0x1677   :  { %1645 = vrot.lane.b32.xlu1 %v4034_v41, %s4171_s5 }
0x167b   :  { %720 = vrot.lane.b32.xlu1 %v4469_v1, %s4172_s18  ;;  %v3893_v1 = vld [vmem:[%s5198_s6] ss:$8 sps:$4 sm:$0xff]  }
0x167c   :  { %1769 = vmatpush1.bf16.msra.mxu1 %v3893_v1 }
0x1684   :  { %v1664_v30 = vpop.permute.xlu0 %1663 }
0x1685   :  { %v1666_v47 = vadd.f32 %v1664_v30, %v1656_v46 }
0x1687   :  { %4035 = vtanh.f32 %v1666_v47 }
0x1691   :  { %v4036_v24 = vpop.eup %4035 }
0x1692   :  { %1669 = vrot.lane.b32.xlu0 %v4036_v24, %s4171_s5 }
0x1696   :  { %556 = vrot.lane.b32.xlu0 %v4429_v11, %s4172_s18  ;;  %v3898_v11 = vld [vmem:[%s5198_s6 + $0x14] ss:$8 sps:$4 sm:$0xff]  }
0x1697   :  { %1770 = vmatprep.subr.bf16.mxu1 %v3898_v11 }
0x169a   :  { %1523 = vrot.lane.b32.xlu0 %v1516_v40, %s4171_s5  ;;  %v4760_v40 = vld [vmem:[%s5200_s8] sm:$0xff]  }
0x169b   :  { %3681 = vmatpush3.bf16.msra.mxu0 %v4760_v40 }
0x169c   :  { %3682 = vmatprep.subr.bf16.mxu0 %v4169_v20 }
0x169e   :  { %884 = vrot.lane.b32.xlu0 %v4509_v61, %s4172_s18  ;;  %v3896_v61 = vld [vmem:[%s5198_s6 + $0x10] ss:$8 sps:$4 sm:$0xff]  }
0x169f   :  { %1771 = vmatpush1.bf16.msra.mxu1 %v3896_v61 }
0x16a2   :  { %1211 = vrot.lane.b32.xlu0 %v4594_v9, %s4171_s5 }
0x16a6   :  { %890 = vrot.lane.b32.xlu0 %v4514_v13, %s4171_s5 }
0x16aa   :  { %1206 = vrot.lane.b32.xlu0 %v4589_v55, %s4172_s18  ;;  %v3901_v55 = vld [vmem:[%s5198_s6 + $0x24] ss:$8 sps:$4 sm:$0xff]  }
0x16ab   :  { %1772 = vmatprep.subr.bf16.mxu1 %v3901_v55 }
0x16ac   :  { %1773 = vmatpush1.bf16.msra.mxu1 %v3899_v48 }
0x16ae   :  { %561 = vrot.lane.b32.xlu0 %v4434_v16, %s4171_s5  ;;  %v3905_v16 = vld [vmem:[%s5198_s6 + $0x34] ss:$8 sps:$4 sm:$0xff]  }
0x16af   :  { %1774 = vmatprep.subr.bf16.mxu1 %v3905_v16 }
0x16b0   :  { %1775 = vmatpush1.bf16.msra.mxu1 %v3903_v26 }
0x16b1   :  { %3712 = vmatprep.subr.bf16.mxu1 %v4169_v20 }
0x16b2   :  { %1518 = vrot.lane.b32.xlu0 %v4664_v52, %s4172_s18 }
0x16e9   :  { %v1646_v13 = vpop.permute.xlu1 %1645 }
0x16ea   :  { %v1648_v56 = vmul.f32 %v4679_v28, %v1646_v13 }
0x16ed   :  { %v721_v9 = vpop.permute.xlu1 %720 }
0x16ee   :  { %724 = vst.msk [vmem:[#allocation3 + $0x8] sm:$0xff] %vm280_vm10, %v721_v9 }
0x1704   :  { %v1670_v14 = vpop.permute.xlu0 %1669 }
0x1705   :  { %v1672_v50 = vmul.f32 %v4032_v33, %v1670_v14 }
0x1707   :  { %1679 = vrot.lane.b32.xlu1 %v1672_v50, %s4171_s5 }
0x1708   :  { %v557_v51 = vpop.permute.xlu0 %556 }
0x1709   :  { %559 = vst.msk [vmem:[#allocation3] sm:$0xff] %vm280_vm10, %v557_v51 }
0x170b   :  { %1048 = vrot.lane.b32.xlu1 %v4549_v58, %s4172_s18 }
0x170c   :  { %v1524_v52 = vpop.permute.xlu0 %1523 }
0x170d   :  { %1526 = vst.msk [vmem:[#allocation3 + $0x8] sm:$0xff] %vm565_vm11, %v1524_v52 }
0x170f   :  { %1367 = vrot.lane.b32.xlu1 %v4634_v2, %s4171_s5  ;;  %v4772_v2 = vld [vmem:[%s5200_s8 + $0x8] sm:$0xff]  }
0x1710   :  { %v885_v32 = vpop.permute.xlu0 %884  ;;  %3683 = vmatpush3.bf16.msra.mxu0 %v4772_v2 }
0x1711   :  { %888 = vst.msk [vmem:[#allocation3 + $0x10] sm:$0xff] %vm280_vm10, %v885_v32  ;;  %3688 = vmatprep.subr.bf16.mxu0 %v4169_v20 }
0x1713   :  { %1054 = vrot.lane.b32.xlu1 %v4554_v10, %s4171_s5  ;;  %3685 = vmatmul.mubr.bf16.vlgmr.msra.gmra.mrb[48].mxu0 %v4168_v0 }
0x1714   :  { %v1212_v36 = vpop.permute.xlu0 %1211  ;;  %3689 = vmatpush3.bf16.msra.mxu0 %v4726_v19  ;;  %3692 = vmatprep.mubr.msk.bf16.mxu0 %vm4170_vm9, %v4169_v20  ;;  %v1684_v57 = vld [vmem:[#allocation3 + $0x8] sm:$0xff] }
0x1715   :  { %3690 = vmatprep.subr.bf16.mxu0 %v4169_v20 }
0x1717   :  { %1362 = vrot.lane.b32.xlu1 %v4629_v53, %s4172_s18 }
0x1718   :  { %v891_v58 = vpop.permute.xlu0 %890  ;;  %3691 = vmatpush3.bf16.msra.mxu0 %v4736_v49 }
0x1719   :  { %894 = vst.msk [vmem:[#allocation3 + $0x28] sm:$0xff] %vm565_vm11, %v891_v58  ;;  %3696 = vmatprep.subr.bf16.mxu0 %v4169_v20 }
0x171b   :  { %726 = vrot.lane.b32.xlu1 %v4474_v15, %s4171_s5 }
0x171c   :  { %v1207_v10 = vpop.permute.xlu0 %1206 }
0x171f   :  { %1674 = vrot.lane.b32.xlu1 %v1648_v56, %s4172_s18 }
0x1720   :  { %v562_v53 = vpop.permute.xlu0 %561 }
0x1721   :  { %566 = vst.msk [vmem:[#allocation3 + $0x38] sm:$0xff] %vm565_vm11, %v562_v53 }
0x1724   :  { %v1519_v43 = vpop.permute.xlu0 %1518 }
0x1779   :  { %v1680_v15 = vpop.permute.xlu1 %1679 }
0x177a   :  { %1682 = vst.msk [vmem:[#allocation3] sm:$0xff] %vm565_vm11, %v1680_v15 }
0x177d   :  { %v1049_v54 = vpop.permute.xlu1 %1048 }
0x177e   :  { %1052 = vst.msk [vmem:[#allocation3 + $0x18] sm:$0xff] %vm280_vm10, %v1049_v54 }
0x177f   :  { %1214 = vst.msk [vmem:[#allocation3 + $0x18] sm:$0xff] %vm565_vm11, %v1212_v36 }
0x1781   :  { %v1368_v59 = vpop.permute.xlu1 %1367  ;;  %v1683_v62 = vld [vmem:[#allocation3] sm:$0xff] }
0x1782   :  { %1370 = vst.msk [vmem:[#allocation3 + $0x10] sm:$0xff] %vm565_vm11, %v1368_v59  ;;  %v1691_v7 = vpack.c.bf16 %v1684_v57, %v1683_v62 }
0x1784   :  { %3348 = vmatmul.mubr.msk.bf16.vlgmr.msra.gmra.mrb[44].mxu1 %vm1755_vm12, %v1691_v7 }
0x1785   :  { %v1055_v60 = vpop.permute.xlu1 %1054  ;;  %1810 = vmatprep.mubr.bf16.mxu1 %v4168_v0  ;;  %3713 = vmatpush3.bf16.msra.mxu1 %v4760_v40 }
0x1786   :  { %1058 = vst.msk [vmem:[#allocation3 + $0x20] sm:$0xff] %vm565_vm11, %v1055_v60  ;;  %3714 = vmatprep.subr.bf16.mxu1 %v4169_v20  ;;  %v1686_v29 = vld [vmem:[#allocation3 + $0x18] sm:$0xff] }
0x1787   :  { %1209 = vst.msk [vmem:[#allocation3 + $0x20] sm:$0xff] %vm280_vm10, %v1207_v10 }
0x1789   :  { %v1363_v63 = vpop.permute.xlu1 %1362  ;;  %v1685_v5 = vld [vmem:[#allocation3 + $0x10] sm:$0xff]  ;;  %3715 = vmatpush3.bf16.msra.mxu1 %v4772_v2 }
0x178a   :  { %1365 = vst.msk [vmem:[#allocation3 + $0x28] sm:$0xff] %vm280_vm10, %v1363_v63  ;;  %v1692_v8 = vpack.c.bf16 %v1686_v29, %v1685_v5  ;;  %3728 = vmatprep.subr.bf16.mxu1 %v4169_v20 }
0x178c   :  { %3349 = vmatmul.mubr.msk.bf16.gmra.mrb[48].mxu1 %vm1755_vm12, %v1692_v8 }
0x178d   :  { %v727_v18 = vpop.permute.xlu1 %726  ;;  %1820 = vmatprep.mubr.bf16.mxu1 %v4168_v0 }
0x178e   :  { %730 = vst.msk [vmem:[#allocation3 + $0x30] sm:$0xff] %vm565_vm11, %v727_v18  ;;  %v1687_v44 = vld [vmem:[#allocation3 + $0x20] sm:$0xff] }
0x178f   :  { %1521 = vst.msk [vmem:[#allocation3 + $0x30] sm:$0xff] %vm280_vm10, %v1519_v43 }
0x1791   :  { %v1675_v21 = vpop.permute.xlu1 %1674  ;;  %v1688_v23 = vld [vmem:[#allocation3 + $0x28] sm:$0xff] }
0x1792   :  { %1677 = vst.msk [vmem:[#allocation3 + $0x38] sm:$0xff] %vm280_vm10, %v1675_v21  ;;  %v1693_v42 = vpack.c.bf16 %v1688_v23, %v1687_v44 }
0x1794   :  { %3350 = vmatmul.mubr.msk.bf16.gmra.mrb[52].mxu1 %vm1755_vm12, %v1693_v42 }
0x1795   :  { %1830 = vmatprep.mubr.bf16.mxu1 %v4168_v0  ;;  %v1703_v0 = vld [vmem:[%s5201_s9] sm:$0x3] }
0x1796   :  { %v1689_v25 = vld [vmem:[#allocation3 + $0x30] sm:$0xff]  ;;  %v1708_v34 = vrot.slane %v1703_v0, %v252_v4  ;;  %v1712_v17 = vrot.slane %v1703_v0, %v256_v6 }
0x1799   :  { %v1690_v27 = vld [vmem:[#allocation3 + $0x38] sm:$0xff] }
0x179a   :  { %v1694_v28 = vpack.c.bf16 %v1690_v27, %v1689_v25 }
0x179c   :  { %3351 = vmatmul.mubr.msk.bf16.gmra.mrb[56].mxu1 %vm1755_vm12, %v1694_v28 }
0x179d   :  { %3716 = vmatprep.mubr.msk.bf16.mxu1 %vm4170_vm9, %v4169_v20 }
0x17e6   :  { %v1966_v33 = vpop.f32.mrb[48].mxu0 }
0x17e7   :  { %v3686_v35 = vpop.f32.mrb[49].mxu0 }
0x17e8   :  { %v1969_v37 = vpop.f32.mrb[50].mxu0 }
0x17e9   :  { %v3687_v39 = vpop.f32.mrb[51].mxu0 }
0x1857   :  { %v1802_v41 = vpop.f32.mrb[44].mxu1 }
0x1858   :  { %v1803_v46 = vadd.f32 %v1802_v41, %v1708_v34  ;;  %v1804_v30 = vpop.f32.mrb[45].mxu1 }
0x1859   :  { %v4816_v47 = vadd.f32 %v1804_v30, %v1712_v17  ;;  %v1806_v24 = vpop.f32.mrb[46].mxu1 }
0x185a   :  { %v1918_v1 = vadd.f32 %v1912_v45, %v1803_v46  ;;  %v4818_v22 = vadd.f32 %v1806_v24, %v1708_v34  ;;  %v1808_v11 = vpop.f32.mrb[47].mxu1 }
0x185b   :  { %v4820_v61 = vadd.f32 %v1808_v11, %v1712_v17 }
0x185c   :  { %4037 = vtanh.f32 %v1918_v1  ;;  %v3356_v5 = vmul.f32 -1.442695, %v1918_v1 }
0x185f   :  { %v1812_v13 = vpop.f32.mrb[48].mxu1 }
0x1860   :  { %v4822_v9 = vadd.f32 %v1812_v13, %v1708_v34  ;;  %v1814_v4 = vpop.f32.mrb[49].mxu1 }
0x1861   :  { %v4824_v48 = vadd.f32 %v1814_v4, %v1712_v17  ;;  %v1816_v3 = vpop.f32.mrb[50].mxu1 }
0x1862   :  { %v4826_v6 = vadd.f32 %v1816_v3, %v1708_v34  ;;  %v1818_v55 = vpop.f32.mrb[51].mxu1 }
0x1863   :  { %v4828_v16 = vadd.f32 %v1818_v55, %v1712_v17 }
0x1866   :  { %v4038_v26 = vpop.eup %4037 }
0x1867   :  { %v1822_v14 = vpop.f32.mrb[52].mxu1  ;;  %1982 = vrot.lane.b32.xlu0 %v4038_v26, %s4171_s5 }
0x1868   :  { %v4831_v50 = vadd.f32 %v1822_v14, %v1708_v34  ;;  %v1824_v51 = vpop.f32.mrb[53].mxu1 }
0x1869   :  { %v4833_v52 = vadd.f32 %v1824_v51, %v1712_v17  ;;  %v1826_v32 = vpop.f32.mrb[54].mxu1 }
0x186a   :  { %v4835_v36 = vadd.f32 %v1826_v32, %v1708_v34  ;;  %v1828_v58 = vpop.f32.mrb[55].mxu1 }
0x186b   :  { %v4837_v10 = vadd.f32 %v1828_v58, %v1712_v17 }
0x186f   :  { %v1832_v56 = vpop.f32.mrb[56].mxu1 }
0x1870   :  { %v4839_v53 = vadd.f32 %v1832_v56, %v1708_v34  ;;  %v1834_v15 = vpop.f32.mrb[57].mxu1 }
0x1871   :  { %v4841_v54 = vadd.f32 %v1834_v15, %v1712_v17  ;;  %v1836_v59 = vpop.f32.mrb[58].mxu1 }
0x1872   :  { %v4843_v62 = vadd.f32 %v1836_v59, %v1708_v34  ;;  %v1838_v57 = vpop.f32.mrb[59].mxu1 }
0x1873   :  { %v1839_v7 = vadd.f32 %v1838_v57, %v1712_v17 }
0x1875   :  { %v1972_v60 = vadd.f32 %v1966_v33, %v1839_v7 }
0x1877   :  { %4039 = vtanh.f32 %v1972_v60  ;;  %v3357_v18 = vmul.f32 -1.442695, %v1972_v60 }
0x1878   :  { %4041 = vpow2.f32 %v3356_v5 }
0x1881   :  { %v4040_v63 = vpop.eup %4039 }
0x1882   :  { %2006 = vrot.lane.b32.xlu1 %v4040_v63, %s4171_s5  ;;  %v4042_v29 = vpop.eup %4041 }
0x1883   :  { %v1976_v8 = vadd.f32 1.0, %v4042_v29 }
0x1885   :  { %4043 = vrcp.f32 %v1976_v8 }
0x1886   :  { %4045 = vpow2.f32 %v3357_v18 }
0x188f   :  { %v4044_v43 = vpop.eup %4043 }
0x1890   :  { %v4046_v23 = vpop.eup %4045  ;;  %v1980_v45 = vmul.f32 0.0, %v4044_v43 }
0x1891   :  { %v2000_v42 = vadd.f32 1.0, %v4046_v23 }
0x1893   :  { %4047 = vrcp.f32 %v2000_v42 }
0x189d   :  { %v4048_v25 = vpop.eup %4047 }
0x189e   :  { %v2004_v33 = vmul.f32 0.0, %v4048_v25 }
0x18d9   :  { %v1983_v21 = vpop.permute.xlu0 %1982 }
0x18da   :  { %v1985_v44 = vmul.f32 %v4044_v43, %v1983_v21 }
0x18dc   :  { %1987 = vrot.lane.b32.xlu0 %v1985_v44, %s4172_s18 }
0x18f4   :  { %v2007_v27 = vpop.permute.xlu1 %2006 }
0x18f5   :  { %v2009_v28 = vmul.f32 %v4048_v25, %v2007_v27 }
0x18f7   :  { %2011 = vrot.lane.b32.xlu1 %v2009_v28, %s4172_s18 }
0x194e   :  { %v1988_v31 = vpop.permute.xlu0 %1987 }
0x194f   :  { %v4848_v12 = vadd.f32 %v1988_v31, %v1980_v45 }
0x1951   :  { %4049 = vtanh.f32 %v4848_v12 }
0x195b   :  { %v4050_v38 = vpop.eup %4049 }
0x195c   :  { %1993 = vrot.lane.b32.xlu0 %v4050_v38, %s4171_s5 }
0x1969   :  { %v2012_v35 = vpop.permute.xlu1 %2011 }
0x196a   :  { %v4852_v37 = vadd.f32 %v2012_v35, %v2004_v33 }
0x196c   :  { %4051 = vtanh.f32 %v4852_v37 }
0x1976   :  { %v4052_v39 = vpop.eup %4051 }
0x1977   :  { %2017 = vrot.lane.b32.xlu1 %v4052_v39, %s4171_s5 }
0x19ce   :  { %v1994_v0 = vpop.permute.xlu0 %1993 }
0x19cf   :  { %v4856_v34 = vmul.f32 %v4044_v43, %v1994_v0 }
0x19d1   :  { %v2030_v17 = vpack.c.bf16 %v4856_v34, %v4856_v34 }
0x19d3   :  { %2032 = vrot.lane.b32.xlu0 %v2030_v17, %s4172_s18 }
0x19e9   :  { %v2018_v41 = vpop.permute.xlu1 %2017 }
0x19ea   :  { %v2020_v46 = vmul.f32 %v4048_v25, %v2018_v41 }
0x19ec   :  { %v2079_v30 = vpack.c.bf16 %v2020_v46, %v2020_v46  ;;  %2028 = vst.msk [vmem:[#allocation3 + $0x38] sm:$0xff] %vm2027_vm13, %v2020_v46 }
0x19ee   :  { %2081 = vrot.lane.b32.xlu1 %v2079_v30, %s4172_s18 }
0x1a45   :  { %v2033_v24 = vpop.permute.xlu0 %2032 }
0x1a46   :  { %3693 = vmatmul.mubr.msk.bf16.vlgmr.msra.gmra.mrb[52].mxu0 %vm280_vm10, %v2033_v24 }
0x1a47   :  { %3697 = vmatpush3.bf16.msra.mxu0 %v4760_v40  ;;  %3700 = vmatprep.mubr.msk.bf16.mxu0 %vm4170_vm9, %v4169_v20 }
0x1a48   :  { %3698 = vmatprep.subr.bf16.mxu0 %v4169_v20 }
0x1a4b   :  { %3699 = vmatpush3.bf16.msra.mxu0 %v4772_v2 }
0x1a4c   :  { %3704 = vmatprep.subr.bf16.mxu0 %v4169_v20 }
0x1a60   :  { %v2082_v1 = vpop.permute.xlu1 %2081 }
0x1a61   :  { %3701 = vmatmul.mubr.msk.bf16.vlgmr.msra.gmra.mrb[56].mxu0 %vm280_vm10, %v2082_v1 }
0x1a62   :  { %3705 = vmatpush3.bf16.msra.mxu0 %v4726_v19  ;;  %3708 = vmatprep.mubr.msk.bf16.mxu0 %vm4170_vm9, %v4169_v20 }
0x1a63   :  { %3706 = vmatprep.subr.bf16.mxu0 %v4169_v20 }
0x1a66   :  { %3707 = vmatpush3.bf16.msra.mxu0 %v4736_v49 }
0x1a67   :  { %3720 = vmatprep.subr.bf16.mxu0 %v4169_v20 }
0x1b19   :  { %v2071_v11 = vpop.f32.mrb[52].mxu0 }
0x1b1a   :  { %v2077_v13 = vadd.f32 %v2071_v11, %v4818_v22  ;;  %v3694_v4 = vpop.f32.mrb[53].mxu0 }
0x1b1b   :  { %v2074_v3 = vpop.f32.mrb[54].mxu0 }
0x1b1c   :  { %4053 = vtanh.f32 %v2077_v13  ;;  %v3695_v55 = vpop.f32.mrb[55].mxu0  ;;  %v3360_v59 = vmul.f32 -1.442695, %v2077_v13 }
0x1b26   :  { %v4054_v26 = vpop.eup %4053 }
0x1b27   :  { %2136 = vrot.lane.b32.xlu0 %v4054_v26, %s4171_s5 }
0x1b34   :  { %v2120_v14 = vpop.f32.mrb[56].mxu0 }
0x1b35   :  { %v2126_v51 = vadd.f32 %v2120_v14, %v4841_v54  ;;  %v3702_v32 = vpop.f32.mrb[57].mxu0 }
0x1b36   :  { %v2123_v58 = vpop.f32.mrb[58].mxu0 }
0x1b37   :  { %4055 = vtanh.f32 %v2126_v51  ;;  %v3703_v56 = vpop.f32.mrb[59].mxu0  ;;  %v3361_v7 = vmul.f32 -1.442695, %v2126_v51 }
0x1b38   :  { %4057 = vpow2.f32 %v3360_v59 }
0x1b41   :  { %v4056_v15 = vpop.eup %4055 }
0x1b42   :  { %2160 = vrot.lane.b32.xlu1 %v4056_v15, %s4171_s5  ;;  %v4058_v22 = vpop.eup %4057 }
0x1b43   :  { %v2130_v57 = vadd.f32 1.0, %v4058_v22 }
0x1b45   :  { %4059 = vrcp.f32 %v2130_v57 }
0x1b46   :  { %4061 = vpow2.f32 %v3361_v7 }
0x1b4f   :  { %v4060_v60 = vpop.eup %4059 }
0x1b50   :  { %v4062_v54 = vpop.eup %4061  ;;  %v2134_v21 = vmul.f32 %v4060_v60, %v4848_v12 }
0x1b51   :  { %v2154_v29 = vadd.f32 1.0, %v4062_v54 }
0x1b53   :  { %4063 = vrcp.f32 %v2154_v29 }
0x1b5d   :  { %v4064_v8 = vpop.eup %4063 }
0x1b5e   :  { %v2158_v25 = vmul.f32 %v4064_v8, %v4852_v37 }
0x1b99   :  { %v2137_v63 = vpop.permute.xlu0 %2136 }
0x1b9a   :  { %v2139_v5 = vmul.f32 %v4060_v60, %v2137_v63 }
0x1b9c   :  { %2141 = vrot.lane.b32.xlu0 %v2139_v5, %s4172_s18 }
0x1bb4   :  { %v2161_v18 = vpop.permute.xlu1 %2160 }
0x1bb5   :  { %v2163_v43 = vmul.f32 %v4064_v8, %v2161_v18 }
0x1bb7   :  { %2165 = vrot.lane.b32.xlu1 %v2163_v43, %s4172_s18 }
0x1c0e   :  { %v2142_v44 = vpop.permute.xlu0 %2141 }
0x1c0f   :  { %v4884_v23 = vadd.f32 %v2142_v44, %v2134_v21 }
0x1c11   :  { %4065 = vtanh.f32 %v4884_v23 }
0x1c1b   :  { %v4066_v42 = vpop.eup %4065 }
0x1c1c   :  { %2147 = vrot.lane.b32.xlu0 %v4066_v42, %s4171_s5 }
0x1c29   :  { %v2166_v27 = vpop.permute.xlu1 %2165 }
0x1c2a   :  { %v4889_v28 = vadd.f32 %v2166_v27, %v2158_v25 }
0x1c2c   :  { %4067 = vtanh.f32 %v4889_v28 }
0x1c36   :  { %v4068_v45 = vpop.eup %4067 }
0x1c37   :  { %2171 = vrot.lane.b32.xlu1 %v4068_v45, %s4171_s5 }
0x1c8e   :  { %v2148_v31 = vpop.permute.xlu0 %2147 }
0x1c8f   :  { %v4893_v12 = vmul.f32 %v4060_v60, %v2148_v31 }
0x1c91   :  { %v2182_v38 = vpack.c.bf16 %v4893_v12, %v4893_v12 }
0x1c93   :  { %2184 = vrot.lane.b32.xlu0 %v2182_v38, %s4172_s18 }
0x1ca9   :  { %v2172_v33 = vpop.permute.xlu1 %2171 }
0x1caa   :  { %v2174_v35 = vmul.f32 %v4064_v8, %v2172_v33 }
0x1cac   :  { %v2231_v39 = vpack.c.bf16 %v2174_v35, %v2174_v35  ;;  %2180 = vst.msk [vmem:[#allocation3 + $0x30] sm:$0xff] %vm2027_vm13, %v2174_v35 }
0x1cae   :  { %2233 = vrot.lane.b32.xlu1 %v2231_v39, %s4172_s18 }
0x1d05   :  { %v2185_v37 = vpop.permute.xlu0 %2184 }
0x1d06   :  { %3709 = vmatmul.mubr.msk.bf16.vlgmr.msra.gmra.mrb[60].mxu0 %vm280_vm10, %v2185_v37 }
0x1d07   :  { %3721 = vmatpush3.bf16.msra.mxu0 %v4726_v19  ;;  %3724 = vmatprep.mubr.msk.bf16.mxu0 %vm4170_vm9, %v4169_v20 }
0x1d08   :  { %3722 = vmatprep.subr.bf16.mxu0 %v4169_v20 }
0x1d0b   :  { %3723 = vmatpush3.bf16.msra.mxu0 %v4736_v49 }
0x1d0c   :  { %3736 = vmatprep.subr.bf16.mxu0 %v4169_v20 }
0x1d20   :  { %v2234_v0 = vpop.permute.xlu1 %2233 }
0x1d21   :  { %3717 = vmatmul.mubr.msk.bf16.vlgmr.msra.gmra.mrb[60].mxu1 %vm280_vm10, %v2234_v0 }
0x1d22   :  { %3729 = vmatpush3.bf16.msra.mxu1 %v4760_v40  ;;  %3732 = vmatprep.mubr.msk.bf16.mxu1 %vm4170_vm9, %v4169_v20 }
0x1d23   :  { %3730 = vmatprep.subr.bf16.mxu1 %v4169_v20 }
0x1d26   :  { %3731 = vmatpush3.bf16.msra.mxu1 %v4772_v2 }
0x1d27   :  { %3744 = vmatprep.subr.bf16.mxu1 %v4169_v20 }
0x1dd9   :  { %v2223_v17 = vpop.f32.mrb[60].mxu0 }
0x1dda   :  { %v2229_v41 = vadd.f32 %v2223_v17, %v4822_v9  ;;  %v3710_v46 = vpop.f32.mrb[61].mxu0 }
0x1ddb   :  { %v2226_v30 = vpop.f32.mrb[62].mxu0 }
0x1ddc   :  { %4069 = vtanh.f32 %v2229_v41  ;;  %v3711_v24 = vpop.f32.mrb[63].mxu0  ;;  %v3364_v14 = vmul.f32 -1.442695, %v2229_v41 }
0x1de6   :  { %v4070_v1 = vpop.eup %4069 }
0x1de7   :  { %2288 = vrot.lane.b32.xlu0 %v4070_v1, %s4171_s5 }
0x1df4   :  { %v2272_v11 = vpop.f32.mrb[60].mxu1 }
0x1df5   :  { %v2278_v13 = vadd.f32 %v2272_v11, %v4837_v10  ;;  %v3718_v4 = vpop.f32.mrb[61].mxu1 }
0x1df6   :  { %v2275_v3 = vpop.f32.mrb[62].mxu1 }
0x1df7   :  { %4071 = vtanh.f32 %v2278_v13  ;;  %v3719_v55 = vpop.f32.mrb[63].mxu1  ;;  %v3365_v32 = vmul.f32 -1.442695, %v2278_v13 }
0x1df8   :  { %4073 = vpow2.f32 %v3364_v14 }
0x1e01   :  { %v4072_v26 = vpop.eup %4071 }
0x1e02   :  { %2312 = vrot.lane.b32.xlu1 %v4072_v26, %s4171_s5  ;;  %v4074_v9 = vpop.eup %4073 }
0x1e03   :  { %v2282_v51 = vadd.f32 1.0, %v4074_v9 }
0x1e05   :  { %4075 = vrcp.f32 %v2282_v51 }
0x1e06   :  { %4077 = vpow2.f32 %v3365_v32 }
0x1e0f   :  { %v4076_v58 = vpop.eup %4075 }
0x1e10   :  { %v4078_v10 = vpop.eup %4077  ;;  %v2286_v60 = vmul.f32 %v4076_v58, %v4884_v23 }
0x1e11   :  { %v2306_v59 = vadd.f32 1.0, %v4078_v10 }
0x1e13   :  { %4079 = vrcp.f32 %v2306_v59 }
0x1e1d   :  { %v4080_v22 = vpop.eup %4079 }
0x1e1e   :  { %v2310_v29 = vmul.f32 %v4080_v22, %v4889_v28 }
0x1e59   :  { %v2289_v56 = vpop.permute.xlu0 %2288 }
0x1e5a   :  { %v2291_v15 = vmul.f32 %v4076_v58, %v2289_v56 }
0x1e5c   :  { %2293 = vrot.lane.b32.xlu0 %v2291_v15, %s4172_s18 }
0x1e74   :  { %v2313_v57 = vpop.permute.xlu1 %2312 }
0x1e75   :  { %v2315_v7 = vmul.f32 %v4080_v22, %v2313_v57 }
0x1e77   :  { %2317 = vrot.lane.b32.xlu1 %v2315_v7, %s4172_s18 }
0x1ece   :  { %v2294_v63 = vpop.permute.xlu0 %2293 }
0x1ecf   :  { %v4921_v5 = vadd.f32 %v2294_v63, %v2286_v60 }
0x1ed1   :  { %4081 = vtanh.f32 %v4921_v5 }
0x1edb   :  { %v4082_v54 = vpop.eup %4081 }
0x1edc   :  { %2299 = vrot.lane.b32.xlu0 %v4082_v54, %s4171_s5 }
0x1ee9   :  { %v2318_v8 = vpop.permute.xlu1 %2317 }
0x1eea   :  { %v4926_v18 = vadd.f32 %v2318_v8, %v2310_v29 }
0x1eec   :  { %4083 = vtanh.f32 %v4926_v18 }
0x1ef6   :  { %v4084_v43 = vpop.eup %4083 }
0x1ef7   :  { %2323 = vrot.lane.b32.xlu1 %v4084_v43, %s4171_s5 }
0x1f4e   :  { %v2300_v21 = vpop.permute.xlu0 %2299 }
0x1f4f   :  { %v4930_v44 = vmul.f32 %v4076_v58, %v2300_v21 }
0x1f51   :  { %v2334_v23 = vpack.c.bf16 %v4930_v44, %v4930_v44 }
0x1f53   :  { %2336 = vrot.lane.b32.xlu0 %v2334_v23, %s4172_s18 }
0x1f69   :  { %v2324_v42 = vpop.permute.xlu1 %2323 }
0x1f6a   :  { %v2326_v25 = vmul.f32 %v4080_v22, %v2324_v42 }
0x1f6c   :  { %v2383_v27 = vpack.c.bf16 %v2326_v25, %v2326_v25  ;;  %2332 = vst.msk [vmem:[#allocation3 + $0x28] sm:$0xff] %vm2027_vm13, %v2326_v25 }
0x1f6e   :  { %2385 = vrot.lane.b32.xlu1 %v2383_v27, %s4172_s18 }
0x1fc5   :  { %v2337_v28 = vpop.permute.xlu0 %2336 }
0x1fc6   :  { %3725 = vmatmul.mubr.msk.bf16.vlgmr.msra.gmra.mrb[64].mxu0 %vm280_vm10, %v2337_v28 }
0x1fc7   :  { %3737 = vmatpush3.bf16.msra.mxu0 %v4726_v19  ;;  %3740 = vmatprep.mubr.msk.bf16.mxu0 %vm4170_vm9, %v4169_v20 }
0x1fc8   :  { %3738 = vmatprep.subr.bf16.mxu0 %v4169_v20 }
0x1fcb   :  { %3739 = vmatpush3.bf16.msra.mxu0 %v4736_v49 }
0x1fcc   :  { %3752 = vmatprep.subr.bf16.mxu0 %v4169_v20 }
0x1fe0   :  { %v2386_v45 = vpop.permute.xlu1 %2385 }
0x1fe1   :  { %3733 = vmatmul.mubr.msk.bf16.vlgmr.msra.gmra.mrb[64].mxu1 %vm280_vm10, %v2386_v45 }
0x1fe2   :  { %3745 = vmatpush3.bf16.msra.mxu1 %v4760_v40  ;;  %3748 = vmatprep.mubr.msk.bf16.mxu1 %vm4170_vm9, %v4169_v20 }
0x1fe3   :  { %3746 = vmatprep.subr.bf16.mxu1 %v4169_v20 }
0x1fe6   :  { %3747 = vmatpush3.bf16.msra.mxu1 %v4772_v2 }
0x1fe7   :  { %3760 = vmatprep.subr.bf16.mxu1 %v4169_v20 }
0x2099   :  { %v2375_v31 = vpop.f32.mrb[64].mxu0 }
0x209a   :  { %v2381_v38 = vadd.f32 %v2375_v31, %v4826_v6  ;;  %v3726_v33 = vpop.f32.mrb[65].mxu0 }
0x209b   :  { %v2378_v35 = vpop.f32.mrb[66].mxu0 }
0x209c   :  { %4085 = vtanh.f32 %v2381_v38  ;;  %v3727_v39 = vpop.f32.mrb[67].mxu0  ;;  %v3368_v1 = vmul.f32 -1.442695, %v2381_v38 }
0x20a6   :  { %v4086_v37 = vpop.eup %4085 }
0x20a7   :  { %2440 = vrot.lane.b32.xlu0 %v4086_v37, %s4171_s5 }
0x20b4   :  { %v2424_v0 = vpop.f32.mrb[64].mxu1 }
0x20b5   :  { %v2430_v17 = vadd.f32 %v2424_v0, %v4833_v52  ;;  %v3734_v41 = vpop.f32.mrb[65].mxu1 }
0x20b6   :  { %v2427_v46 = vpop.f32.mrb[66].mxu1 }
0x20b7   :  { %4087 = vtanh.f32 %v2430_v17  ;;  %v3735_v30 = vpop.f32.mrb[67].mxu1  ;;  %v3369_v13 = vmul.f32 -1.442695, %v2430_v17 }
0x20b8   :  { %4089 = vpow2.f32 %v3368_v1 }
0x20c1   :  { %v4088_v24 = vpop.eup %4087 }
0x20c2   :  { %2464 = vrot.lane.b32.xlu1 %v4088_v24, %s4171_s5  ;;  %v4090_v6 = vpop.eup %4089 }
0x20c3   :  { %v2434_v11 = vadd.f32 1.0, %v4090_v6 }
0x20c5   :  { %4091 = vrcp.f32 %v2434_v11 }
0x20c6   :  { %4093 = vpow2.f32 %v3369_v13 }
0x20cf   :  { %v4092_v4 = vpop.eup %4091 }
0x20d0   :  { %v4094_v52 = vpop.eup %4093  ;;  %v2438_v32 = vmul.f32 %v4092_v4, %v4921_v5 }
0x20d1   :  { %v2458_v26 = vadd.f32 1.0, %v4094_v52 }
0x20d3   :  { %4095 = vrcp.f32 %v2458_v26 }
0x20dd   :  { %v4096_v14 = vpop.eup %4095 }
0x20de   :  { %v2462_v10 = vmul.f32 %v4096_v14, %v4926_v18 }
0x2119   :  { %v2441_v3 = vpop.permute.xlu0 %2440 }
0x211a   :  { %v2443_v55 = vmul.f32 %v4092_v4, %v2441_v3 }
0x211c   :  { %2445 = vrot.lane.b32.xlu0 %v2443_v55, %s4172_s18 }
0x2134   :  { %v2465_v9 = vpop.permute.xlu1 %2464 }
0x2135   :  { %v2467_v51 = vmul.f32 %v4096_v14, %v2465_v9 }
0x2137   :  { %2469 = vrot.lane.b32.xlu1 %v2467_v51, %s4172_s18 }
0x218e   :  { %v2446_v58 = vpop.permute.xlu0 %2445 }
0x218f   :  { %v4958_v56 = vadd.f32 %v2446_v58, %v2438_v32 }
0x2191   :  { %4097 = vtanh.f32 %v4958_v56 }
0x219b   :  { %v4098_v15 = vpop.eup %4097 }
0x219c   :  { %2451 = vrot.lane.b32.xlu0 %v4098_v15, %s4171_s5 }
0x21a9   :  { %v2470_v59 = vpop.permute.xlu1 %2469 }
0x21aa   :  { %v4963_v22 = vadd.f32 %v2470_v59, %v2462_v10 }
0x21ac   :  { %4099 = vtanh.f32 %v4963_v22 }
0x21b6   :  { %v4100_v57 = vpop.eup %4099 }
0x21b7   :  { %2475 = vrot.lane.b32.xlu1 %v4100_v57, %s4171_s5 }
0x220e   :  { %v2452_v7 = vpop.permute.xlu0 %2451 }
0x220f   :  { %v4967_v60 = vmul.f32 %v4092_v4, %v2452_v7 }
0x2211   :  { %v2486_v63 = vpack.c.bf16 %v4967_v60, %v4967_v60 }
0x2213   :  { %2488 = vrot.lane.b32.xlu0 %v2486_v63, %s4172_s18 }
0x2229   :  { %v2476_v5 = vpop.permute.xlu1 %2475 }
0x222a   :  { %v2478_v54 = vmul.f32 %v4096_v14, %v2476_v5 }
0x222c   :  { %v2535_v29 = vpack.c.bf16 %v2478_v54, %v2478_v54  ;;  %2484 = vst.msk [vmem:[#allocation3 + $0x20] sm:$0xff] %vm2027_vm13, %v2478_v54 }
0x222e   :  { %2537 = vrot.lane.b32.xlu1 %v2535_v29, %s4172_s18 }
0x2285   :  { %v2489_v8 = vpop.permute.xlu0 %2488 }
0x2286   :  { %3741 = vmatmul.mubr.msk.bf16.vlgmr.msra.gmra.mrb[68].mxu0 %vm280_vm10, %v2489_v8 }
0x2287   :  { %3753 = vmatpush3.bf16.msra.mxu0 %v4726_v19  ;;  %3756 = vmatprep.mubr.msk.bf16.mxu0 %vm4170_vm9, %v4169_v20 }
0x2288   :  { %3754 = vmatprep.subr.bf16.mxu0 %v4169_v20 }
0x228b   :  { %3755 = vmatpush3.bf16.msra.mxu0 %v4736_v49 }
0x228c   :  { %3768 = vmatprep.subr.bf16.mxu0 %v4169_v20 }
0x22a0   :  { %v2538_v18 = vpop.permute.xlu1 %2537 }
0x22a1   :  { %3749 = vmatmul.mubr.msk.bf16.vlgmr.msra.gmra.mrb[68].mxu1 %vm280_vm10, %v2538_v18 }
0x22a2   :  { %3761 = vmatpush3.bf16.msra.mxu1 %v4760_v40  ;;  %3764 = vmatprep.mubr.msk.bf16.mxu1 %vm4170_vm9, %v4169_v20 }
0x22a3   :  { %3762 = vmatprep.subr.bf16.mxu1 %v4169_v20 }
0x22a6   :  { %3763 = vmatpush3.bf16.msra.mxu1 %v4772_v2 }
0x22a7   :  { %3776 = vmatprep.subr.bf16.mxu1 %v4169_v20 }
0x2359   :  { %v2527_v43 = vpop.f32.mrb[68].mxu0 }
0x235a   :  { %v2533_v21 = vadd.f32 %v2527_v43, %v4831_v50  ;;  %v3742_v23 = vpop.f32.mrb[69].mxu0 }
0x235b   :  { %v2530_v42 = vpop.f32.mrb[70].mxu0 }
0x235c   :  { %4101 = vtanh.f32 %v2533_v21  ;;  %v3743_v25 = vpop.f32.mrb[71].mxu0  ;;  %v3372_v39 = vmul.f32 -1.442695, %v2533_v21 }
0x2366   :  { %v4102_v27 = vpop.eup %4101 }
0x2367   :  { %2592 = vrot.lane.b32.xlu0 %v4102_v27, %s4171_s5 }
0x2374   :  { %v2576_v28 = vpop.f32.mrb[68].mxu1 }
0x2375   :  { %v2582_v45 = vadd.f32 %v2576_v28, %v4828_v16  ;;  %v3750_v31 = vpop.f32.mrb[69].mxu1 }
0x2376   :  { %v2579_v38 = vpop.f32.mrb[70].mxu1 }
0x2377   :  { %4103 = vtanh.f32 %v2582_v45  ;;  %v3751_v33 = vpop.f32.mrb[71].mxu1  ;;  %v3373_v0 = vmul.f32 -1.442695, %v2582_v45 }
0x2378   :  { %4105 = vpow2.f32 %v3372_v39 }
0x2381   :  { %v4104_v35 = vpop.eup %4103 }
0x2382   :  { %2616 = vrot.lane.b32.xlu1 %v4104_v35, %s4171_s5  ;;  %v4106_v50 = vpop.eup %4105 }
0x2383   :  { %v2586_v37 = vadd.f32 1.0, %v4106_v50 }
0x2385   :  { %4107 = vrcp.f32 %v2586_v37 }
0x2386   :  { %4109 = vpow2.f32 %v3373_v0 }
0x238f   :  { %v4108_v17 = vpop.eup %4107 }
0x2390   :  { %v4110_v16 = vpop.eup %4109  ;;  %v2590_v11 = vmul.f32 %v4108_v17, %v4958_v56 }
0x2391   :  { %v2610_v30 = vadd.f32 1.0, %v4110_v16 }
0x2393   :  { %4111 = vrcp.f32 %v2610_v30 }
0x239d   :  { %v4112_v24 = vpop.eup %4111 }
0x239e   :  { %v2614_v55 = vmul.f32 %v4112_v24, %v4963_v22 }
0x23d9   :  { %v2593_v41 = vpop.permute.xlu0 %2592 }
0x23da   :  { %v2595_v46 = vmul.f32 %v4108_v17, %v2593_v41 }
0x23dc   :  { %2597 = vrot.lane.b32.xlu0 %v2595_v46, %s4172_s18 }
0x23f4   :  { %v2617_v1 = vpop.permute.xlu1 %2616 }
0x23f5   :  { %v2619_v6 = vmul.f32 %v4112_v24, %v2617_v1 }
0x23f7   :  { %2621 = vrot.lane.b32.xlu1 %v2619_v6, %s4172_s18 }
0x244e   :  { %v2598_v13 = vpop.permute.xlu0 %2597 }
0x244f   :  { %v4995_v4 = vadd.f32 %v2598_v13, %v2590_v11 }
0x2451   :  { %4113 = vtanh.f32 %v4995_v4 }
0x245b   :  { %v4114_v3 = vpop.eup %4113 }
0x245c   :  { %2603 = vrot.lane.b32.xlu0 %v4114_v3, %s4171_s5  ;;  %v4167_v3 = vld [vmem:[%s5199_s7 + $0x8] sm:$0xff]  }
0x2469   :  { %v2622_v52 = vpop.permute.xlu1 %2621 }
0x246a   :  { %v5000_v26 = vadd.f32 %v2622_v52, %v2614_v55 }
0x246c   :  { %4115 = vtanh.f32 %v5000_v26 }
0x2476   :  { %v4116_v14 = vpop.eup %4115 }
0x2477   :  { %2627 = vrot.lane.b32.xlu1 %v4116_v14, %s4171_s5 }
0x24ce   :  { %v2604_v9 = vpop.permute.xlu0 %2603 }
0x24cf   :  { %v5004_v51 = vmul.f32 %v4108_v17, %v2604_v9 }
0x24d1   :  { %v2638_v32 = vpack.c.bf16 %v5004_v51, %v5004_v51 }
0x24d3   :  { %2640 = vrot.lane.b32.xlu0 %v2638_v32, %s4172_s18 }
0x24e9   :  { %v2628_v58 = vpop.permute.xlu1 %2627 }
0x24ea   :  { %v5009_v56 = vmul.f32 %v4112_v24, %v2628_v58 }
0x24ec   :  { %v2687_v15 = vpack.c.bf16 %v5009_v56, %v5009_v56 }
0x24ee   :  { %2689 = vrot.lane.b32.xlu1 %v2687_v15, %s4172_s18 }
0x2545   :  { %v2641_v10 = vpop.permute.xlu0 %2640 }
0x2546   :  { %3757 = vmatmul.mubr.msk.bf16.vlgmr.msra.gmra.mrb[72].mxu0 %vm280_vm10, %v2641_v10 }
0x2547   :  { %3769 = vmatpush3.bf16.msra.mxu0 %v4726_v19  ;;  %3772 = vmatprep.mubr.msk.bf16.mxu0 %vm4170_vm9, %v4169_v20 }
0x2548   :  { %3770 = vmatprep.subr.bf16.mxu0 %v4169_v20 }
0x254b   :  { %3771 = vmatpush3.bf16.msra.mxu0 %v4736_v49 }
0x254c   :  { %3784 = vmatprep.subr.bf16.mxu0 %v4169_v20 }
0x2560   :  { %v2690_v59 = vpop.permute.xlu1 %2689 }
0x2561   :  { %3765 = vmatmul.mubr.msk.bf16.vlgmr.msra.gmra.mrb[72].mxu1 %vm280_vm10, %v2690_v59 }
0x2562   :  { %3777 = vmatpush3.bf16.msra.mxu1 %v4760_v40  ;;  %3780 = vmatprep.mubr.msk.bf16.mxu1 %vm4170_vm9, %v4169_v20 }
0x2563   :  { %3778 = vmatprep.subr.bf16.mxu1 %v4169_v20 }
0x2566   :  { %3779 = vmatpush3.bf16.msra.mxu1 %v4772_v2 }
0x2567   :  { %3792 = vmatprep.subr.bf16.mxu1 %v4169_v20 }
0x2619   :  { %v2679_v19 = vpop.f32.mrb[72].mxu0 }
0x261a   :  { %v2685_v22 = vadd.f32 %v2679_v19, %v4835_v36  ;;  %v3758_v49 = vpop.f32.mrb[73].mxu0 }
0x261b   :  { %v2682_v57 = vpop.f32.mrb[74].mxu0 }
0x261c   :  { %4117 = vtanh.f32 %v2685_v22  ;;  %v3759_v7 = vpop.f32.mrb[75].mxu0  ;;  %v3376_v21 = vmul.f32 -1.442695, %v2685_v22 }
0x2626   :  { %v4118_v63 = vpop.eup %4117 }
0x2627   :  { %2744 = vrot.lane.b32.xlu0 %v4118_v63, %s4171_s5 }
0x2634   :  { %v2728_v5 = vpop.f32.mrb[72].mxu1 }
0x2635   :  { %v2734_v54 = vadd.f32 %v2728_v5, %v4824_v48  ;;  %v3766_v29 = vpop.f32.mrb[73].mxu1 }
0x2636   :  { %v2731_v8 = vpop.f32.mrb[74].mxu1 }
0x2637   :  { %4119 = vtanh.f32 %v2734_v54  ;;  %v3767_v18 = vpop.f32.mrb[75].mxu1  ;;  %v3377_v42 = vmul.f32 -1.442695, %v2734_v54 }
0x2638   :  { %4121 = vpow2.f32 %v3376_v21 }
0x2641   :  { %v4120_v43 = vpop.eup %4119 }
0x2642   :  { %2768 = vrot.lane.b32.xlu1 %v4120_v43, %s4171_s5  ;;  %v4122_v36 = vpop.eup %4121 }
0x2643   :  { %v2738_v23 = vadd.f32 1.0, %v4122_v36 }
0x2645   :  { %4123 = vrcp.f32 %v2738_v23 }
0x2646   :  { %4125 = vpow2.f32 %v3377_v42 }
0x264f   :  { %v4124_v25 = vpop.eup %4123 }
0x2650   :  { %v4126_v48 = vpop.eup %4125  ;;  %v2742_v35 = vmul.f32 %v4124_v25, %v4995_v4  ;;  %v4166_v4 = vld [vmem:[%s5199_s7] sm:$0xff]   ;;  %s4173_s7 = smov 96  }
0x2651   :  { %v2762_v45 = vadd.f32 1.0, %v4126_v48 }
0x2653   :  { %4127 = vrcp.f32 %v2762_v45 }
0x265d   :  { %v4128_v31 = vpop.eup %4127 }
0x265e   :  { %v2766_v0 = vmul.f32 %v4128_v31, %v5000_v26 }
0x2699   :  { %v2745_v27 = vpop.permute.xlu0 %2744 }
0x269a   :  { %v2747_v28 = vmul.f32 %v4124_v25, %v2745_v27 }
0x269c   :  { %2749 = vrot.lane.b32.xlu0 %v2747_v28, %s4172_s18 }
0x26b4   :  { %v2769_v38 = vpop.permute.xlu1 %2768 }
0x26b5   :  { %v2771_v33 = vmul.f32 %v4128_v31, %v2769_v38 }
0x26b7   :  { %2773 = vrot.lane.b32.xlu1 %v2771_v33, %s4172_s18 }
0x270e   :  { %v2750_v39 = vpop.permute.xlu0 %2749 }
0x270f   :  { %v5035_v50 = vadd.f32 %v2750_v39, %v2742_v35 }
0x2711   :  { %4129 = vtanh.f32 %v5035_v50 }
0x271b   :  { %v4130_v37 = vpop.eup %4129 }
0x271c   :  { %2755 = vrot.lane.b32.xlu0 %v4130_v37, %s4171_s5 }
0x2729   :  { %v2774_v17 = vpop.permute.xlu1 %2773 }
0x272a   :  { %v5040_v41 = vadd.f32 %v2774_v17, %v2766_v0 }
0x272c   :  { %4131 = vtanh.f32 %v5040_v41 }
0x2736   :  { %v4132_v46 = vpop.eup %4131 }
0x2737   :  { %2779 = vrot.lane.b32.xlu1 %v4132_v46, %s4171_s5 }
0x278e   :  { %v2756_v16 = vpop.permute.xlu0 %2755 }
0x278f   :  { %v5044_v30 = vmul.f32 %v4124_v25, %v2756_v16 }
0x2791   :  { %v2790_v24 = vpack.c.bf16 %v5044_v30, %v5044_v30 }
0x2793   :  { %2792 = vrot.lane.b32.xlu0 %v2790_v24, %s4172_s18 }
0x27a9   :  { %v2780_v1 = vpop.permute.xlu1 %2779 }
0x27aa   :  { %v5049_v6 = vmul.f32 %v4128_v31, %v2780_v1 }
0x27ac   :  { %v2839_v11 = vpack.c.bf16 %v5049_v6, %v5049_v6 }
0x27ae   :  { %2841 = vrot.lane.b32.xlu1 %v2839_v11, %s4172_s18 }
0x2805   :  { %v2793_v13 = vpop.permute.xlu0 %2792 }
0x2806   :  { %3773 = vmatmul.mubr.msk.bf16.vlgmr.msra.gmra.mrb[76].mxu0 %vm280_vm10, %v2793_v13 }
0x2807   :  { %3785 = vmatpush3.bf16.msra.mxu0 %v4166_v4  ;;  %3788 = vmatprep.mubr.msk.bf16.mxu0 %vm4170_vm9, %v4169_v20 }
0x2808   :  { %3786 = vmatprep.subr.bf16.mxu0 %v4169_v20 }
0x280b   :  { %3787 = vmatpush3.bf16.msra.mxu0 %v4167_v3 }
0x2820   :  { %v2842_v55 = vpop.permute.xlu1 %2841 }
0x2821   :  { %3781 = vmatmul.mubr.msk.bf16.vlgmr.msra.gmra.mrb[76].mxu1 %vm280_vm10, %v2842_v55 }
0x2822   :  { %3793 = vmatpush3.bf16.msra.mxu1 %v4760_v40  ;;  %3796 = vmatprep.mubr.msk.bf16.mxu1 %vm4170_vm9, %v4169_v20 }
0x2823   :  { %3794 = vmatprep.subr.bf16.mxu1 %v4169_v20 }
0x2826   :  { %3795 = vmatpush3.bf16.msra.mxu1 %v4772_v2 }
0x28d9   :  { %v2831_v52 = vpop.f32.mrb[76].mxu0 }
0x28da   :  { %v2837_v26 = vadd.f32 %v2831_v52, %v4839_v53  ;;  %v3774_v14 = vpop.f32.mrb[77].mxu0 }
0x28db   :  { %v2834_v9 = vpop.f32.mrb[78].mxu0 }
0x28dc   :  { %4133 = vtanh.f32 %v2837_v26  ;;  %v3775_v32 = vpop.f32.mrb[79].mxu0  ;;  %v3380_v2 = vmul.f32 -1.442695, %v2837_v26 }
0x28e6   :  { %v4134_v58 = vpop.eup %4133 }
0x28e7   :  { %2896 = vrot.lane.b32.xlu0 %v4134_v58, %s4171_s5 }
0x28f4   :  { %v2880_v15 = vpop.f32.mrb[76].mxu1 }
0x28f5   :  { %v2886_v40 = vadd.f32 %v2880_v15, %v4820_v61  ;;  %v3782_v10 = vpop.f32.mrb[77].mxu1 }
0x28f6   :  { %v2883_v59 = vpop.f32.mrb[78].mxu1 }
0x28f7   :  { %4135 = vtanh.f32 %v2886_v40  ;;  %v3783_v19 = vpop.f32.mrb[79].mxu1  ;;  %v3381_v57 = vmul.f32 -1.442695, %v2886_v40 }
0x28f8   :  { %4137 = vpow2.f32 %v3380_v2 }
0x2901   :  { %v4136_v22 = vpop.eup %4135 }
0x2902   :  { %2920 = vrot.lane.b32.xlu1 %v4136_v22, %s4171_s5  ;;  %v4138_v53 = vpop.eup %4137 }
0x2903   :  { %v2890_v49 = vadd.f32 1.0, %v4138_v53 }
0x2905   :  { %4139 = vrcp.f32 %v2890_v49 }
0x2906   :  { %4141 = vpow2.f32 %v3381_v57 }
0x290f   :  { %v4140_v7 = vpop.eup %4139 }
0x2910   :  { %v4142_v61 = vpop.eup %4141  ;;  %v2894_v43 = vmul.f32 %v4140_v7, %v5035_v50 }
0x2911   :  { %v2914_v54 = vadd.f32 1.0, %v4142_v61  ;;  %v4174_v61 = vmov 0.0|0.0  }
0x2912   :  { %3862 = vmatprep.subr.bf16.mxu1 %v4174_v61  ;;  %3850 = vmatprep.subr.bf16.mxu0 %v4174_v61 }
0x2913   :  { %4143 = vrcp.f32 %v2914_v54  ;;  %v3095_v54 = vld [vmem:[%s5202_s10 + $0x8] sm:$0xff] }
0x291d   :  { %v4144_v29 = vpop.eup %4143 }
0x291e   :  { %v2918_v42 = vmul.f32 %v4144_v29, %v5040_v41 }
0x2959   :  { %v2897_v63 = vpop.permute.xlu0 %2896 }
0x295a   :  { %v2899_v5 = vmul.f32 %v4140_v7, %v2897_v63 }
0x295c   :  { %2901 = vrot.lane.b32.xlu0 %v2899_v5, %s4172_s18 }
0x2974   :  { %v2921_v8 = vpop.permute.xlu1 %2920 }
0x2975   :  { %v2923_v18 = vmul.f32 %v4144_v29, %v2921_v8  ;;  %v3096_v8 = vld [vmem:[%s5202_s10 + $0x10] sm:$0xff] }
0x2977   :  { %2925 = vrot.lane.b32.xlu1 %v2923_v18, %s4172_s18  ;;  %v3097_v18 = vld [vmem:[%s5202_s10 + $0x18] sm:$0xff] }
0x29ce   :  { %v2902_v21 = vpop.permute.xlu0 %2901 }
0x29cf   :  { %v2904_v36 = vadd.f32 %v2902_v21, %v2894_v43  ;;  %v3866_v43 = vpack.c.bf16 %v3097_v18, %v3096_v8  ;;  %v3098_v21 = vld [vmem:[%s5202_s10 + $0x20] sm:$0xff] }
0x29d1   :  { %4145 = vtanh.f32 %v2904_v36 }
0x29db   :  { %v4146_v23 = vpop.eup %4145 }
0x29dc   :  { %2907 = vrot.lane.b32.xlu0 %v4146_v23, %s4171_s5 }
0x29e9   :  { %v2926_v25 = vpop.permute.xlu1 %2925 }
0x29ea   :  { %v2928_v27 = vadd.f32 %v2926_v25, %v2918_v42  ;;  %v3100_v42 = vld [vmem:[%s5202_s10 + $0x30] sm:$0xff]  ;;  %v3101_v25 = vld [vmem:[%s5202_s10 + $0x38] sm:$0xff] }
0x29ec   :  { %4147 = vtanh.f32 %v2928_v27 }
0x29f6   :  { %v4148_v28 = vpop.eup %4147 }
0x29f7   :  { %2931 = vrot.lane.b32.xlu1 %v4148_v28, %s4171_s5 }
0x2a4e   :  { %v2908_v48 = vpop.permute.xlu0 %2907 }
0x2a4f   :  { %v5080_v45 = vmul.f32 %v4140_v7, %v2908_v48 }
0x2a51   :  { %v2942_v31 = vpack.c.bf16 %v5080_v45, %v5080_v45 }
0x2a53   :  { %2944 = vrot.lane.b32.xlu0 %v2942_v31, %s4172_s18 }
0x2a69   :  { %v2932_v38 = vpop.permute.xlu1 %2931 }
0x2a6a   :  { %v5085_v33 = vmul.f32 %v4144_v29, %v2932_v38  ;;  %v3103_v38 = vld [vmem:[%s5203_s11] sm:$0xff] }
0x2a6c   :  { %v2991_v35 = vpack.c.bf16 %v5085_v33, %v5085_v33 }
0x2a6e   :  { %2993 = vrot.lane.b32.xlu1 %v2991_v35, %s4172_s18  ;;  %v3104_v35 = vld [vmem:[%s5203_s11 + $0x8] sm:$0xff] }
0x2ac5   :  { %v2945_v39 = vpop.permute.xlu0 %2944 }
0x2ac6   :  { %3789 = vmatmul.mubr.msk.bf16.vlgmr.msra.gmra.mrb[80].mxu0 %vm280_vm10, %v2945_v39  ;;  %v3105_v39 = vld [vmem:[%s5203_s11 + $0x10] sm:$0xff] }
0x2ac7   :  { %3816 = vmatprep.mubr.msk.f32.mxu0 %vm4170_vm9, %v4169_v20 }
0x2ae0   :  { %v2994_v50 = vpop.permute.xlu1 %2993 }
0x2ae1   :  { %3797 = vmatmul.mubr.msk.bf16.vlgmr.msra.gmra.mrb[80].mxu1 %vm280_vm10, %v2994_v50  ;;  %v3851_v50 = vpack.c.bf16 %v3104_v35, %v3103_v38 }
0x2ae2   :  { %3835 = vmatprep.mubr.msk.f32.mxu1 %vm4170_vm9, %v4169_v20 }
0x2ae3   :  { %3852 = vmatpush3.bf16.msra.mxu0 %v3851_v50 }
0x2ae4   :  { %3853 = vmatprep.subr.bf16.mxu0 %v4174_v61 }
0x2b99   :  { %v2983_v37 = vpop.f32.mrb[80].mxu0 }
0x2b9a   :  { %v2989_v0 = vadd.f32 %v2983_v37, %v4843_v62  ;;  %v3790_v17 = vpop.f32.mrb[81].mxu0  ;;  %v3106_v37 = vld [vmem:[%s5203_s11 + $0x18] sm:$0xff] }
0x2b9b   :  { %v2986_v41 = vpop.f32.mrb[82].mxu0  ;;  %v3107_v17 = vld [vmem:[%s5203_s11 + $0x20] sm:$0xff] }
0x2b9c   :  { %4149 = vtanh.f32 %v2989_v0  ;;  %v3791_v46 = vpop.f32.mrb[83].mxu0  ;;  %v3384_v20 = vmul.f32 -1.442695, %v2989_v0  ;;  %v3854_v0 = vpack.c.bf16 %v3106_v37, %v3105_v39  ;;  %v3108_v41 = vld [vmem:[%s5203_s11 + $0x28] sm:$0xff] }
0x2b9d   :  { %v3857_v46 = vpack.c.bf16 %v3108_v41, %v3107_v17 }
0x2b9e   :  { %3855 = vmatpush3.bf16.msra.mxu0 %v3854_v0 }
0x2b9f   :  { %3856 = vmatprep.subr.bf16.mxu0 %v4174_v61 }
0x2ba2   :  { %3858 = vmatpush3.bf16.msra.mxu0 %v3857_v46 }
0x2ba3   :  { %3859 = vmatprep.subr.bf16.mxu0 %v4174_v61 }
0x2ba6   :  { %v4150_v16 = vpop.eup %4149 }
0x2ba7   :  { %3048 = vrot.lane.b32.xlu0 %v4150_v16, %s4171_s5  ;;  %v3109_v16 = vld [vmem:[%s5203_s11 + $0x30] sm:$0xff] }
0x2bb4   :  { %v3032_v24 = vpop.f32.mrb[80].mxu1 }
0x2bb5   :  { %v3038_v1 = vadd.f32 %v3032_v24, %v4816_v47  ;;  %v3798_v11 = vpop.f32.mrb[81].mxu1 }
0x2bb6   :  { %v3035_v13 = vpop.f32.mrb[82].mxu1 }
0x2bb7   :  { %4151 = vtanh.f32 %v3038_v1  ;;  %v3799_v4 = vpop.f32.mrb[83].mxu1  ;;  %v3385_v52 = vmul.f32 -1.442695, %v3038_v1 }
0x2bb8   :  { %4153 = vpow2.f32 %v3384_v20 }
0x2bc1   :  { %v4152_v3 = vpop.eup %4151 }
0x2bc2   :  { %3072 = vrot.lane.b32.xlu1 %v4152_v3, %s4171_s5  ;;  %v4154_v62 = vpop.eup %4153 }
0x2bc3   :  { %v3042_v55 = vadd.f32 1.0, %v4154_v62 }
0x2bc5   :  { %4155 = vrcp.f32 %v3042_v55  ;;  %v3388_v55 = vld [vmem:[%s5204_s12] ss:$0 sm:$0xff] }
0x2bc6   :  { %4157 = vpow2.f32 %v3385_v52 }
0x2bcf   :  { %v4156_v26 = vpop.eup %4155 }
0x2bd0   :  { %v4158_v47 = vpop.eup %4157  ;;  %v3046_v10 = vmul.f32 %v4156_v26, %v2904_v36  ;;  %v3099_v36 = vld [vmem:[%s5202_s10 + $0x28] sm:$0xff] }
0x2bd1   :  { %v3066_v32 = vadd.f32 1.0, %v4158_v47  ;;  %v3869_v23 = vpack.c.bf16 %v3099_v36, %v3098_v21 }
0x2bd3   :  { %4159 = vrcp.f32 %v3066_v32 }
0x2bdd   :  { %v4160_v58 = vpop.eup %4159 }
0x2bde   :  { %v3070_v2 = vmul.f32 %v4160_v58, %v2928_v27  ;;  %v3872_v27 = vpack.c.bf16 %v3101_v25, %v3100_v42 }
0x2c19   :  { %v3049_v14 = vpop.permute.xlu0 %3048 }
0x2c1a   :  { %v3051_v9 = vmul.f32 %v4156_v26, %v3049_v14 }
0x2c1c   :  { %3053 = vrot.lane.b32.xlu0 %v3051_v9, %s4172_s18 }
0x2c34   :  { %v3073_v15 = vpop.permute.xlu1 %3072 }
0x2c35   :  { %v3075_v40 = vmul.f32 %v4160_v58, %v3073_v15 }
0x2c37   :  { %3077 = vrot.lane.b32.xlu1 %v3075_v40, %s4172_s18 }
0x2c8e   :  { %v3054_v59 = vpop.permute.xlu0 %3053 }
0x2c8f   :  { %v3056_v19 = vadd.f32 %v3054_v59, %v3046_v10 }
0x2c91   :  { %4161 = vtanh.f32 %v3056_v19 }
0x2c9b   :  { %v4162_v22 = vpop.eup %4161 }
0x2c9c   :  { %3059 = vrot.lane.b32.xlu0 %v4162_v22, %s4171_s5 }
0x2ca0   :  { %2022 = vrot.lane.b32.xlu0 %v4856_v34, %s4173_s7  ;;  %v3094_v34 = vld [vmem:[%s5202_s10] sm:$0xff] }
0x2ca1   :  { %v3863_v29 = vpack.c.bf16 %v3095_v54, %v3094_v34 }
0x2ca3   :  { %3864 = vmatpush3.bf16.msra.mxu1 %v3863_v29 }
0x2ca4   :  { %3865 = vmatprep.subr.bf16.mxu1 %v4174_v61 }
0x2ca7   :  { %3867 = vmatpush3.bf16.msra.mxu1 %v3866_v43 }
0x2ca8   :  { %3868 = vmatprep.subr.bf16.mxu1 %v4174_v61 }
0x2ca9   :  { %v3078_v53 = vpop.permute.xlu1 %3077 }
0x2caa   :  { %v3080_v49 = vadd.f32 %v3078_v53, %v3070_v2 }
0x2cab   :  { %3870 = vmatpush3.bf16.msra.mxu1 %v3869_v23 }
0x2cac   :  { %4163 = vtanh.f32 %v3080_v49  ;;  %3871 = vmatprep.subr.bf16.mxu1 %v4174_v61 }
0x2caf   :  { %3873 = vmatpush3.bf16.msra.mxu1 %v3872_v27 }
0x2cb6   :  { %v4164_v57 = vpop.eup %4163 }
0x2cb7   :  { %3083 = vrot.lane.b32.xlu1 %v4164_v57, %s4171_s5 }
0x2d0e   :  { %v3060_v7 = vpop.permute.xlu0 %3059 }
0x2d0f   :  { %v3062_v63 = vmul.f32 %v4156_v26, %v3060_v7 }
0x2d11   :  { %3088 = vrot.lane.b32.xlu1 %v3062_v63, %s4173_s7 }
0x2d12   :  { %v2023_v5 = vpop.permute.xlu0 %2022 }
0x2d13   :  { %2026 = vst.msk [vmem:[#allocation3] sm:$0xff] %vm2025_vm14, %v2023_v5 }
0x2d29   :  { %v3084_v28 = vpop.permute.xlu1 %3083 }
0x2d2a   :  { %v3086_v48 = vmul.f32 %v4160_v58, %v3084_v28 }
0x2d2c   :  { %3092 = vst.msk [vmem:[#allocation3] sm:$0xff] %vm2027_vm13, %v3086_v48 }
0x2d33   :  { %v3093_v31 = vld [vmem:[#allocation3] sm:$0xff] }
0x2d34   :  { %3187 = vrot.lane.b32.xlu1 %v3093_v31, %s4171_s5 }
0x2d38   :  { %2328 = vrot.lane.b32.xlu1 %v4930_v44, %s4173_s7  ;;  %v3110_v44 = vld [vmem:[%s5203_s11 + $0x38] sm:$0xff] }
0x2d39   :  { %v3860_v24 = vpack.c.bf16 %v3110_v44, %v3109_v16 }
0x2d3b   :  { %3861 = vmatpush3.bf16.msra.mxu0 %v3860_v24 }
0x2d3c   :  { %2632 = vrot.lane.b32.xlu1 %v5004_v51, %s4173_s7 }
0x2d40   :  { %2936 = vrot.lane.b32.xlu1 %v5080_v45, %s4173_s7 }
0x2d83   :  { %v3089_v1 = vpop.permute.xlu1 %3088 }
0x2d84   :  { %3091 = vst.msk [vmem:[#allocation3 + $0x38] sm:$0xff] %vm2025_vm14, %v3089_v1 }
0x2d8b   :  { %v3102_v51 = vld [vmem:[#allocation3 + $0x38] sm:$0xff] }
0x2d8c   :  { %3112 = vrot.lane.b32.xlu0 %v3102_v51, %s4171_s5 }
0x2d90   :  { %2176 = vrot.lane.b32.xlu0 %v4893_v12, %s4173_s7 }
0x2d94   :  { %2480 = vrot.lane.b32.xlu0 %v4967_v60, %s4173_s7 }
0x2d98   :  { %2784 = vrot.lane.b32.xlu0 %v5044_v30, %s4173_s7 }
0x2da6   :  { %v3188_v11 = vpop.permute.xlu1 %3187 }
0x2da7   :  { %3836 = vmatmul.mubr.msk.f32.vlgmr.msra.gmra.mrb[84].mxu1 %vm1755_vm12, %v3188_v11 }
0x2daa   :  { %v2329_v45 = vpop.permute.xlu1 %2328 }
0x2dab   :  { %2331 = vst.msk [vmem:[#allocation3 + $0x10] sm:$0xff] %vm2025_vm14, %v2329_v45 }
0x2dac   :  { %2788 = vst.msk [vmem:[#allocation3 + $0x10] sm:$0xff] %vm2027_vm13, %v5049_v6 }
0x2dae   :  { %v2633_v13 = vpop.permute.xlu1 %2632 }
0x2daf   :  { %2635 = vst.msk [vmem:[#allocation3 + $0x20] sm:$0xff] %vm2025_vm14, %v2633_v13 }
0x2db2   :  { %v2937_v4 = vpop.permute.xlu1 %2936 }
0x2db3   :  { %2939 = vst.msk [vmem:[#allocation3 + $0x30] sm:$0xff] %vm2025_vm14, %v2937_v4 }
0x2dfe   :  { %v3113_v12 = vpop.permute.xlu0 %3112 }
0x2dff   :  { %3817 = vmatmul.mubr.msk.f32.vlgmr.msra.gmra.mrb[84].mxu0 %vm1755_vm12, %v3113_v12 }
0x2e02   :  { %v2177_v60 = vpop.permute.xlu0 %2176 }
0x2e03   :  { %2179 = vst.msk [vmem:[#allocation3 + $0x8] sm:$0xff] %vm2025_vm14, %v2177_v60 }
0x2e04   :  { %2940 = vst.msk [vmem:[#allocation3 + $0x8] sm:$0xff] %vm2027_vm13, %v5085_v33 }
0x2e06   :  { %v2481_v30 = vpop.permute.xlu0 %2480 }
0x2e07   :  { %2483 = vst.msk [vmem:[#allocation3 + $0x18] sm:$0xff] %vm2025_vm14, %v2481_v30 }
0x2e08   :  { %2636 = vst.msk [vmem:[#allocation3 + $0x18] sm:$0xff] %vm2027_vm13, %v5009_v56 }
0x2e0a   :  { %v2785_v6 = vpop.permute.xlu0 %2784 }
0x2e0b   :  { %2787 = vst.msk [vmem:[#allocation3 + $0x28] sm:$0xff] %vm2025_vm14, %v2785_v6 }
0x2e7a   :  { %v3257_v3 = vpop.f32.mrb[84].mxu1 }
0x2e7b   :  { %v3837_v20 = vpop.f32.mrb[85].mxu1 }
0x2ed2   :  { %v3182_v62 = vpop.f32.mrb[84].mxu0 }
0x2ed3   :  { %v3258_v52 = vadd.f32 %v3257_v3, %v3182_v62  ;;  %v3818_v26 = vpop.f32.mrb[85].mxu0 }
0x2ed5   :  { %v3268_v33 = vadd.f32 %v3388_v55, %v3258_v52 }
0x2ed7   :  { %3270 = vst.msk [vmem:[%s5205_s13] sm:$0xff] %vm3269_vm15, %v3268_v33 }

</bundles_post_ra>
